<compile_context>
chip_gen: v7x
topology: tpu7x:2x2x1
jax: 0.10.0
libtpu: 0.0.40
codegen_flags: <defaults>
</compile_context>

<pallas_src>
import jax
import jax.numpy as jnp
from jax.experimental import pallas as pl
from jax.experimental.pallas import tpu as pltpu

B = 2        # batch
T_IN = 8     # input sequence length
T_OUT = 8    # output sequence length
E = 32       # embedding dim
H = 32       # LSTM hidden dim
V_IN = 16    # input vocab
V_OUT = 16   # output vocab
NEG_INF = -1e9


def encdec_kernel(inp_ref, tgt_ref, emb_in_ref, emb_out_ref,
                  enc_w_ref, enc_b_ref, dec_w_ref, dec_b_ref,
                  out_w_ref, out_b_ref, probs_ref):
    inp = inp_ref[...]                                    # (B, T_IN)  int32
    tgt = tgt_ref[...]                                    # (B, T_OUT) int32
    emb_in = emb_in_ref[...]                              # (V_IN, E)
    emb_out = emb_out_ref[...]                            # (V_OUT, E)
    enc_w = enc_w_ref[...]                                # (E+H, 4H)
    enc_b = enc_b_ref[...]                                # (1, 4H)
    dec_w = dec_w_ref[...]                                # (E+H, 4H)
    dec_b = dec_b_ref[...]                                # (1, 4H)
    out_w = out_w_ref[...]                                # (2H, V_OUT)
    out_b = out_b_ref[...]                                # (1, V_OUT)

    # ctx mask (padding id == 0): 1.0 = real token, 0.0 = padding
    valid = (inp != 0).astype(jnp.float32)                # (B, T_IN)
    cmask_add = (1.0 - valid) * NEG_INF                   # additive attn mask

    iota_vin = jax.lax.broadcasted_iota(jnp.int32, (1, V_IN), 1)
    iota_vout = jax.lax.broadcasted_iota(jnp.int32, (1, V_OUT), 1)
    # lane mask selecting the g-gate lanes of the 4H-wide gate slab
    lane = jax.lax.broadcasted_iota(jnp.int32, (B, 4 * H), 1)
    g_lane = (lane >= 2 * H) & (lane < 3 * H)

    def lstm_step(x_t, h_prev, c_prev, w_gates, b_gates):
        # fused gate matmul: [x ; h_prev] @ W  -> (B, 4H), one MXU pass (K = E+H = 64)
        xh = jnp.concatenate([x_t, h_prev], axis=1)
        gates = jnp.dot(xh, w_gates, preferred_element_type=jnp.float32) + b_gates
        # one sigmoid + one tanh over the whole 128-lane slab, blend g lanes
        act = jnp.where(g_lane, jnp.tanh(gates), jax.nn.sigmoid(gates))
        i = act[:, 0 * H:1 * H]
        f = act[:, 1 * H:2 * H]
        g = act[:, 2 * H:3 * H]
        o = act[:, 3 * H:4 * H]
        c_new = f * c_prev + i * g
        h_new = o * jnp.tanh(c_new)
        return h_new, c_new

    # ---------------------------------------------------------- encoder ----
    h = jnp.zeros((B, H), jnp.float32)
    c = jnp.zeros((B, H), jnp.float32)
    ctx_steps = []
    for t in range(T_IN):                                 # serial recurrence, fully unrolled
        onehot = (inp[:, t:t + 1] == iota_vin).astype(jnp.float32)          # (B, V_IN)
        x_t = jnp.dot(onehot, emb_in, preferred_element_type=jnp.float32)   # (B, E)
        h_new, c_new = lstm_step(x_t, h, c, enc_w, enc_b)
        m = valid[:, t:t + 1]                             # (B, 1)
        # padded steps carry the previous state -> final (h, c) = last valid step
        h = jnp.where(m > 0.0, h_new, h)
        c = jnp.where(m > 0.0, c_new, c)
        ctx_steps.append(h)                               # all hidden states -> ctx
    ctx = jnp.stack(ctx_steps, axis=1)                    # (B, T_IN, H), stays in VMEM/vregs

    # ---------------------------------------------------------- decoder ----
    hd, cd = h, c                                         # seed from encoder final states
    step_probs = []
    for s in range(T_OUT):
        onehot = (tgt[:, s:s + 1] == iota_vout).astype(jnp.float32)         # (B, V_OUT)
        y_t = jnp.dot(onehot, emb_out, preferred_element_type=jnp.float32)  # (B, E)
        hd, cd = lstm_step(y_t, hd, cd, dec_w, dec_b)

        # masked dot-product attention: VPU multiply + XLU reduce (MXU stays free)
        scores = jnp.sum(ctx * hd[:, None, :], axis=-1) + cmask_add          # (B, T_IN)
        scores = scores - jnp.max(scores, axis=-1, keepdims=True)
        w_att = jnp.exp(scores)
        alpha = w_att * pl.reciprocal(jnp.sum(w_att, axis=-1, keepdims=True),
                                      approx=True)
        cvec = jnp.sum(alpha[:, :, None] * ctx, axis=1)                      # (B, H)

        # fused output projection of [h ; ctx_vec] + softmax
        hc = jnp.concatenate([hd, cvec], axis=1)                             # (B, 2H)
        logits = jnp.dot(hc, out_w, preferred_element_type=jnp.float32) + out_b
        logits = logits - jnp.max(logits, axis=-1, keepdims=True)
        e = jnp.exp(logits)
        p = e * pl.reciprocal(jnp.sum(e, axis=-1, keepdims=True), approx=True)
        step_probs.append(p)

    # single store of all decode steps (one DMA instead of T_OUT small ones)
    probs_ref[...] = jnp.stack(step_probs, axis=1)        # (B, T_OUT, V_OUT)


def encdec_forward(inpseq, outseq, p):
    vmem = pl.BlockSpec(memory_space=pltpu.MemorySpace.VMEM)
    return pl.pallas_call(
        encdec_kernel,
        out_shape=jax.ShapeDtypeStruct((B, T_OUT, V_OUT), jnp.float32),
        in_specs=[vmem] * 10,
        out_specs=vmem,
    )(inpseq.astype(jnp.int32), outseq.astype(jnp.int32),
      p["emb_in"], p["emb_out"],
      p["enc_w"], p["enc_b"],
      p["dec_w"], p["dec_b"],
      p["out_w"], p["out_b"])


def init_params(key):
    ks = jax.random.split(key, 8)
    s = 0.1
    return {
        "emb_in":  jax.random.normal(ks[0], (V_IN, E), jnp.float32) * s,
        "emb_out": jax.random.normal(ks[1], (V_OUT, E), jnp.float32) * s,
        # gate weights pre-fused: rows [0:E) act on x, rows [E:E+H) act on h_prev
        "enc_w":   jax.random.normal(ks[2], (E + H, 4 * H), jnp.float32) * s,
        "enc_b":   jnp.zeros((1, 4 * H), jnp.float32),
        "dec_w":   jax.random.normal(ks[3], (E + H, 4 * H), jnp.float32) * s,
        "dec_b":   jnp.zeros((1, 4 * H), jnp.float32),
        # output projection pre-fused: rows [0:H) for h, rows [H:2H) for ctx_vec
        "out_w":   jax.random.normal(ks[4], (2 * H, V_OUT), jnp.float32) * s,
        "out_b":   jnp.zeros((1, V_OUT), jnp.float32),
    }


if __name__ == "__main__":
    key = jax.random.PRNGKey(0)
    kp, k1, k2 = jax.random.split(key, 3)
    params = init_params(kp)

    inpseq = jax.random.randint(k1, (B, T_IN), 1, V_IN)
    inpseq = inpseq.at[1, 5:].set(0)          # pad tail of second example
    outseq = jax.random.randint(k2, (B, T_OUT), 1, V_OUT)

    fwd = jax.jit(encdec_forward)
    outprobs = jax.block_until_ready(fwd(inpseq, outseq, params))

    assert outprobs.shape == (B, T_OUT, V_OUT)
    assert bool(jnp.all(jnp.isfinite(outprobs)))
    row_sums = jnp.sum(outprobs, axis=-1)
    # approx EUP reciprocal in the softmax -> allow a slightly looser tolerance
    assert bool(jnp.allclose(row_sums, 1.0, atol=5e-3))
    print("KERNEL_OK")
</pallas_src>

<mosaic_0001>
module attributes {stable_mosaic.version = 11 : i64} {
  func.func @encdec_kernel(%arg0: memref<2x8xi32, #tpu.memory_space<vmem>>, %arg1: memref<2x8xi32, #tpu.memory_space<vmem>>, %arg2: memref<16x32xf32, #tpu.memory_space<vmem>>, %arg3: memref<16x32xf32, #tpu.memory_space<vmem>>, %arg4: memref<64x128xf32, #tpu.memory_space<vmem>>, %arg5: memref<1x128xf32, #tpu.memory_space<vmem>>, %arg6: memref<64x128xf32, #tpu.memory_space<vmem>>, %arg7: memref<1x128xf32, #tpu.memory_space<vmem>>, %arg8: memref<64x16xf32, #tpu.memory_space<vmem>>, %arg9: memref<1x16xf32, #tpu.memory_space<vmem>>, %arg10: memref<2x8x16xf32, #tpu.memory_space<vmem>>) attributes {dimension_semantics = [], scalar_prefetch = 0 : i64, scratch_operands = 0 : i64, tpu.core_type = #tpu.core_type<tc>} {
    %c0 = arith.constant 0 : index
    %c0_0 = arith.constant 0 : index
    %0 = vector.load %arg0[%c0, %c0_0] : memref<2x8xi32, #tpu.memory_space<vmem>>, vector<2x8xi32>
    %c0_1 = arith.constant 0 : index
    %c0_2 = arith.constant 0 : index
    %1 = vector.load %arg1[%c0_1, %c0_2] : memref<2x8xi32, #tpu.memory_space<vmem>>, vector<2x8xi32>
    %c0_3 = arith.constant 0 : index
    %c0_4 = arith.constant 0 : index
    %2 = vector.load %arg2[%c0_3, %c0_4] : memref<16x32xf32, #tpu.memory_space<vmem>>, vector<16x32xf32>
    %c0_5 = arith.constant 0 : index
    %c0_6 = arith.constant 0 : index
    %3 = vector.load %arg3[%c0_5, %c0_6] : memref<16x32xf32, #tpu.memory_space<vmem>>, vector<16x32xf32>
    %c0_7 = arith.constant 0 : index
    %c0_8 = arith.constant 0 : index
    %4 = vector.load %arg4[%c0_7, %c0_8] : memref<64x128xf32, #tpu.memory_space<vmem>>, vector<64x128xf32>
    %c0_9 = arith.constant 0 : index
    %c0_10 = arith.constant 0 : index
    %5 = vector.load %arg5[%c0_9, %c0_10] : memref<1x128xf32, #tpu.memory_space<vmem>>, vector<1x128xf32>
    %c0_11 = arith.constant 0 : index
    %c0_12 = arith.constant 0 : index
    %6 = vector.load %arg6[%c0_11, %c0_12] : memref<64x128xf32, #tpu.memory_space<vmem>>, vector<64x128xf32>
    %c0_13 = arith.constant 0 : index
    %c0_14 = arith.constant 0 : index
    %7 = vector.load %arg7[%c0_13, %c0_14] : memref<1x128xf32, #tpu.memory_space<vmem>>, vector<1x128xf32>
    %c0_15 = arith.constant 0 : index
    %c0_16 = arith.constant 0 : index
    %8 = vector.load %arg8[%c0_15, %c0_16] : memref<64x16xf32, #tpu.memory_space<vmem>>, vector<64x16xf32>
    %c0_17 = arith.constant 0 : index
    %c0_18 = arith.constant 0 : index
    %9 = vector.load %arg9[%c0_17, %c0_18] : memref<1x16xf32, #tpu.memory_space<vmem>>, vector<1x16xf32>
    %c0_i32 = arith.constant 0 : i32
    %10 = vector.broadcast %c0_i32 : i32 to vector<2x8xi32>
    %11 = arith.cmpi ne, %0, %10 : vector<2x8xi32>
    %12 = arith.extui %11 : vector<2x8xi1> to vector<2x8xi32>
    %13 = arith.sitofp %12 : vector<2x8xi32> to vector<2x8xf32>
    %cst = arith.constant 1.000000e+00 : f32
    %14 = vector.broadcast %cst : f32 to vector<2x8xf32>
    %15 = arith.subf %14, %13 : vector<2x8xf32>
    %cst_19 = arith.constant -1.000000e+09 : f32
    %16 = vector.broadcast %cst_19 : f32 to vector<2x8xf32>
    %17 = arith.mulf %15, %16 : vector<2x8xf32>
    %18 = tpu.iota {dimensions = array<i32: 1>} : vector<1x16xi32>
    %19 = tpu.iota {dimensions = array<i32: 1>} : vector<1x16xi32>
    %20 = tpu.iota {dimensions = array<i32: 1>} : vector<2x128xi32>
    %c64_i32 = arith.constant 64 : i32
    %21 = vector.broadcast %c64_i32 : i32 to vector<2x128xi32>
    %22 = arith.cmpi sge, %20, %21 : vector<2x128xi32>
    %c96_i32 = arith.constant 96 : i32
    %23 = vector.broadcast %c96_i32 : i32 to vector<2x128xi32>
    %24 = arith.cmpi slt, %20, %23 : vector<2x128xi32>
    %25 = arith.andi %22, %24 : vector<2x128xi1>
    %cst_20 = arith.constant 0.000000e+00 : f32
    %26 = vector.broadcast %cst_20 : f32 to vector<2x32xf32>
    %cst_21 = arith.constant 0.000000e+00 : f32
    %27 = vector.broadcast %cst_21 : f32 to vector<2x32xf32>
    %28 = vector.extract_strided_slice %0 {offsets = [0, 0], sizes = [2, 1], strides = [1, 1]} : vector<2x8xi32> to vector<2x1xi32>
    %29 = vector.broadcast %28 : vector<2x1xi32> to vector<2x16xi32>
    %30 = vector.broadcast %18 : vector<1x16xi32> to vector<2x16xi32>
    %31 = arith.cmpi eq, %29, %30 : vector<2x16xi32>
    %32 = arith.extui %31 : vector<2x16xi1> to vector<2x16xi32>
    %33 = arith.sitofp %32 : vector<2x16xi32> to vector<2x16xf32>
    %cst_22 = arith.constant dense<0.000000e+00> : vector<2x32xf32>
    %34 = tpu.matmul %33, %2, %cst_22 {dimension_numbers = #tpu.dot_dimension_numbers<[1], [0], [0], [1], [0, 0, 1, 1], [], []>} : vector<2x16xf32>, vector<16x32xf32>, vector<2x32xf32> -> vector<2x32xf32>
    %35 = tpu.concatenate %34, %26 in 1 : vector<2x32xf32>, vector<2x32xf32> -> vector<2x64xf32>
    %cst_23 = arith.constant dense<0.000000e+00> : vector<2x128xf32>
    %36 = tpu.matmul %35, %4, %cst_23 {dimension_numbers = #tpu.dot_dimension_numbers<[1], [0], [0], [1], [0, 0, 1, 1], [], []>} : vector<2x64xf32>, vector<64x128xf32>, vector<2x128xf32> -> vector<2x128xf32>
    %37 = vector.broadcast %5 : vector<1x128xf32> to vector<2x128xf32>
    %38 = arith.addf %36, %37 : vector<2x128xf32>
    %39 = math.tanh %38 : vector<2x128xf32>
    %40 = arith.negf %38 : vector<2x128xf32>
    %41 = math.exp %40 : vector<2x128xf32>
    %cst_24 = arith.constant 1.000000e+00 : f32
    %42 = vector.broadcast %cst_24 : f32 to vector<2x128xf32>
    %43 = arith.addf %42, %41 : vector<2x128xf32>
    %44 = arith.divf %42, %43 : vector<2x128xf32>
    %45 = arith.select %25, %39, %44 : vector<2x128xi1>, vector<2x128xf32>
    %46 = vector.extract_strided_slice %45 {offsets = [0, 0], sizes = [2, 32], strides = [1, 1]} : vector<2x128xf32> to vector<2x32xf32>
    %47 = vector.extract_strided_slice %45 {offsets = [0, 32], sizes = [2, 32], strides = [1, 1]} : vector<2x128xf32> to vector<2x32xf32>
    %48 = vector.extract_strided_slice %45 {offsets = [0, 64], sizes = [2, 32], strides = [1, 1]} : vector<2x128xf32> to vector<2x32xf32>
    %49 = vector.extract_strided_slice %45 {offsets = [0, 96], sizes = [2, 32], strides = [1, 1]} : vector<2x128xf32> to vector<2x32xf32>
    %50 = arith.mulf %47, %27 : vector<2x32xf32>
    %51 = arith.mulf %46, %48 : vector<2x32xf32>
    %52 = arith.addf %50, %51 : vector<2x32xf32>
    %53 = math.tanh %52 : vector<2x32xf32>
    %54 = arith.mulf %49, %53 : vector<2x32xf32>
    %55 = vector.extract_strided_slice %13 {offsets = [0, 0], sizes = [2, 1], strides = [1, 1]} : vector<2x8xf32> to vector<2x1xf32>
    %cst_25 = arith.constant 0.000000e+00 : f32
    %56 = vector.broadcast %cst_25 : f32 to vector<2x1xf32>
    %57 = arith.cmpf ogt, %55, %56 : vector<2x1xf32>
    %58 = vector.shape_cast %57 : vector<2x1xi1> to vector<2x1xi1>
    %59 = vector.broadcast %58 : vector<2x1xi1> to vector<2x32xi1>
    %60 = arith.select %59, %54, %26 : vector<2x32xi1>, vector<2x32xf32>
    %cst_26 = arith.constant 0.000000e+00 : f32
    %61 = vector.broadcast %cst_26 : f32 to vector<2x1xf32>
    %62 = arith.cmpf ogt, %55, %61 : vector<2x1xf32>
    %63 = vector.shape_cast %62 : vector<2x1xi1> to vector<2x1xi1>
    %64 = vector.broadcast %63 : vector<2x1xi1> to vector<2x32xi1>
    %65 = arith.select %64, %52, %27 : vector<2x32xi1>, vector<2x32xf32>
    %66 = vector.extract_strided_slice %0 {offsets = [0, 1], sizes = [2, 1], strides = [1, 1]} : vector<2x8xi32> to vector<2x1xi32>
    %67 = vector.broadcast %66 : vector<2x1xi32> to vector<2x16xi32>
    %68 = vector.broadcast %18 : vector<1x16xi32> to vector<2x16xi32>
    %69 = arith.cmpi eq, %67, %68 : vector<2x16xi32>
    %70 = arith.extui %69 : vector<2x16xi1> to vector<2x16xi32>
    %71 = arith.sitofp %70 : vector<2x16xi32> to vector<2x16xf32>
    %cst_27 = arith.constant dense<0.000000e+00> : vector<2x32xf32>
    %72 = tpu.matmul %71, %2, %cst_27 {dimension_numbers = #tpu.dot_dimension_numbers<[1], [0], [0], [1], [0, 0, 1, 1], [], []>} : vector<2x16xf32>, vector<16x32xf32>, vector<2x32xf32> -> vector<2x32xf32>
    %73 = tpu.concatenate %72, %60 in 1 : vector<2x32xf32>, vector<2x32xf32> -> vector<2x64xf32>
    %cst_28 = arith.constant dense<0.000000e+00> : vector<2x128xf32>
    %74 = tpu.matmul %73, %4, %cst_28 {dimension_numbers = #tpu.dot_dimension_numbers<[1], [0], [0], [1], [0, 0, 1, 1], [], []>} : vector<2x64xf32>, vector<64x128xf32>, vector<2x128xf32> -> vector<2x128xf32>
    %75 = vector.broadcast %5 : vector<1x128xf32> to vector<2x128xf32>
    %76 = arith.addf %74, %75 : vector<2x128xf32>
    %77 = math.tanh %76 : vector<2x128xf32>
    %78 = arith.negf %76 : vector<2x128xf32>
    %79 = math.exp %78 : vector<2x128xf32>
    %cst_29 = arith.constant 1.000000e+00 : f32
    %80 = vector.broadcast %cst_29 : f32 to vector<2x128xf32>
    %81 = arith.addf %80, %79 : vector<2x128xf32>
    %82 = arith.divf %80, %81 : vector<2x128xf32>
    %83 = arith.select %25, %77, %82 : vector<2x128xi1>, vector<2x128xf32>
    %84 = vector.extract_strided_slice %83 {offsets = [0, 0], sizes = [2, 32], strides = [1, 1]} : vector<2x128xf32> to vector<2x32xf32>
    %85 = vector.extract_strided_slice %83 {offsets = [0, 32], sizes = [2, 32], strides = [1, 1]} : vector<2x128xf32> to vector<2x32xf32>
    %86 = vector.extract_strided_slice %83 {offsets = [0, 64], sizes = [2, 32], strides = [1, 1]} : vector<2x128xf32> to vector<2x32xf32>
    %87 = vector.extract_strided_slice %83 {offsets = [0, 96], sizes = [2, 32], strides = [1, 1]} : vector<2x128xf32> to vector<2x32xf32>
    %88 = arith.mulf %85, %65 : vector<2x32xf32>
    %89 = arith.mulf %84, %86 : vector<2x32xf32>
    %90 = arith.addf %88, %89 : vector<2x32xf32>
    %91 = math.tanh %90 : vector<2x32xf32>
    %92 = arith.mulf %87, %91 : vector<2x32xf32>
    %93 = vector.extract_strided_slice %13 {offsets = [0, 1], sizes = [2, 1], strides = [1, 1]} : vector<2x8xf32> to vector<2x1xf32>
    %cst_30 = arith.constant 0.000000e+00 : f32
    %94 = vector.broadcast %cst_30 : f32 to vector<2x1xf32>
    %95 = arith.cmpf ogt, %93, %94 : vector<2x1xf32>
    %96 = vector.shape_cast %95 : vector<2x1xi1> to vector<2x1xi1>
    %97 = vector.broadcast %96 : vector<2x1xi1> to vector<2x32xi1>
    %98 = arith.select %97, %92, %60 : vector<2x32xi1>, vector<2x32xf32>
    %cst_31 = arith.constant 0.000000e+00 : f32
    %99 = vector.broadcast %cst_31 : f32 to vector<2x1xf32>
    %100 = arith.cmpf ogt, %93, %99 : vector<2x1xf32>
    %101 = vector.shape_cast %100 : vector<2x1xi1> to vector<2x1xi1>
    %102 = vector.broadcast %101 : vector<2x1xi1> to vector<2x32xi1>
    %103 = arith.select %102, %90, %65 : vector<2x32xi1>, vector<2x32xf32>
    %104 = vector.extract_strided_slice %0 {offsets = [0, 2], sizes = [2, 1], strides = [1, 1]} : vector<2x8xi32> to vector<2x1xi32>
    %105 = vector.broadcast %104 : vector<2x1xi32> to vector<2x16xi32>
    %106 = vector.broadcast %18 : vector<1x16xi32> to vector<2x16xi32>
    %107 = arith.cmpi eq, %105, %106 : vector<2x16xi32>
    %108 = arith.extui %107 : vector<2x16xi1> to vector<2x16xi32>
    %109 = arith.sitofp %108 : vector<2x16xi32> to vector<2x16xf32>
    %cst_32 = arith.constant dense<0.000000e+00> : vector<2x32xf32>
    %110 = tpu.matmul %109, %2, %cst_32 {dimension_numbers = #tpu.dot_dimension_numbers<[1], [0], [0], [1], [0, 0, 1, 1], [], []>} : vector<2x16xf32>, vector<16x32xf32>, vector<2x32xf32> -> vector<2x32xf32>
    %111 = tpu.concatenate %110, %98 in 1 : vector<2x32xf32>, vector<2x32xf32> -> vector<2x64xf32>
    %cst_33 = arith.constant dense<0.000000e+00> : vector<2x128xf32>
    %112 = tpu.matmul %111, %4, %cst_33 {dimension_numbers = #tpu.dot_dimension_numbers<[1], [0], [0], [1], [0, 0, 1, 1], [], []>} : vector<2x64xf32>, vector<64x128xf32>, vector<2x128xf32> -> vector<2x128xf32>
    %113 = vector.broadcast %5 : vector<1x128xf32> to vector<2x128xf32>
    %114 = arith.addf %112, %113 : vector<2x128xf32>
    %115 = math.tanh %114 : vector<2x128xf32>
    %116 = arith.negf %114 : vector<2x128xf32>
    %117 = math.exp %116 : vector<2x128xf32>
    %cst_34 = arith.constant 1.000000e+00 : f32
    %118 = vector.broadcast %cst_34 : f32 to vector<2x128xf32>
    %119 = arith.addf %118, %117 : vector<2x128xf32>
    %120 = arith.divf %118, %119 : vector<2x128xf32>
    %121 = arith.select %25, %115, %120 : vector<2x128xi1>, vector<2x128xf32>
    %122 = vector.extract_strided_slice %121 {offsets = [0, 0], sizes = [2, 32], strides = [1, 1]} : vector<2x128xf32> to vector<2x32xf32>
    %123 = vector.extract_strided_slice %121 {offsets = [0, 32], sizes = [2, 32], strides = [1, 1]} : vector<2x128xf32> to vector<2x32xf32>
    %124 = vector.extract_strided_slice %121 {offsets = [0, 64], sizes = [2, 32], strides = [1, 1]} : vector<2x128xf32> to vector<2x32xf32>
    %125 = vector.extract_strided_slice %121 {offsets = [0, 96], sizes = [2, 32], strides = [1, 1]} : vector<2x128xf32> to vector<2x32xf32>
    %126 = arith.mulf %123, %103 : vector<2x32xf32>
    %127 = arith.mulf %122, %124 : vector<2x32xf32>
    %128 = arith.addf %126, %127 : vector<2x32xf32>
    %129 = math.tanh %128 : vector<2x32xf32>
    %130 = arith.mulf %125, %129 : vector<2x32xf32>
    %131 = vector.extract_strided_slice %13 {offsets = [0, 2], sizes = [2, 1], strides = [1, 1]} : vector<2x8xf32> to vector<2x1xf32>
    %cst_35 = arith.constant 0.000000e+00 : f32
    %132 = vector.broadcast %cst_35 : f32 to vector<2x1xf32>
    %133 = arith.cmpf ogt, %131, %132 : vector<2x1xf32>
    %134 = vector.shape_cast %133 : vector<2x1xi1> to vector<2x1xi1>
    %135 = vector.broadcast %134 : vector<2x1xi1> to vector<2x32xi1>
    %136 = arith.select %135, %130, %98 : vector<2x32xi1>, vector<2x32xf32>
    %cst_36 = arith.constant 0.000000e+00 : f32
    %137 = vector.broadcast %cst_36 : f32 to vector<2x1xf32>
    %138 = arith.cmpf ogt, %131, %137 : vector<2x1xf32>
    %139 = vector.shape_cast %138 : vector<2x1xi1> to vector<2x1xi1>
    %140 = vector.broadcast %139 : vector<2x1xi1> to vector<2x32xi1>
    %141 = arith.select %140, %128, %103 : vector<2x32xi1>, vector<2x32xf32>
    %142 = vector.extract_strided_slice %0 {offsets = [0, 3], sizes = [2, 1], strides = [1, 1]} : vector<2x8xi32> to vector<2x1xi32>
    %143 = vector.broadcast %142 : vector<2x1xi32> to vector<2x16xi32>
    %144 = vector.broadcast %18 : vector<1x16xi32> to vector<2x16xi32>
    %145 = arith.cmpi eq, %143, %144 : vector<2x16xi32>
    %146 = arith.extui %145 : vector<2x16xi1> to vector<2x16xi32>
    %147 = arith.sitofp %146 : vector<2x16xi32> to vector<2x16xf32>
    %cst_37 = arith.constant dense<0.000000e+00> : vector<2x32xf32>
    %148 = tpu.matmul %147, %2, %cst_37 {dimension_numbers = #tpu.dot_dimension_numbers<[1], [0], [0], [1], [0, 0, 1, 1], [], []>} : vector<2x16xf32>, vector<16x32xf32>, vector<2x32xf32> -> vector<2x32xf32>
    %149 = tpu.concatenate %148, %136 in 1 : vector<2x32xf32>, vector<2x32xf32> -> vector<2x64xf32>
    %cst_38 = arith.constant dense<0.000000e+00> : vector<2x128xf32>
    %150 = tpu.matmul %149, %4, %cst_38 {dimension_numbers = #tpu.dot_dimension_numbers<[1], [0], [0], [1], [0, 0, 1, 1], [], []>} : vector<2x64xf32>, vector<64x128xf32>, vector<2x128xf32> -> vector<2x128xf32>
    %151 = vector.broadcast %5 : vector<1x128xf32> to vector<2x128xf32>
    %152 = arith.addf %150, %151 : vector<2x128xf32>
    %153 = math.tanh %152 : vector<2x128xf32>
    %154 = arith.negf %152 : vector<2x128xf32>
    %155 = math.exp %154 : vector<2x128xf32>
    %cst_39 = arith.constant 1.000000e+00 : f32
    %156 = vector.broadcast %cst_39 : f32 to vector<2x128xf32>
    %157 = arith.addf %156, %155 : vector<2x128xf32>
    %158 = arith.divf %156, %157 : vector<2x128xf32>
    %159 = arith.select %25, %153, %158 : vector<2x128xi1>, vector<2x128xf32>
    %160 = vector.extract_strided_slice %159 {offsets = [0, 0], sizes = [2, 32], strides = [1, 1]} : vector<2x128xf32> to vector<2x32xf32>
    %161 = vector.extract_strided_slice %159 {offsets = [0, 32], sizes = [2, 32], strides = [1, 1]} : vector<2x128xf32> to vector<2x32xf32>
    %162 = vector.extract_strided_slice %159 {offsets = [0, 64], sizes = [2, 32], strides = [1, 1]} : vector<2x128xf32> to vector<2x32xf32>
    %163 = vector.extract_strided_slice %159 {offsets = [0, 96], sizes = [2, 32], strides = [1, 1]} : vector<2x128xf32> to vector<2x32xf32>
    %164 = arith.mulf %161, %141 : vector<2x32xf32>
    %165 = arith.mulf %160, %162 : vector<2x32xf32>
    %166 = arith.addf %164, %165 : vector<2x32xf32>
    %167 = math.tanh %166 : vector<2x32xf32>
    %168 = arith.mulf %163, %167 : vector<2x32xf32>
    %169 = vector.extract_strided_slice %13 {offsets = [0, 3], sizes = [2, 1], strides = [1, 1]} : vector<2x8xf32> to vector<2x1xf32>
    %cst_40 = arith.constant 0.000000e+00 : f32
    %170 = vector.broadcast %cst_40 : f32 to vector<2x1xf32>
    %171 = arith.cmpf ogt, %169, %170 : vector<2x1xf32>
    %172 = vector.shape_cast %171 : vector<2x1xi1> to vector<2x1xi1>
    %173 = vector.broadcast %172 : vector<2x1xi1> to vector<2x32xi1>
    %174 = arith.select %173, %168, %136 : vector<2x32xi1>, vector<2x32xf32>
    %cst_41 = arith.constant 0.000000e+00 : f32
    %175 = vector.broadcast %cst_41 : f32 to vector<2x1xf32>
    %176 = arith.cmpf ogt, %169, %175 : vector<2x1xf32>
    %177 = vector.shape_cast %176 : vector<2x1xi1> to vector<2x1xi1>
    %178 = vector.broadcast %177 : vector<2x1xi1> to vector<2x32xi1>
    %179 = arith.select %178, %166, %141 : vector<2x32xi1>, vector<2x32xf32>
    %180 = vector.extract_strided_slice %0 {offsets = [0, 4], sizes = [2, 1], strides = [1, 1]} : vector<2x8xi32> to vector<2x1xi32>
    %181 = vector.broadcast %180 : vector<2x1xi32> to vector<2x16xi32>
    %182 = vector.broadcast %18 : vector<1x16xi32> to vector<2x16xi32>
    %183 = arith.cmpi eq, %181, %182 : vector<2x16xi32>
    %184 = arith.extui %183 : vector<2x16xi1> to vector<2x16xi32>
    %185 = arith.sitofp %184 : vector<2x16xi32> to vector<2x16xf32>
    %cst_42 = arith.constant dense<0.000000e+00> : vector<2x32xf32>
    %186 = tpu.matmul %185, %2, %cst_42 {dimension_numbers = #tpu.dot_dimension_numbers<[1], [0], [0], [1], [0, 0, 1, 1], [], []>} : vector<2x16xf32>, vector<16x32xf32>, vector<2x32xf32> -> vector<2x32xf32>
    %187 = tpu.concatenate %186, %174 in 1 : vector<2x32xf32>, vector<2x32xf32> -> vector<2x64xf32>
    %cst_43 = arith.constant dense<0.000000e+00> : vector<2x128xf32>
    %188 = tpu.matmul %187, %4, %cst_43 {dimension_numbers = #tpu.dot_dimension_numbers<[1], [0], [0], [1], [0, 0, 1, 1], [], []>} : vector<2x64xf32>, vector<64x128xf32>, vector<2x128xf32> -> vector<2x128xf32>
    %189 = vector.broadcast %5 : vector<1x128xf32> to vector<2x128xf32>
    %190 = arith.addf %188, %189 : vector<2x128xf32>
    %191 = math.tanh %190 : vector<2x128xf32>
    %192 = arith.negf %190 : vector<2x128xf32>
    %193 = math.exp %192 : vector<2x128xf32>
    %cst_44 = arith.constant 1.000000e+00 : f32
    %194 = vector.broadcast %cst_44 : f32 to vector<2x128xf32>
    %195 = arith.addf %194, %193 : vector<2x128xf32>
    %196 = arith.divf %194, %195 : vector<2x128xf32>
    %197 = arith.select %25, %191, %196 : vector<2x128xi1>, vector<2x128xf32>
    %198 = vector.extract_strided_slice %197 {offsets = [0, 0], sizes = [2, 32], strides = [1, 1]} : vector<2x128xf32> to vector<2x32xf32>
    %199 = vector.extract_strided_slice %197 {offsets = [0, 32], sizes = [2, 32], strides = [1, 1]} : vector<2x128xf32> to vector<2x32xf32>
    %200 = vector.extract_strided_slice %197 {offsets = [0, 64], sizes = [2, 32], strides = [1, 1]} : vector<2x128xf32> to vector<2x32xf32>
    %201 = vector.extract_strided_slice %197 {offsets = [0, 96], sizes = [2, 32], strides = [1, 1]} : vector<2x128xf32> to vector<2x32xf32>
    %202 = arith.mulf %199, %179 : vector<2x32xf32>
    %203 = arith.mulf %198, %200 : vector<2x32xf32>
    %204 = arith.addf %202, %203 : vector<2x32xf32>
    %205 = math.tanh %204 : vector<2x32xf32>
    %206 = arith.mulf %201, %205 : vector<2x32xf32>
    %207 = vector.extract_strided_slice %13 {offsets = [0, 4], sizes = [2, 1], strides = [1, 1]} : vector<2x8xf32> to vector<2x1xf32>
    %cst_45 = arith.constant 0.000000e+00 : f32
    %208 = vector.broadcast %cst_45 : f32 to vector<2x1xf32>
    %209 = arith.cmpf ogt, %207, %208 : vector<2x1xf32>
    %210 = vector.shape_cast %209 : vector<2x1xi1> to vector<2x1xi1>
    %211 = vector.broadcast %210 : vector<2x1xi1> to vector<2x32xi1>
    %212 = arith.select %211, %206, %174 : vector<2x32xi1>, vector<2x32xf32>
    %cst_46 = arith.constant 0.000000e+00 : f32
    %213 = vector.broadcast %cst_46 : f32 to vector<2x1xf32>
    %214 = arith.cmpf ogt, %207, %213 : vector<2x1xf32>
    %215 = vector.shape_cast %214 : vector<2x1xi1> to vector<2x1xi1>
    %216 = vector.broadcast %215 : vector<2x1xi1> to vector<2x32xi1>
    %217 = arith.select %216, %204, %179 : vector<2x32xi1>, vector<2x32xf32>
    %218 = vector.extract_strided_slice %0 {offsets = [0, 5], sizes = [2, 1], strides = [1, 1]} : vector<2x8xi32> to vector<2x1xi32>
    %219 = vector.broadcast %218 : vector<2x1xi32> to vector<2x16xi32>
    %220 = vector.broadcast %18 : vector<1x16xi32> to vector<2x16xi32>
    %221 = arith.cmpi eq, %219, %220 : vector<2x16xi32>
    %222 = arith.extui %221 : vector<2x16xi1> to vector<2x16xi32>
    %223 = arith.sitofp %222 : vector<2x16xi32> to vector<2x16xf32>
    %cst_47 = arith.constant dense<0.000000e+00> : vector<2x32xf32>
    %224 = tpu.matmul %223, %2, %cst_47 {dimension_numbers = #tpu.dot_dimension_numbers<[1], [0], [0], [1], [0, 0, 1, 1], [], []>} : vector<2x16xf32>, vector<16x32xf32>, vector<2x32xf32> -> vector<2x32xf32>
    %225 = tpu.concatenate %224, %212 in 1 : vector<2x32xf32>, vector<2x32xf32> -> vector<2x64xf32>
    %cst_48 = arith.constant dense<0.000000e+00> : vector<2x128xf32>
    %226 = tpu.matmul %225, %4, %cst_48 {dimension_numbers = #tpu.dot_dimension_numbers<[1], [0], [0], [1], [0, 0, 1, 1], [], []>} : vector<2x64xf32>, vector<64x128xf32>, vector<2x128xf32> -> vector<2x128xf32>
    %227 = vector.broadcast %5 : vector<1x128xf32> to vector<2x128xf32>
    %228 = arith.addf %226, %227 : vector<2x128xf32>
    %229 = math.tanh %228 : vector<2x128xf32>
    %230 = arith.negf %228 : vector<2x128xf32>
    %231 = math.exp %230 : vector<2x128xf32>
    %cst_49 = arith.constant 1.000000e+00 : f32
    %232 = vector.broadcast %cst_49 : f32 to vector<2x128xf32>
    %233 = arith.addf %232, %231 : vector<2x128xf32>
    %234 = arith.divf %232, %233 : vector<2x128xf32>
    %235 = arith.select %25, %229, %234 : vector<2x128xi1>, vector<2x128xf32>
    %236 = vector.extract_strided_slice %235 {offsets = [0, 0], sizes = [2, 32], strides = [1, 1]} : vector<2x128xf32> to vector<2x32xf32>
    %237 = vector.extract_strided_slice %235 {offsets = [0, 32], sizes = [2, 32], strides = [1, 1]} : vector<2x128xf32> to vector<2x32xf32>
    %238 = vector.extract_strided_slice %235 {offsets = [0, 64], sizes = [2, 32], strides = [1, 1]} : vector<2x128xf32> to vector<2x32xf32>
    %239 = vector.extract_strided_slice %235 {offsets = [0, 96], sizes = [2, 32], strides = [1, 1]} : vector<2x128xf32> to vector<2x32xf32>
    %240 = arith.mulf %237, %217 : vector<2x32xf32>
    %241 = arith.mulf %236, %238 : vector<2x32xf32>
    %242 = arith.addf %240, %241 : vector<2x32xf32>
    %243 = math.tanh %242 : vector<2x32xf32>
    %244 = arith.mulf %239, %243 : vector<2x32xf32>
    %245 = vector.extract_strided_slice %13 {offsets = [0, 5], sizes = [2, 1], strides = [1, 1]} : vector<2x8xf32> to vector<2x1xf32>
    %cst_50 = arith.constant 0.000000e+00 : f32
    %246 = vector.broadcast %cst_50 : f32 to vector<2x1xf32>
    %247 = arith.cmpf ogt, %245, %246 : vector<2x1xf32>
    %248 = vector.shape_cast %247 : vector<2x1xi1> to vector<2x1xi1>
    %249 = vector.broadcast %248 : vector<2x1xi1> to vector<2x32xi1>
    %250 = arith.select %249, %244, %212 : vector<2x32xi1>, vector<2x32xf32>
    %cst_51 = arith.constant 0.000000e+00 : f32
    %251 = vector.broadcast %cst_51 : f32 to vector<2x1xf32>
    %252 = arith.cmpf ogt, %245, %251 : vector<2x1xf32>
    %253 = vector.shape_cast %252 : vector<2x1xi1> to vector<2x1xi1>
    %254 = vector.broadcast %253 : vector<2x1xi1> to vector<2x32xi1>
    %255 = arith.select %254, %242, %217 : vector<2x32xi1>, vector<2x32xf32>
    %256 = vector.extract_strided_slice %0 {offsets = [0, 6], sizes = [2, 1], strides = [1, 1]} : vector<2x8xi32> to vector<2x1xi32>
    %257 = vector.broadcast %256 : vector<2x1xi32> to vector<2x16xi32>
    %258 = vector.broadcast %18 : vector<1x16xi32> to vector<2x16xi32>
    %259 = arith.cmpi eq, %257, %258 : vector<2x16xi32>
    %260 = arith.extui %259 : vector<2x16xi1> to vector<2x16xi32>
    %261 = arith.sitofp %260 : vector<2x16xi32> to vector<2x16xf32>
    %cst_52 = arith.constant dense<0.000000e+00> : vector<2x32xf32>
    %262 = tpu.matmul %261, %2, %cst_52 {dimension_numbers = #tpu.dot_dimension_numbers<[1], [0], [0], [1], [0, 0, 1, 1], [], []>} : vector<2x16xf32>, vector<16x32xf32>, vector<2x32xf32> -> vector<2x32xf32>
    %263 = tpu.concatenate %262, %250 in 1 : vector<2x32xf32>, vector<2x32xf32> -> vector<2x64xf32>
    %cst_53 = arith.constant dense<0.000000e+00> : vector<2x128xf32>
    %264 = tpu.matmul %263, %4, %cst_53 {dimension_numbers = #tpu.dot_dimension_numbers<[1], [0], [0], [1], [0, 0, 1, 1], [], []>} : vector<2x64xf32>, vector<64x128xf32>, vector<2x128xf32> -> vector<2x128xf32>
    %265 = vector.broadcast %5 : vector<1x128xf32> to vector<2x128xf32>
    %266 = arith.addf %264, %265 : vector<2x128xf32>
    %267 = math.tanh %266 : vector<2x128xf32>
    %268 = arith.negf %266 : vector<2x128xf32>
    %269 = math.exp %268 : vector<2x128xf32>
    %cst_54 = arith.constant 1.000000e+00 : f32
    %270 = vector.broadcast %cst_54 : f32 to vector<2x128xf32>
    %271 = arith.addf %270, %269 : vector<2x128xf32>
    %272 = arith.divf %270, %271 : vector<2x128xf32>
    %273 = arith.select %25, %267, %272 : vector<2x128xi1>, vector<2x128xf32>
    %274 = vector.extract_strided_slice %273 {offsets = [0, 0], sizes = [2, 32], strides = [1, 1]} : vector<2x128xf32> to vector<2x32xf32>
    %275 = vector.extract_strided_slice %273 {offsets = [0, 32], sizes = [2, 32], strides = [1, 1]} : vector<2x128xf32> to vector<2x32xf32>
    %276 = vector.extract_strided_slice %273 {offsets = [0, 64], sizes = [2, 32], strides = [1, 1]} : vector<2x128xf32> to vector<2x32xf32>
    %277 = vector.extract_strided_slice %273 {offsets = [0, 96], sizes = [2, 32], strides = [1, 1]} : vector<2x128xf32> to vector<2x32xf32>
    %278 = arith.mulf %275, %255 : vector<2x32xf32>
    %279 = arith.mulf %274, %276 : vector<2x32xf32>
    %280 = arith.addf %278, %279 : vector<2x32xf32>
    %281 = math.tanh %280 : vector<2x32xf32>
    %282 = arith.mulf %277, %281 : vector<2x32xf32>
    %283 = vector.extract_strided_slice %13 {offsets = [0, 6], sizes = [2, 1], strides = [1, 1]} : vector<2x8xf32> to vector<2x1xf32>
    %cst_55 = arith.constant 0.000000e+00 : f32
    %284 = vector.broadcast %cst_55 : f32 to vector<2x1xf32>
    %285 = arith.cmpf ogt, %283, %284 : vector<2x1xf32>
    %286 = vector.shape_cast %285 : vector<2x1xi1> to vector<2x1xi1>
    %287 = vector.broadcast %286 : vector<2x1xi1> to vector<2x32xi1>
    %288 = arith.select %287, %282, %250 : vector<2x32xi1>, vector<2x32xf32>
    %cst_56 = arith.constant 0.000000e+00 : f32
    %289 = vector.broadcast %cst_56 : f32 to vector<2x1xf32>
    %290 = arith.cmpf ogt, %283, %289 : vector<2x1xf32>
    %291 = vector.shape_cast %290 : vector<2x1xi1> to vector<2x1xi1>
    %292 = vector.broadcast %291 : vector<2x1xi1> to vector<2x32xi1>
    %293 = arith.select %292, %280, %255 : vector<2x32xi1>, vector<2x32xf32>
    %294 = vector.extract_strided_slice %0 {offsets = [0, 7], sizes = [2, 1], strides = [1, 1]} : vector<2x8xi32> to vector<2x1xi32>
    %295 = vector.broadcast %294 : vector<2x1xi32> to vector<2x16xi32>
    %296 = vector.broadcast %18 : vector<1x16xi32> to vector<2x16xi32>
    %297 = arith.cmpi eq, %295, %296 : vector<2x16xi32>
    %298 = arith.extui %297 : vector<2x16xi1> to vector<2x16xi32>
    %299 = arith.sitofp %298 : vector<2x16xi32> to vector<2x16xf32>
    %cst_57 = arith.constant dense<0.000000e+00> : vector<2x32xf32>
    %300 = tpu.matmul %299, %2, %cst_57 {dimension_numbers = #tpu.dot_dimension_numbers<[1], [0], [0], [1], [0, 0, 1, 1], [], []>} : vector<2x16xf32>, vector<16x32xf32>, vector<2x32xf32> -> vector<2x32xf32>
    %301 = tpu.concatenate %300, %288 in 1 : vector<2x32xf32>, vector<2x32xf32> -> vector<2x64xf32>
    %cst_58 = arith.constant dense<0.000000e+00> : vector<2x128xf32>
    %302 = tpu.matmul %301, %4, %cst_58 {dimension_numbers = #tpu.dot_dimension_numbers<[1], [0], [0], [1], [0, 0, 1, 1], [], []>} : vector<2x64xf32>, vector<64x128xf32>, vector<2x128xf32> -> vector<2x128xf32>
    %303 = vector.broadcast %5 : vector<1x128xf32> to vector<2x128xf32>
    %304 = arith.addf %302, %303 : vector<2x128xf32>
    %305 = math.tanh %304 : vector<2x128xf32>
    %306 = arith.negf %304 : vector<2x128xf32>
    %307 = math.exp %306 : vector<2x128xf32>
    %cst_59 = arith.constant 1.000000e+00 : f32
    %308 = vector.broadcast %cst_59 : f32 to vector<2x128xf32>
    %309 = arith.addf %308, %307 : vector<2x128xf32>
    %310 = arith.divf %308, %309 : vector<2x128xf32>
    %311 = arith.select %25, %305, %310 : vector<2x128xi1>, vector<2x128xf32>
    %312 = vector.extract_strided_slice %311 {offsets = [0, 0], sizes = [2, 32], strides = [1, 1]} : vector<2x128xf32> to vector<2x32xf32>
    %313 = vector.extract_strided_slice %311 {offsets = [0, 32], sizes = [2, 32], strides = [1, 1]} : vector<2x128xf32> to vector<2x32xf32>
    %314 = vector.extract_strided_slice %311 {offsets = [0, 64], sizes = [2, 32], strides = [1, 1]} : vector<2x128xf32> to vector<2x32xf32>
    %315 = vector.extract_strided_slice %311 {offsets = [0, 96], sizes = [2, 32], strides = [1, 1]} : vector<2x128xf32> to vector<2x32xf32>
    %316 = arith.mulf %313, %293 : vector<2x32xf32>
    %317 = arith.mulf %312, %314 : vector<2x32xf32>
    %318 = arith.addf %316, %317 : vector<2x32xf32>
    %319 = math.tanh %318 : vector<2x32xf32>
    %320 = arith.mulf %315, %319 : vector<2x32xf32>
    %321 = vector.extract_strided_slice %13 {offsets = [0, 7], sizes = [2, 1], strides = [1, 1]} : vector<2x8xf32> to vector<2x1xf32>
    %cst_60 = arith.constant 0.000000e+00 : f32
    %322 = vector.broadcast %cst_60 : f32 to vector<2x1xf32>
    %323 = arith.cmpf ogt, %321, %322 : vector<2x1xf32>
    %324 = vector.shape_cast %323 : vector<2x1xi1> to vector<2x1xi1>
    %325 = vector.broadcast %324 : vector<2x1xi1> to vector<2x32xi1>
    %326 = arith.select %325, %320, %288 : vector<2x32xi1>, vector<2x32xf32>
    %cst_61 = arith.constant 0.000000e+00 : f32
    %327 = vector.broadcast %cst_61 : f32 to vector<2x1xf32>
    %328 = arith.cmpf ogt, %321, %327 : vector<2x1xf32>
    %329 = vector.shape_cast %328 : vector<2x1xi1> to vector<2x1xi1>
    %330 = vector.broadcast %329 : vector<2x1xi1> to vector<2x32xi1>
    %331 = arith.select %330, %318, %293 : vector<2x32xi1>, vector<2x32xf32>
    %332 = vector.shape_cast %60 : vector<2x32xf32> to vector<2x1x32xf32>
    %333 = vector.shape_cast %98 : vector<2x32xf32> to vector<2x1x32xf32>
    %334 = vector.shape_cast %136 : vector<2x32xf32> to vector<2x1x32xf32>
    %335 = vector.shape_cast %174 : vector<2x32xf32> to vector<2x1x32xf32>
    %336 = vector.shape_cast %212 : vector<2x32xf32> to vector<2x1x32xf32>
    %337 = vector.shape_cast %250 : vector<2x32xf32> to vector<2x1x32xf32>
    %338 = vector.shape_cast %288 : vector<2x32xf32> to vector<2x1x32xf32>
    %339 = vector.shape_cast %326 : vector<2x32xf32> to vector<2x1x32xf32>
    %340 = tpu.concatenate %332, %333, %334, %335, %336, %337, %338, %339 in 1 : vector<2x1x32xf32>, vector<2x1x32xf32>, vector<2x1x32xf32>, vector<2x1x32xf32>, vector<2x1x32xf32>, vector<2x1x32xf32>, vector<2x1x32xf32>, vector<2x1x32xf32> -> vector<2x8x32xf32>
    %341 = vector.extract_strided_slice %1 {offsets = [0, 0], sizes = [2, 1], strides = [1, 1]} : vector<2x8xi32> to vector<2x1xi32>
    %342 = vector.broadcast %341 : vector<2x1xi32> to vector<2x16xi32>
    %343 = vector.broadcast %19 : vector<1x16xi32> to vector<2x16xi32>
    %344 = arith.cmpi eq, %342, %343 : vector<2x16xi32>
    %345 = arith.extui %344 : vector<2x16xi1> to vector<2x16xi32>
    %346 = arith.sitofp %345 : vector<2x16xi32> to vector<2x16xf32>
    %cst_62 = arith.constant dense<0.000000e+00> : vector<2x32xf32>
    %347 = tpu.matmul %346, %3, %cst_62 {dimension_numbers = #tpu.dot_dimension_numbers<[1], [0], [0], [1], [0, 0, 1, 1], [], []>} : vector<2x16xf32>, vector<16x32xf32>, vector<2x32xf32> -> vector<2x32xf32>
    %348 = tpu.concatenate %347, %326 in 1 : vector<2x32xf32>, vector<2x32xf32> -> vector<2x64xf32>
    %cst_63 = arith.constant dense<0.000000e+00> : vector<2x128xf32>
    %349 = tpu.matmul %348, %6, %cst_63 {dimension_numbers = #tpu.dot_dimension_numbers<[1], [0], [0], [1], [0, 0, 1, 1], [], []>} : vector<2x64xf32>, vector<64x128xf32>, vector<2x128xf32> -> vector<2x128xf32>
    %350 = vector.broadcast %7 : vector<1x128xf32> to vector<2x128xf32>
    %351 = arith.addf %349, %350 : vector<2x128xf32>
    %352 = math.tanh %351 : vector<2x128xf32>
    %353 = arith.negf %351 : vector<2x128xf32>
    %354 = math.exp %353 : vector<2x128xf32>
    %cst_64 = arith.constant 1.000000e+00 : f32
    %355 = vector.broadcast %cst_64 : f32 to vector<2x128xf32>
    %356 = arith.addf %355, %354 : vector<2x128xf32>
    %357 = arith.divf %355, %356 : vector<2x128xf32>
    %358 = arith.select %25, %352, %357 : vector<2x128xi1>, vector<2x128xf32>
    %359 = vector.extract_strided_slice %358 {offsets = [0, 0], sizes = [2, 32], strides = [1, 1]} : vector<2x128xf32> to vector<2x32xf32>
    %360 = vector.extract_strided_slice %358 {offsets = [0, 32], sizes = [2, 32], strides = [1, 1]} : vector<2x128xf32> to vector<2x32xf32>
    %361 = vector.extract_strided_slice %358 {offsets = [0, 64], sizes = [2, 32], strides = [1, 1]} : vector<2x128xf32> to vector<2x32xf32>
    %362 = vector.extract_strided_slice %358 {offsets = [0, 96], sizes = [2, 32], strides = [1, 1]} : vector<2x128xf32> to vector<2x32xf32>
    %363 = arith.mulf %360, %331 : vector<2x32xf32>
    %364 = arith.mulf %359, %361 : vector<2x32xf32>
    %365 = arith.addf %363, %364 : vector<2x32xf32>
    %366 = math.tanh %365 : vector<2x32xf32>
    %367 = arith.mulf %362, %366 : vector<2x32xf32>
    %368 = vector.shape_cast %367 : vector<2x32xf32> to vector<2x1x32xf32>
    %369 = vector.broadcast %368 : vector<2x1x32xf32> to vector<2x8x32xf32>
    %370 = arith.mulf %340, %369 : vector<2x8x32xf32>
    %cst_65 = arith.constant dense<0.000000e+00> : vector<2x8xf32>
    %371 = vector.multi_reduction <add>, %370, %cst_65 [2] : vector<2x8x32xf32> to vector<2x8xf32>
    %372 = arith.addf %371, %17 : vector<2x8xf32>
    %cst_66 = arith.constant dense<0xFF800000> : vector<2xf32>
    %373 = vector.multi_reduction <maximumf>, %372, %cst_66 [1] : vector<2x8xf32> to vector<2xf32>
    %374 = vector.shape_cast %373 : vector<2xf32> to vector<2x1xf32>
    %375 = vector.broadcast %374 : vector<2x1xf32> to vector<2x8xf32>
    %376 = arith.subf %372, %375 : vector<2x8xf32>
    %377 = math.exp %376 : vector<2x8xf32>
    %cst_67 = arith.constant dense<0.000000e+00> : vector<2xf32>
    %378 = vector.multi_reduction <add>, %377, %cst_67 [1] : vector<2x8xf32> to vector<2xf32>
    %379 = vector.shape_cast %378 : vector<2xf32> to vector<2x1xf32>
    %380 = tpu.reciprocal %379 {approx = true} : vector<2x1xf32> -> vector<2x1xf32>
    %381 = vector.broadcast %380 : vector<2x1xf32> to vector<2x8xf32>
    %382 = arith.mulf %377, %381 : vector<2x8xf32>
    %383 = vector.shape_cast %382 : vector<2x8xf32> to vector<2x8x1xf32>
    %384 = vector.broadcast %383 : vector<2x8x1xf32> to vector<2x8x32xf32>
    %385 = arith.mulf %384, %340 : vector<2x8x32xf32>
    %cst_68 = arith.constant dense<0.000000e+00> : vector<2x32xf32>
    %386 = vector.multi_reduction <add>, %385, %cst_68 [1] : vector<2x8x32xf32> to vector<2x32xf32>
    %387 = tpu.concatenate %367, %386 in 1 : vector<2x32xf32>, vector<2x32xf32> -> vector<2x64xf32>
    %cst_69 = arith.constant dense<0.000000e+00> : vector<2x16xf32>
    %388 = tpu.matmul %387, %8, %cst_69 {dimension_numbers = #tpu.dot_dimension_numbers<[1], [0], [0], [1], [0, 0, 1, 1], [], []>} : vector<2x64xf32>, vector<64x16xf32>, vector<2x16xf32> -> vector<2x16xf32>
    %389 = vector.broadcast %9 : vector<1x16xf32> to vector<2x16xf32>
    %390 = arith.addf %388, %389 : vector<2x16xf32>
    %cst_70 = arith.constant dense<0xFF800000> : vector<2xf32>
    %391 = vector.multi_reduction <maximumf>, %390, %cst_70 [1] : vector<2x16xf32> to vector<2xf32>
    %392 = vector.shape_cast %391 : vector<2xf32> to vector<2x1xf32>
    %393 = vector.broadcast %392 : vector<2x1xf32> to vector<2x16xf32>
    %394 = arith.subf %390, %393 : vector<2x16xf32>
    %395 = math.exp %394 : vector<2x16xf32>
    %cst_71 = arith.constant dense<0.000000e+00> : vector<2xf32>
    %396 = vector.multi_reduction <add>, %395, %cst_71 [1] : vector<2x16xf32> to vector<2xf32>
    %397 = vector.shape_cast %396 : vector<2xf32> to vector<2x1xf32>
    %398 = tpu.reciprocal %397 {approx = true} : vector<2x1xf32> -> vector<2x1xf32>
    %399 = vector.broadcast %398 : vector<2x1xf32> to vector<2x16xf32>
    %400 = arith.mulf %395, %399 : vector<2x16xf32>
    %401 = vector.extract_strided_slice %1 {offsets = [0, 1], sizes = [2, 1], strides = [1, 1]} : vector<2x8xi32> to vector<2x1xi32>
    %402 = vector.broadcast %401 : vector<2x1xi32> to vector<2x16xi32>
    %403 = vector.broadcast %19 : vector<1x16xi32> to vector<2x16xi32>
    %404 = arith.cmpi eq, %402, %403 : vector<2x16xi32>
    %405 = arith.extui %404 : vector<2x16xi1> to vector<2x16xi32>
    %406 = arith.sitofp %405 : vector<2x16xi32> to vector<2x16xf32>
    %cst_72 = arith.constant dense<0.000000e+00> : vector<2x32xf32>
    %407 = tpu.matmul %406, %3, %cst_72 {dimension_numbers = #tpu.dot_dimension_numbers<[1], [0], [0], [1], [0, 0, 1, 1], [], []>} : vector<2x16xf32>, vector<16x32xf32>, vector<2x32xf32> -> vector<2x32xf32>
    %408 = tpu.concatenate %407, %367 in 1 : vector<2x32xf32>, vector<2x32xf32> -> vector<2x64xf32>
    %cst_73 = arith.constant dense<0.000000e+00> : vector<2x128xf32>
    %409 = tpu.matmul %408, %6, %cst_73 {dimension_numbers = #tpu.dot_dimension_numbers<[1], [0], [0], [1], [0, 0, 1, 1], [], []>} : vector<2x64xf32>, vector<64x128xf32>, vector<2x128xf32> -> vector<2x128xf32>
    %410 = vector.broadcast %7 : vector<1x128xf32> to vector<2x128xf32>
    %411 = arith.addf %409, %410 : vector<2x128xf32>
    %412 = math.tanh %411 : vector<2x128xf32>
    %413 = arith.negf %411 : vector<2x128xf32>
    %414 = math.exp %413 : vector<2x128xf32>
    %cst_74 = arith.constant 1.000000e+00 : f32
    %415 = vector.broadcast %cst_74 : f32 to vector<2x128xf32>
    %416 = arith.addf %415, %414 : vector<2x128xf32>
    %417 = arith.divf %415, %416 : vector<2x128xf32>
    %418 = arith.select %25, %412, %417 : vector<2x128xi1>, vector<2x128xf32>
    %419 = vector.extract_strided_slice %418 {offsets = [0, 0], sizes = [2, 32], strides = [1, 1]} : vector<2x128xf32> to vector<2x32xf32>
    %420 = vector.extract_strided_slice %418 {offsets = [0, 32], sizes = [2, 32], strides = [1, 1]} : vector<2x128xf32> to vector<2x32xf32>
    %421 = vector.extract_strided_slice %418 {offsets = [0, 64], sizes = [2, 32], strides = [1, 1]} : vector<2x128xf32> to vector<2x32xf32>
    %422 = vector.extract_strided_slice %418 {offsets = [0, 96], sizes = [2, 32], strides = [1, 1]} : vector<2x128xf32> to vector<2x32xf32>
    %423 = arith.mulf %420, %365 : vector<2x32xf32>
    %424 = arith.mulf %419, %421 : vector<2x32xf32>
    %425 = arith.addf %423, %424 : vector<2x32xf32>
    %426 = math.tanh %425 : vector<2x32xf32>
    %427 = arith.mulf %422, %426 : vector<2x32xf32>
    %428 = vector.shape_cast %427 : vector<2x32xf32> to vector<2x1x32xf32>
    %429 = vector.broadcast %428 : vector<2x1x32xf32> to vector<2x8x32xf32>
    %430 = arith.mulf %340, %429 : vector<2x8x32xf32>
    %cst_75 = arith.constant dense<0.000000e+00> : vector<2x8xf32>
    %431 = vector.multi_reduction <add>, %430, %cst_75 [2] : vector<2x8x32xf32> to vector<2x8xf32>
    %432 = arith.addf %431, %17 : vector<2x8xf32>
    %cst_76 = arith.constant dense<0xFF800000> : vector<2xf32>
    %433 = vector.multi_reduction <maximumf>, %432, %cst_76 [1] : vector<2x8xf32> to vector<2xf32>
    %434 = vector.shape_cast %433 : vector<2xf32> to vector<2x1xf32>
    %435 = vector.broadcast %434 : vector<2x1xf32> to vector<2x8xf32>
    %436 = arith.subf %432, %435 : vector<2x8xf32>
    %437 = math.exp %436 : vector<2x8xf32>
    %cst_77 = arith.constant dense<0.000000e+00> : vector<2xf32>
    %438 = vector.multi_reduction <add>, %437, %cst_77 [1] : vector<2x8xf32> to vector<2xf32>
    %439 = vector.shape_cast %438 : vector<2xf32> to vector<2x1xf32>
    %440 = tpu.reciprocal %439 {approx = true} : vector<2x1xf32> -> vector<2x1xf32>
    %441 = vector.broadcast %440 : vector<2x1xf32> to vector<2x8xf32>
    %442 = arith.mulf %437, %441 : vector<2x8xf32>
    %443 = vector.shape_cast %442 : vector<2x8xf32> to vector<2x8x1xf32>
    %444 = vector.broadcast %443 : vector<2x8x1xf32> to vector<2x8x32xf32>
    %445 = arith.mulf %444, %340 : vector<2x8x32xf32>
    %cst_78 = arith.constant dense<0.000000e+00> : vector<2x32xf32>
    %446 = vector.multi_reduction <add>, %445, %cst_78 [1] : vector<2x8x32xf32> to vector<2x32xf32>
    %447 = tpu.concatenate %427, %446 in 1 : vector<2x32xf32>, vector<2x32xf32> -> vector<2x64xf32>
    %cst_79 = arith.constant dense<0.000000e+00> : vector<2x16xf32>
    %448 = tpu.matmul %447, %8, %cst_79 {dimension_numbers = #tpu.dot_dimension_numbers<[1], [0], [0], [1], [0, 0, 1, 1], [], []>} : vector<2x64xf32>, vector<64x16xf32>, vector<2x16xf32> -> vector<2x16xf32>
    %449 = vector.broadcast %9 : vector<1x16xf32> to vector<2x16xf32>
    %450 = arith.addf %448, %449 : vector<2x16xf32>
    %cst_80 = arith.constant dense<0xFF800000> : vector<2xf32>
    %451 = vector.multi_reduction <maximumf>, %450, %cst_80 [1] : vector<2x16xf32> to vector<2xf32>
    %452 = vector.shape_cast %451 : vector<2xf32> to vector<2x1xf32>
    %453 = vector.broadcast %452 : vector<2x1xf32> to vector<2x16xf32>
    %454 = arith.subf %450, %453 : vector<2x16xf32>
    %455 = math.exp %454 : vector<2x16xf32>
    %cst_81 = arith.constant dense<0.000000e+00> : vector<2xf32>
    %456 = vector.multi_reduction <add>, %455, %cst_81 [1] : vector<2x16xf32> to vector<2xf32>
    %457 = vector.shape_cast %456 : vector<2xf32> to vector<2x1xf32>
    %458 = tpu.reciprocal %457 {approx = true} : vector<2x1xf32> -> vector<2x1xf32>
    %459 = vector.broadcast %458 : vector<2x1xf32> to vector<2x16xf32>
    %460 = arith.mulf %455, %459 : vector<2x16xf32>
    %461 = vector.extract_strided_slice %1 {offsets = [0, 2], sizes = [2, 1], strides = [1, 1]} : vector<2x8xi32> to vector<2x1xi32>
    %462 = vector.broadcast %461 : vector<2x1xi32> to vector<2x16xi32>
    %463 = vector.broadcast %19 : vector<1x16xi32> to vector<2x16xi32>
    %464 = arith.cmpi eq, %462, %463 : vector<2x16xi32>
    %465 = arith.extui %464 : vector<2x16xi1> to vector<2x16xi32>
    %466 = arith.sitofp %465 : vector<2x16xi32> to vector<2x16xf32>
    %cst_82 = arith.constant dense<0.000000e+00> : vector<2x32xf32>
    %467 = tpu.matmul %466, %3, %cst_82 {dimension_numbers = #tpu.dot_dimension_numbers<[1], [0], [0], [1], [0, 0, 1, 1], [], []>} : vector<2x16xf32>, vector<16x32xf32>, vector<2x32xf32> -> vector<2x32xf32>
    %468 = tpu.concatenate %467, %427 in 1 : vector<2x32xf32>, vector<2x32xf32> -> vector<2x64xf32>
    %cst_83 = arith.constant dense<0.000000e+00> : vector<2x128xf32>
    %469 = tpu.matmul %468, %6, %cst_83 {dimension_numbers = #tpu.dot_dimension_numbers<[1], [0], [0], [1], [0, 0, 1, 1], [], []>} : vector<2x64xf32>, vector<64x128xf32>, vector<2x128xf32> -> vector<2x128xf32>
    %470 = vector.broadcast %7 : vector<1x128xf32> to vector<2x128xf32>
    %471 = arith.addf %469, %470 : vector<2x128xf32>
    %472 = math.tanh %471 : vector<2x128xf32>
    %473 = arith.negf %471 : vector<2x128xf32>
    %474 = math.exp %473 : vector<2x128xf32>
    %cst_84 = arith.constant 1.000000e+00 : f32
    %475 = vector.broadcast %cst_84 : f32 to vector<2x128xf32>
    %476 = arith.addf %475, %474 : vector<2x128xf32>
    %477 = arith.divf %475, %476 : vector<2x128xf32>
    %478 = arith.select %25, %472, %477 : vector<2x128xi1>, vector<2x128xf32>
    %479 = vector.extract_strided_slice %478 {offsets = [0, 0], sizes = [2, 32], strides = [1, 1]} : vector<2x128xf32> to vector<2x32xf32>
    %480 = vector.extract_strided_slice %478 {offsets = [0, 32], sizes = [2, 32], strides = [1, 1]} : vector<2x128xf32> to vector<2x32xf32>
    %481 = vector.extract_strided_slice %478 {offsets = [0, 64], sizes = [2, 32], strides = [1, 1]} : vector<2x128xf32> to vector<2x32xf32>
    %482 = vector.extract_strided_slice %478 {offsets = [0, 96], sizes = [2, 32], strides = [1, 1]} : vector<2x128xf32> to vector<2x32xf32>
    %483 = arith.mulf %480, %425 : vector<2x32xf32>
    %484 = arith.mulf %479, %481 : vector<2x32xf32>
    %485 = arith.addf %483, %484 : vector<2x32xf32>
    %486 = math.tanh %485 : vector<2x32xf32>
    %487 = arith.mulf %482, %486 : vector<2x32xf32>
    %488 = vector.shape_cast %487 : vector<2x32xf32> to vector<2x1x32xf32>
    %489 = vector.broadcast %488 : vector<2x1x32xf32> to vector<2x8x32xf32>
    %490 = arith.mulf %340, %489 : vector<2x8x32xf32>
    %cst_85 = arith.constant dense<0.000000e+00> : vector<2x8xf32>
    %491 = vector.multi_reduction <add>, %490, %cst_85 [2] : vector<2x8x32xf32> to vector<2x8xf32>
    %492 = arith.addf %491, %17 : vector<2x8xf32>
    %cst_86 = arith.constant dense<0xFF800000> : vector<2xf32>
    %493 = vector.multi_reduction <maximumf>, %492, %cst_86 [1] : vector<2x8xf32> to vector<2xf32>
    %494 = vector.shape_cast %493 : vector<2xf32> to vector<2x1xf32>
    %495 = vector.broadcast %494 : vector<2x1xf32> to vector<2x8xf32>
    %496 = arith.subf %492, %495 : vector<2x8xf32>
    %497 = math.exp %496 : vector<2x8xf32>
    %cst_87 = arith.constant dense<0.000000e+00> : vector<2xf32>
    %498 = vector.multi_reduction <add>, %497, %cst_87 [1] : vector<2x8xf32> to vector<2xf32>
    %499 = vector.shape_cast %498 : vector<2xf32> to vector<2x1xf32>
    %500 = tpu.reciprocal %499 {approx = true} : vector<2x1xf32> -> vector<2x1xf32>
    %501 = vector.broadcast %500 : vector<2x1xf32> to vector<2x8xf32>
    %502 = arith.mulf %497, %501 : vector<2x8xf32>
    %503 = vector.shape_cast %502 : vector<2x8xf32> to vector<2x8x1xf32>
    %504 = vector.broadcast %503 : vector<2x8x1xf32> to vector<2x8x32xf32>
    %505 = arith.mulf %504, %340 : vector<2x8x32xf32>
    %cst_88 = arith.constant dense<0.000000e+00> : vector<2x32xf32>
    %506 = vector.multi_reduction <add>, %505, %cst_88 [1] : vector<2x8x32xf32> to vector<2x32xf32>
    %507 = tpu.concatenate %487, %506 in 1 : vector<2x32xf32>, vector<2x32xf32> -> vector<2x64xf32>
    %cst_89 = arith.constant dense<0.000000e+00> : vector<2x16xf32>
    %508 = tpu.matmul %507, %8, %cst_89 {dimension_numbers = #tpu.dot_dimension_numbers<[1], [0], [0], [1], [0, 0, 1, 1], [], []>} : vector<2x64xf32>, vector<64x16xf32>, vector<2x16xf32> -> vector<2x16xf32>
    %509 = vector.broadcast %9 : vector<1x16xf32> to vector<2x16xf32>
    %510 = arith.addf %508, %509 : vector<2x16xf32>
    %cst_90 = arith.constant dense<0xFF800000> : vector<2xf32>
    %511 = vector.multi_reduction <maximumf>, %510, %cst_90 [1] : vector<2x16xf32> to vector<2xf32>
    %512 = vector.shape_cast %511 : vector<2xf32> to vector<2x1xf32>
    %513 = vector.broadcast %512 : vector<2x1xf32> to vector<2x16xf32>
    %514 = arith.subf %510, %513 : vector<2x16xf32>
    %515 = math.exp %514 : vector<2x16xf32>
    %cst_91 = arith.constant dense<0.000000e+00> : vector<2xf32>
    %516 = vector.multi_reduction <add>, %515, %cst_91 [1] : vector<2x16xf32> to vector<2xf32>
    %517 = vector.shape_cast %516 : vector<2xf32> to vector<2x1xf32>
    %518 = tpu.reciprocal %517 {approx = true} : vector<2x1xf32> -> vector<2x1xf32>
    %519 = vector.broadcast %518 : vector<2x1xf32> to vector<2x16xf32>
    %520 = arith.mulf %515, %519 : vector<2x16xf32>
    %521 = vector.extract_strided_slice %1 {offsets = [0, 3], sizes = [2, 1], strides = [1, 1]} : vector<2x8xi32> to vector<2x1xi32>
    %522 = vector.broadcast %521 : vector<2x1xi32> to vector<2x16xi32>
    %523 = vector.broadcast %19 : vector<1x16xi32> to vector<2x16xi32>
    %524 = arith.cmpi eq, %522, %523 : vector<2x16xi32>
    %525 = arith.extui %524 : vector<2x16xi1> to vector<2x16xi32>
    %526 = arith.sitofp %525 : vector<2x16xi32> to vector<2x16xf32>
    %cst_92 = arith.constant dense<0.000000e+00> : vector<2x32xf32>
    %527 = tpu.matmul %526, %3, %cst_92 {dimension_numbers = #tpu.dot_dimension_numbers<[1], [0], [0], [1], [0, 0, 1, 1], [], []>} : vector<2x16xf32>, vector<16x32xf32>, vector<2x32xf32> -> vector<2x32xf32>
    %528 = tpu.concatenate %527, %487 in 1 : vector<2x32xf32>, vector<2x32xf32> -> vector<2x64xf32>
    %cst_93 = arith.constant dense<0.000000e+00> : vector<2x128xf32>
    %529 = tpu.matmul %528, %6, %cst_93 {dimension_numbers = #tpu.dot_dimension_numbers<[1], [0], [0], [1], [0, 0, 1, 1], [], []>} : vector<2x64xf32>, vector<64x128xf32>, vector<2x128xf32> -> vector<2x128xf32>
    %530 = vector.broadcast %7 : vector<1x128xf32> to vector<2x128xf32>
    %531 = arith.addf %529, %530 : vector<2x128xf32>
    %532 = math.tanh %531 : vector<2x128xf32>
    %533 = arith.negf %531 : vector<2x128xf32>
    %534 = math.exp %533 : vector<2x128xf32>
    %cst_94 = arith.constant 1.000000e+00 : f32
    %535 = vector.broadcast %cst_94 : f32 to vector<2x128xf32>
    %536 = arith.addf %535, %534 : vector<2x128xf32>
    %537 = arith.divf %535, %536 : vector<2x128xf32>
    %538 = arith.select %25, %532, %537 : vector<2x128xi1>, vector<2x128xf32>
    %539 = vector.extract_strided_slice %538 {offsets = [0, 0], sizes = [2, 32], strides = [1, 1]} : vector<2x128xf32> to vector<2x32xf32>
    %540 = vector.extract_strided_slice %538 {offsets = [0, 32], sizes = [2, 32], strides = [1, 1]} : vector<2x128xf32> to vector<2x32xf32>
    %541 = vector.extract_strided_slice %538 {offsets = [0, 64], sizes = [2, 32], strides = [1, 1]} : vector<2x128xf32> to vector<2x32xf32>
    %542 = vector.extract_strided_slice %538 {offsets = [0, 96], sizes = [2, 32], strides = [1, 1]} : vector<2x128xf32> to vector<2x32xf32>
    %543 = arith.mulf %540, %485 : vector<2x32xf32>
    %544 = arith.mulf %539, %541 : vector<2x32xf32>
    %545 = arith.addf %543, %544 : vector<2x32xf32>
    %546 = math.tanh %545 : vector<2x32xf32>
    %547 = arith.mulf %542, %546 : vector<2x32xf32>
    %548 = vector.shape_cast %547 : vector<2x32xf32> to vector<2x1x32xf32>
    %549 = vector.broadcast %548 : vector<2x1x32xf32> to vector<2x8x32xf32>
    %550 = arith.mulf %340, %549 : vector<2x8x32xf32>
    %cst_95 = arith.constant dense<0.000000e+00> : vector<2x8xf32>
    %551 = vector.multi_reduction <add>, %550, %cst_95 [2] : vector<2x8x32xf32> to vector<2x8xf32>
    %552 = arith.addf %551, %17 : vector<2x8xf32>
    %cst_96 = arith.constant dense<0xFF800000> : vector<2xf32>
    %553 = vector.multi_reduction <maximumf>, %552, %cst_96 [1] : vector<2x8xf32> to vector<2xf32>
    %554 = vector.shape_cast %553 : vector<2xf32> to vector<2x1xf32>
    %555 = vector.broadcast %554 : vector<2x1xf32> to vector<2x8xf32>
    %556 = arith.subf %552, %555 : vector<2x8xf32>
    %557 = math.exp %556 : vector<2x8xf32>
    %cst_97 = arith.constant dense<0.000000e+00> : vector<2xf32>
    %558 = vector.multi_reduction <add>, %557, %cst_97 [1] : vector<2x8xf32> to vector<2xf32>
    %559 = vector.shape_cast %558 : vector<2xf32> to vector<2x1xf32>
    %560 = tpu.reciprocal %559 {approx = true} : vector<2x1xf32> -> vector<2x1xf32>
    %561 = vector.broadcast %560 : vector<2x1xf32> to vector<2x8xf32>
    %562 = arith.mulf %557, %561 : vector<2x8xf32>
    %563 = vector.shape_cast %562 : vector<2x8xf32> to vector<2x8x1xf32>
    %564 = vector.broadcast %563 : vector<2x8x1xf32> to vector<2x8x32xf32>
    %565 = arith.mulf %564, %340 : vector<2x8x32xf32>
    %cst_98 = arith.constant dense<0.000000e+00> : vector<2x32xf32>
    %566 = vector.multi_reduction <add>, %565, %cst_98 [1] : vector<2x8x32xf32> to vector<2x32xf32>
    %567 = tpu.concatenate %547, %566 in 1 : vector<2x32xf32>, vector<2x32xf32> -> vector<2x64xf32>
    %cst_99 = arith.constant dense<0.000000e+00> : vector<2x16xf32>
    %568 = tpu.matmul %567, %8, %cst_99 {dimension_numbers = #tpu.dot_dimension_numbers<[1], [0], [0], [1], [0, 0, 1, 1], [], []>} : vector<2x64xf32>, vector<64x16xf32>, vector<2x16xf32> -> vector<2x16xf32>
    %569 = vector.broadcast %9 : vector<1x16xf32> to vector<2x16xf32>
    %570 = arith.addf %568, %569 : vector<2x16xf32>
    %cst_100 = arith.constant dense<0xFF800000> : vector<2xf32>
    %571 = vector.multi_reduction <maximumf>, %570, %cst_100 [1] : vector<2x16xf32> to vector<2xf32>
    %572 = vector.shape_cast %571 : vector<2xf32> to vector<2x1xf32>
    %573 = vector.broadcast %572 : vector<2x1xf32> to vector<2x16xf32>
    %574 = arith.subf %570, %573 : vector<2x16xf32>
    %575 = math.exp %574 : vector<2x16xf32>
    %cst_101 = arith.constant dense<0.000000e+00> : vector<2xf32>
    %576 = vector.multi_reduction <add>, %575, %cst_101 [1] : vector<2x16xf32> to vector<2xf32>
    %577 = vector.shape_cast %576 : vector<2xf32> to vector<2x1xf32>
    %578 = tpu.reciprocal %577 {approx = true} : vector<2x1xf32> -> vector<2x1xf32>
    %579 = vector.broadcast %578 : vector<2x1xf32> to vector<2x16xf32>
    %580 = arith.mulf %575, %579 : vector<2x16xf32>
    %581 = vector.extract_strided_slice %1 {offsets = [0, 4], sizes = [2, 1], strides = [1, 1]} : vector<2x8xi32> to vector<2x1xi32>
    %582 = vector.broadcast %581 : vector<2x1xi32> to vector<2x16xi32>
    %583 = vector.broadcast %19 : vector<1x16xi32> to vector<2x16xi32>
    %584 = arith.cmpi eq, %582, %583 : vector<2x16xi32>
    %585 = arith.extui %584 : vector<2x16xi1> to vector<2x16xi32>
    %586 = arith.sitofp %585 : vector<2x16xi32> to vector<2x16xf32>
    %cst_102 = arith.constant dense<0.000000e+00> : vector<2x32xf32>
    %587 = tpu.matmul %586, %3, %cst_102 {dimension_numbers = #tpu.dot_dimension_numbers<[1], [0], [0], [1], [0, 0, 1, 1], [], []>} : vector<2x16xf32>, vector<16x32xf32>, vector<2x32xf32> -> vector<2x32xf32>
    %588 = tpu.concatenate %587, %547 in 1 : vector<2x32xf32>, vector<2x32xf32> -> vector<2x64xf32>
    %cst_103 = arith.constant dense<0.000000e+00> : vector<2x128xf32>
    %589 = tpu.matmul %588, %6, %cst_103 {dimension_numbers = #tpu.dot_dimension_numbers<[1], [0], [0], [1], [0, 0, 1, 1], [], []>} : vector<2x64xf32>, vector<64x128xf32>, vector<2x128xf32> -> vector<2x128xf32>
    %590 = vector.broadcast %7 : vector<1x128xf32> to vector<2x128xf32>
    %591 = arith.addf %589, %590 : vector<2x128xf32>
    %592 = math.tanh %591 : vector<2x128xf32>
    %593 = arith.negf %591 : vector<2x128xf32>
    %594 = math.exp %593 : vector<2x128xf32>
    %cst_104 = arith.constant 1.000000e+00 : f32
    %595 = vector.broadcast %cst_104 : f32 to vector<2x128xf32>
    %596 = arith.addf %595, %594 : vector<2x128xf32>
    %597 = arith.divf %595, %596 : vector<2x128xf32>
    %598 = arith.select %25, %592, %597 : vector<2x128xi1>, vector<2x128xf32>
    %599 = vector.extract_strided_slice %598 {offsets = [0, 0], sizes = [2, 32], strides = [1, 1]} : vector<2x128xf32> to vector<2x32xf32>
    %600 = vector.extract_strided_slice %598 {offsets = [0, 32], sizes = [2, 32], strides = [1, 1]} : vector<2x128xf32> to vector<2x32xf32>
    %601 = vector.extract_strided_slice %598 {offsets = [0, 64], sizes = [2, 32], strides = [1, 1]} : vector<2x128xf32> to vector<2x32xf32>
    %602 = vector.extract_strided_slice %598 {offsets = [0, 96], sizes = [2, 32], strides = [1, 1]} : vector<2x128xf32> to vector<2x32xf32>
    %603 = arith.mulf %600, %545 : vector<2x32xf32>
    %604 = arith.mulf %599, %601 : vector<2x32xf32>
    %605 = arith.addf %603, %604 : vector<2x32xf32>
    %606 = math.tanh %605 : vector<2x32xf32>
    %607 = arith.mulf %602, %606 : vector<2x32xf32>
    %608 = vector.shape_cast %607 : vector<2x32xf32> to vector<2x1x32xf32>
    %609 = vector.broadcast %608 : vector<2x1x32xf32> to vector<2x8x32xf32>
    %610 = arith.mulf %340, %609 : vector<2x8x32xf32>
    %cst_105 = arith.constant dense<0.000000e+00> : vector<2x8xf32>
    %611 = vector.multi_reduction <add>, %610, %cst_105 [2] : vector<2x8x32xf32> to vector<2x8xf32>
    %612 = arith.addf %611, %17 : vector<2x8xf32>
    %cst_106 = arith.constant dense<0xFF800000> : vector<2xf32>
    %613 = vector.multi_reduction <maximumf>, %612, %cst_106 [1] : vector<2x8xf32> to vector<2xf32>
    %614 = vector.shape_cast %613 : vector<2xf32> to vector<2x1xf32>
    %615 = vector.broadcast %614 : vector<2x1xf32> to vector<2x8xf32>
    %616 = arith.subf %612, %615 : vector<2x8xf32>
    %617 = math.exp %616 : vector<2x8xf32>
    %cst_107 = arith.constant dense<0.000000e+00> : vector<2xf32>
    %618 = vector.multi_reduction <add>, %617, %cst_107 [1] : vector<2x8xf32> to vector<2xf32>
    %619 = vector.shape_cast %618 : vector<2xf32> to vector<2x1xf32>
    %620 = tpu.reciprocal %619 {approx = true} : vector<2x1xf32> -> vector<2x1xf32>
    %621 = vector.broadcast %620 : vector<2x1xf32> to vector<2x8xf32>
    %622 = arith.mulf %617, %621 : vector<2x8xf32>
    %623 = vector.shape_cast %622 : vector<2x8xf32> to vector<2x8x1xf32>
    %624 = vector.broadcast %623 : vector<2x8x1xf32> to vector<2x8x32xf32>
    %625 = arith.mulf %624, %340 : vector<2x8x32xf32>
    %cst_108 = arith.constant dense<0.000000e+00> : vector<2x32xf32>
    %626 = vector.multi_reduction <add>, %625, %cst_108 [1] : vector<2x8x32xf32> to vector<2x32xf32>
    %627 = tpu.concatenate %607, %626 in 1 : vector<2x32xf32>, vector<2x32xf32> -> vector<2x64xf32>
    %cst_109 = arith.constant dense<0.000000e+00> : vector<2x16xf32>
    %628 = tpu.matmul %627, %8, %cst_109 {dimension_numbers = #tpu.dot_dimension_numbers<[1], [0], [0], [1], [0, 0, 1, 1], [], []>} : vector<2x64xf32>, vector<64x16xf32>, vector<2x16xf32> -> vector<2x16xf32>
    %629 = vector.broadcast %9 : vector<1x16xf32> to vector<2x16xf32>
    %630 = arith.addf %628, %629 : vector<2x16xf32>
    %cst_110 = arith.constant dense<0xFF800000> : vector<2xf32>
    %631 = vector.multi_reduction <maximumf>, %630, %cst_110 [1] : vector<2x16xf32> to vector<2xf32>
    %632 = vector.shape_cast %631 : vector<2xf32> to vector<2x1xf32>
    %633 = vector.broadcast %632 : vector<2x1xf32> to vector<2x16xf32>
    %634 = arith.subf %630, %633 : vector<2x16xf32>
    %635 = math.exp %634 : vector<2x16xf32>
    %cst_111 = arith.constant dense<0.000000e+00> : vector<2xf32>
    %636 = vector.multi_reduction <add>, %635, %cst_111 [1] : vector<2x16xf32> to vector<2xf32>
    %637 = vector.shape_cast %636 : vector<2xf32> to vector<2x1xf32>
    %638 = tpu.reciprocal %637 {approx = true} : vector<2x1xf32> -> vector<2x1xf32>
    %639 = vector.broadcast %638 : vector<2x1xf32> to vector<2x16xf32>
    %640 = arith.mulf %635, %639 : vector<2x16xf32>
    %641 = vector.extract_strided_slice %1 {offsets = [0, 5], sizes = [2, 1], strides = [1, 1]} : vector<2x8xi32> to vector<2x1xi32>
    %642 = vector.broadcast %641 : vector<2x1xi32> to vector<2x16xi32>
    %643 = vector.broadcast %19 : vector<1x16xi32> to vector<2x16xi32>
    %644 = arith.cmpi eq, %642, %643 : vector<2x16xi32>
    %645 = arith.extui %644 : vector<2x16xi1> to vector<2x16xi32>
    %646 = arith.sitofp %645 : vector<2x16xi32> to vector<2x16xf32>
    %cst_112 = arith.constant dense<0.000000e+00> : vector<2x32xf32>
    %647 = tpu.matmul %646, %3, %cst_112 {dimension_numbers = #tpu.dot_dimension_numbers<[1], [0], [0], [1], [0, 0, 1, 1], [], []>} : vector<2x16xf32>, vector<16x32xf32>, vector<2x32xf32> -> vector<2x32xf32>
    %648 = tpu.concatenate %647, %607 in 1 : vector<2x32xf32>, vector<2x32xf32> -> vector<2x64xf32>
    %cst_113 = arith.constant dense<0.000000e+00> : vector<2x128xf32>
    %649 = tpu.matmul %648, %6, %cst_113 {dimension_numbers = #tpu.dot_dimension_numbers<[1], [0], [0], [1], [0, 0, 1, 1], [], []>} : vector<2x64xf32>, vector<64x128xf32>, vector<2x128xf32> -> vector<2x128xf32>
    %650 = vector.broadcast %7 : vector<1x128xf32> to vector<2x128xf32>
    %651 = arith.addf %649, %650 : vector<2x128xf32>
    %652 = math.tanh %651 : vector<2x128xf32>
    %653 = arith.negf %651 : vector<2x128xf32>
    %654 = math.exp %653 : vector<2x128xf32>
    %cst_114 = arith.constant 1.000000e+00 : f32
    %655 = vector.broadcast %cst_114 : f32 to vector<2x128xf32>
    %656 = arith.addf %655, %654 : vector<2x128xf32>
    %657 = arith.divf %655, %656 : vector<2x128xf32>
    %658 = arith.select %25, %652, %657 : vector<2x128xi1>, vector<2x128xf32>
    %659 = vector.extract_strided_slice %658 {offsets = [0, 0], sizes = [2, 32], strides = [1, 1]} : vector<2x128xf32> to vector<2x32xf32>
    %660 = vector.extract_strided_slice %658 {offsets = [0, 32], sizes = [2, 32], strides = [1, 1]} : vector<2x128xf32> to vector<2x32xf32>
    %661 = vector.extract_strided_slice %658 {offsets = [0, 64], sizes = [2, 32], strides = [1, 1]} : vector<2x128xf32> to vector<2x32xf32>
    %662 = vector.extract_strided_slice %658 {offsets = [0, 96], sizes = [2, 32], strides = [1, 1]} : vector<2x128xf32> to vector<2x32xf32>
    %663 = arith.mulf %660, %605 : vector<2x32xf32>
    %664 = arith.mulf %659, %661 : vector<2x32xf32>
    %665 = arith.addf %663, %664 : vector<2x32xf32>
    %666 = math.tanh %665 : vector<2x32xf32>
    %667 = arith.mulf %662, %666 : vector<2x32xf32>
    %668 = vector.shape_cast %667 : vector<2x32xf32> to vector<2x1x32xf32>
    %669 = vector.broadcast %668 : vector<2x1x32xf32> to vector<2x8x32xf32>
    %670 = arith.mulf %340, %669 : vector<2x8x32xf32>
    %cst_115 = arith.constant dense<0.000000e+00> : vector<2x8xf32>
    %671 = vector.multi_reduction <add>, %670, %cst_115 [2] : vector<2x8x32xf32> to vector<2x8xf32>
    %672 = arith.addf %671, %17 : vector<2x8xf32>
    %cst_116 = arith.constant dense<0xFF800000> : vector<2xf32>
    %673 = vector.multi_reduction <maximumf>, %672, %cst_116 [1] : vector<2x8xf32> to vector<2xf32>
    %674 = vector.shape_cast %673 : vector<2xf32> to vector<2x1xf32>
    %675 = vector.broadcast %674 : vector<2x1xf32> to vector<2x8xf32>
    %676 = arith.subf %672, %675 : vector<2x8xf32>
    %677 = math.exp %676 : vector<2x8xf32>
    %cst_117 = arith.constant dense<0.000000e+00> : vector<2xf32>
    %678 = vector.multi_reduction <add>, %677, %cst_117 [1] : vector<2x8xf32> to vector<2xf32>
    %679 = vector.shape_cast %678 : vector<2xf32> to vector<2x1xf32>
    %680 = tpu.reciprocal %679 {approx = true} : vector<2x1xf32> -> vector<2x1xf32>
    %681 = vector.broadcast %680 : vector<2x1xf32> to vector<2x8xf32>
    %682 = arith.mulf %677, %681 : vector<2x8xf32>
    %683 = vector.shape_cast %682 : vector<2x8xf32> to vector<2x8x1xf32>
    %684 = vector.broadcast %683 : vector<2x8x1xf32> to vector<2x8x32xf32>
    %685 = arith.mulf %684, %340 : vector<2x8x32xf32>
    %cst_118 = arith.constant dense<0.000000e+00> : vector<2x32xf32>
    %686 = vector.multi_reduction <add>, %685, %cst_118 [1] : vector<2x8x32xf32> to vector<2x32xf32>
    %687 = tpu.concatenate %667, %686 in 1 : vector<2x32xf32>, vector<2x32xf32> -> vector<2x64xf32>
    %cst_119 = arith.constant dense<0.000000e+00> : vector<2x16xf32>
    %688 = tpu.matmul %687, %8, %cst_119 {dimension_numbers = #tpu.dot_dimension_numbers<[1], [0], [0], [1], [0, 0, 1, 1], [], []>} : vector<2x64xf32>, vector<64x16xf32>, vector<2x16xf32> -> vector<2x16xf32>
    %689 = vector.broadcast %9 : vector<1x16xf32> to vector<2x16xf32>
    %690 = arith.addf %688, %689 : vector<2x16xf32>
    %cst_120 = arith.constant dense<0xFF800000> : vector<2xf32>
    %691 = vector.multi_reduction <maximumf>, %690, %cst_120 [1] : vector<2x16xf32> to vector<2xf32>
    %692 = vector.shape_cast %691 : vector<2xf32> to vector<2x1xf32>
    %693 = vector.broadcast %692 : vector<2x1xf32> to vector<2x16xf32>
    %694 = arith.subf %690, %693 : vector<2x16xf32>
    %695 = math.exp %694 : vector<2x16xf32>
    %cst_121 = arith.constant dense<0.000000e+00> : vector<2xf32>
    %696 = vector.multi_reduction <add>, %695, %cst_121 [1] : vector<2x16xf32> to vector<2xf32>
    %697 = vector.shape_cast %696 : vector<2xf32> to vector<2x1xf32>
    %698 = tpu.reciprocal %697 {approx = true} : vector<2x1xf32> -> vector<2x1xf32>
    %699 = vector.broadcast %698 : vector<2x1xf32> to vector<2x16xf32>
    %700 = arith.mulf %695, %699 : vector<2x16xf32>
    %701 = vector.extract_strided_slice %1 {offsets = [0, 6], sizes = [2, 1], strides = [1, 1]} : vector<2x8xi32> to vector<2x1xi32>
    %702 = vector.broadcast %701 : vector<2x1xi32> to vector<2x16xi32>
    %703 = vector.broadcast %19 : vector<1x16xi32> to vector<2x16xi32>
    %704 = arith.cmpi eq, %702, %703 : vector<2x16xi32>
    %705 = arith.extui %704 : vector<2x16xi1> to vector<2x16xi32>
    %706 = arith.sitofp %705 : vector<2x16xi32> to vector<2x16xf32>
    %cst_122 = arith.constant dense<0.000000e+00> : vector<2x32xf32>
    %707 = tpu.matmul %706, %3, %cst_122 {dimension_numbers = #tpu.dot_dimension_numbers<[1], [0], [0], [1], [0, 0, 1, 1], [], []>} : vector<2x16xf32>, vector<16x32xf32>, vector<2x32xf32> -> vector<2x32xf32>
    %708 = tpu.concatenate %707, %667 in 1 : vector<2x32xf32>, vector<2x32xf32> -> vector<2x64xf32>
    %cst_123 = arith.constant dense<0.000000e+00> : vector<2x128xf32>
    %709 = tpu.matmul %708, %6, %cst_123 {dimension_numbers = #tpu.dot_dimension_numbers<[1], [0], [0], [1], [0, 0, 1, 1], [], []>} : vector<2x64xf32>, vector<64x128xf32>, vector<2x128xf32> -> vector<2x128xf32>
    %710 = vector.broadcast %7 : vector<1x128xf32> to vector<2x128xf32>
    %711 = arith.addf %709, %710 : vector<2x128xf32>
    %712 = math.tanh %711 : vector<2x128xf32>
    %713 = arith.negf %711 : vector<2x128xf32>
    %714 = math.exp %713 : vector<2x128xf32>
    %cst_124 = arith.constant 1.000000e+00 : f32
    %715 = vector.broadcast %cst_124 : f32 to vector<2x128xf32>
    %716 = arith.addf %715, %714 : vector<2x128xf32>
    %717 = arith.divf %715, %716 : vector<2x128xf32>
    %718 = arith.select %25, %712, %717 : vector<2x128xi1>, vector<2x128xf32>
    %719 = vector.extract_strided_slice %718 {offsets = [0, 0], sizes = [2, 32], strides = [1, 1]} : vector<2x128xf32> to vector<2x32xf32>
    %720 = vector.extract_strided_slice %718 {offsets = [0, 32], sizes = [2, 32], strides = [1, 1]} : vector<2x128xf32> to vector<2x32xf32>
    %721 = vector.extract_strided_slice %718 {offsets = [0, 64], sizes = [2, 32], strides = [1, 1]} : vector<2x128xf32> to vector<2x32xf32>
    %722 = vector.extract_strided_slice %718 {offsets = [0, 96], sizes = [2, 32], strides = [1, 1]} : vector<2x128xf32> to vector<2x32xf32>
    %723 = arith.mulf %720, %665 : vector<2x32xf32>
    %724 = arith.mulf %719, %721 : vector<2x32xf32>
    %725 = arith.addf %723, %724 : vector<2x32xf32>
    %726 = math.tanh %725 : vector<2x32xf32>
    %727 = arith.mulf %722, %726 : vector<2x32xf32>
    %728 = vector.shape_cast %727 : vector<2x32xf32> to vector<2x1x32xf32>
    %729 = vector.broadcast %728 : vector<2x1x32xf32> to vector<2x8x32xf32>
    %730 = arith.mulf %340, %729 : vector<2x8x32xf32>
    %cst_125 = arith.constant dense<0.000000e+00> : vector<2x8xf32>
    %731 = vector.multi_reduction <add>, %730, %cst_125 [2] : vector<2x8x32xf32> to vector<2x8xf32>
    %732 = arith.addf %731, %17 : vector<2x8xf32>
    %cst_126 = arith.constant dense<0xFF800000> : vector<2xf32>
    %733 = vector.multi_reduction <maximumf>, %732, %cst_126 [1] : vector<2x8xf32> to vector<2xf32>
    %734 = vector.shape_cast %733 : vector<2xf32> to vector<2x1xf32>
    %735 = vector.broadcast %734 : vector<2x1xf32> to vector<2x8xf32>
    %736 = arith.subf %732, %735 : vector<2x8xf32>
    %737 = math.exp %736 : vector<2x8xf32>
    %cst_127 = arith.constant dense<0.000000e+00> : vector<2xf32>
    %738 = vector.multi_reduction <add>, %737, %cst_127 [1] : vector<2x8xf32> to vector<2xf32>
    %739 = vector.shape_cast %738 : vector<2xf32> to vector<2x1xf32>
    %740 = tpu.reciprocal %739 {approx = true} : vector<2x1xf32> -> vector<2x1xf32>
    %741 = vector.broadcast %740 : vector<2x1xf32> to vector<2x8xf32>
    %742 = arith.mulf %737, %741 : vector<2x8xf32>
    %743 = vector.shape_cast %742 : vector<2x8xf32> to vector<2x8x1xf32>
    %744 = vector.broadcast %743 : vector<2x8x1xf32> to vector<2x8x32xf32>
    %745 = arith.mulf %744, %340 : vector<2x8x32xf32>
    %cst_128 = arith.constant dense<0.000000e+00> : vector<2x32xf32>
    %746 = vector.multi_reduction <add>, %745, %cst_128 [1] : vector<2x8x32xf32> to vector<2x32xf32>
    %747 = tpu.concatenate %727, %746 in 1 : vector<2x32xf32>, vector<2x32xf32> -> vector<2x64xf32>
    %cst_129 = arith.constant dense<0.000000e+00> : vector<2x16xf32>
    %748 = tpu.matmul %747, %8, %cst_129 {dimension_numbers = #tpu.dot_dimension_numbers<[1], [0], [0], [1], [0, 0, 1, 1], [], []>} : vector<2x64xf32>, vector<64x16xf32>, vector<2x16xf32> -> vector<2x16xf32>
    %749 = vector.broadcast %9 : vector<1x16xf32> to vector<2x16xf32>
    %750 = arith.addf %748, %749 : vector<2x16xf32>
    %cst_130 = arith.constant dense<0xFF800000> : vector<2xf32>
    %751 = vector.multi_reduction <maximumf>, %750, %cst_130 [1] : vector<2x16xf32> to vector<2xf32>
    %752 = vector.shape_cast %751 : vector<2xf32> to vector<2x1xf32>
    %753 = vector.broadcast %752 : vector<2x1xf32> to vector<2x16xf32>
    %754 = arith.subf %750, %753 : vector<2x16xf32>
    %755 = math.exp %754 : vector<2x16xf32>
    %cst_131 = arith.constant dense<0.000000e+00> : vector<2xf32>
    %756 = vector.multi_reduction <add>, %755, %cst_131 [1] : vector<2x16xf32> to vector<2xf32>
    %757 = vector.shape_cast %756 : vector<2xf32> to vector<2x1xf32>
    %758 = tpu.reciprocal %757 {approx = true} : vector<2x1xf32> -> vector<2x1xf32>
    %759 = vector.broadcast %758 : vector<2x1xf32> to vector<2x16xf32>
    %760 = arith.mulf %755, %759 : vector<2x16xf32>
    %761 = vector.extract_strided_slice %1 {offsets = [0, 7], sizes = [2, 1], strides = [1, 1]} : vector<2x8xi32> to vector<2x1xi32>
    %762 = vector.broadcast %761 : vector<2x1xi32> to vector<2x16xi32>
    %763 = vector.broadcast %19 : vector<1x16xi32> to vector<2x16xi32>
    %764 = arith.cmpi eq, %762, %763 : vector<2x16xi32>
    %765 = arith.extui %764 : vector<2x16xi1> to vector<2x16xi32>
    %766 = arith.sitofp %765 : vector<2x16xi32> to vector<2x16xf32>
    %cst_132 = arith.constant dense<0.000000e+00> : vector<2x32xf32>
    %767 = tpu.matmul %766, %3, %cst_132 {dimension_numbers = #tpu.dot_dimension_numbers<[1], [0], [0], [1], [0, 0, 1, 1], [], []>} : vector<2x16xf32>, vector<16x32xf32>, vector<2x32xf32> -> vector<2x32xf32>
    %768 = tpu.concatenate %767, %727 in 1 : vector<2x32xf32>, vector<2x32xf32> -> vector<2x64xf32>
    %cst_133 = arith.constant dense<0.000000e+00> : vector<2x128xf32>
    %769 = tpu.matmul %768, %6, %cst_133 {dimension_numbers = #tpu.dot_dimension_numbers<[1], [0], [0], [1], [0, 0, 1, 1], [], []>} : vector<2x64xf32>, vector<64x128xf32>, vector<2x128xf32> -> vector<2x128xf32>
    %770 = vector.broadcast %7 : vector<1x128xf32> to vector<2x128xf32>
    %771 = arith.addf %769, %770 : vector<2x128xf32>
    %772 = math.tanh %771 : vector<2x128xf32>
    %773 = arith.negf %771 : vector<2x128xf32>
    %774 = math.exp %773 : vector<2x128xf32>
    %cst_134 = arith.constant 1.000000e+00 : f32
    %775 = vector.broadcast %cst_134 : f32 to vector<2x128xf32>
    %776 = arith.addf %775, %774 : vector<2x128xf32>
    %777 = arith.divf %775, %776 : vector<2x128xf32>
    %778 = arith.select %25, %772, %777 : vector<2x128xi1>, vector<2x128xf32>
    %779 = vector.extract_strided_slice %778 {offsets = [0, 0], sizes = [2, 32], strides = [1, 1]} : vector<2x128xf32> to vector<2x32xf32>
    %780 = vector.extract_strided_slice %778 {offsets = [0, 32], sizes = [2, 32], strides = [1, 1]} : vector<2x128xf32> to vector<2x32xf32>
    %781 = vector.extract_strided_slice %778 {offsets = [0, 64], sizes = [2, 32], strides = [1, 1]} : vector<2x128xf32> to vector<2x32xf32>
    %782 = vector.extract_strided_slice %778 {offsets = [0, 96], sizes = [2, 32], strides = [1, 1]} : vector<2x128xf32> to vector<2x32xf32>
    %783 = arith.mulf %780, %725 : vector<2x32xf32>
    %784 = arith.mulf %779, %781 : vector<2x32xf32>
    %785 = arith.addf %783, %784 : vector<2x32xf32>
    %786 = math.tanh %785 : vector<2x32xf32>
    %787 = arith.mulf %782, %786 : vector<2x32xf32>
    %788 = vector.shape_cast %787 : vector<2x32xf32> to vector<2x1x32xf32>
    %789 = vector.broadcast %788 : vector<2x1x32xf32> to vector<2x8x32xf32>
    %790 = arith.mulf %340, %789 : vector<2x8x32xf32>
    %cst_135 = arith.constant dense<0.000000e+00> : vector<2x8xf32>
    %791 = vector.multi_reduction <add>, %790, %cst_135 [2] : vector<2x8x32xf32> to vector<2x8xf32>
    %792 = arith.addf %791, %17 : vector<2x8xf32>
    %cst_136 = arith.constant dense<0xFF800000> : vector<2xf32>
    %793 = vector.multi_reduction <maximumf>, %792, %cst_136 [1] : vector<2x8xf32> to vector<2xf32>
    %794 = vector.shape_cast %793 : vector<2xf32> to vector<2x1xf32>
    %795 = vector.broadcast %794 : vector<2x1xf32> to vector<2x8xf32>
    %796 = arith.subf %792, %795 : vector<2x8xf32>
    %797 = math.exp %796 : vector<2x8xf32>
    %cst_137 = arith.constant dense<0.000000e+00> : vector<2xf32>
    %798 = vector.multi_reduction <add>, %797, %cst_137 [1] : vector<2x8xf32> to vector<2xf32>
    %799 = vector.shape_cast %798 : vector<2xf32> to vector<2x1xf32>
    %800 = tpu.reciprocal %799 {approx = true} : vector<2x1xf32> -> vector<2x1xf32>
    %801 = vector.broadcast %800 : vector<2x1xf32> to vector<2x8xf32>
    %802 = arith.mulf %797, %801 : vector<2x8xf32>
    %803 = vector.shape_cast %802 : vector<2x8xf32> to vector<2x8x1xf32>
    %804 = vector.broadcast %803 : vector<2x8x1xf32> to vector<2x8x32xf32>
    %805 = arith.mulf %804, %340 : vector<2x8x32xf32>
    %cst_138 = arith.constant dense<0.000000e+00> : vector<2x32xf32>
    %806 = vector.multi_reduction <add>, %805, %cst_138 [1] : vector<2x8x32xf32> to vector<2x32xf32>
    %807 = tpu.concatenate %787, %806 in 1 : vector<2x32xf32>, vector<2x32xf32> -> vector<2x64xf32>
    %cst_139 = arith.constant dense<0.000000e+00> : vector<2x16xf32>
    %808 = tpu.matmul %807, %8, %cst_139 {dimension_numbers = #tpu.dot_dimension_numbers<[1], [0], [0], [1], [0, 0, 1, 1], [], []>} : vector<2x64xf32>, vector<64x16xf32>, vector<2x16xf32> -> vector<2x16xf32>
    %809 = vector.broadcast %9 : vector<1x16xf32> to vector<2x16xf32>
    %810 = arith.addf %808, %809 : vector<2x16xf32>
    %cst_140 = arith.constant dense<0xFF800000> : vector<2xf32>
    %811 = vector.multi_reduction <maximumf>, %810, %cst_140 [1] : vector<2x16xf32> to vector<2xf32>
    %812 = vector.shape_cast %811 : vector<2xf32> to vector<2x1xf32>
    %813 = vector.broadcast %812 : vector<2x1xf32> to vector<2x16xf32>
    %814 = arith.subf %810, %813 : vector<2x16xf32>
    %815 = math.exp %814 : vector<2x16xf32>
    %cst_141 = arith.constant dense<0.000000e+00> : vector<2xf32>
    %816 = vector.multi_reduction <add>, %815, %cst_141 [1] : vector<2x16xf32> to vector<2xf32>
    %817 = vector.shape_cast %816 : vector<2xf32> to vector<2x1xf32>
    %818 = tpu.reciprocal %817 {approx = true} : vector<2x1xf32> -> vector<2x1xf32>
    %819 = vector.broadcast %818 : vector<2x1xf32> to vector<2x16xf32>
    %820 = arith.mulf %815, %819 : vector<2x16xf32>
    %821 = vector.shape_cast %400 : vector<2x16xf32> to vector<2x1x16xf32>
    %822 = vector.shape_cast %460 : vector<2x16xf32> to vector<2x1x16xf32>
    %823 = vector.shape_cast %520 : vector<2x16xf32> to vector<2x1x16xf32>
    %824 = vector.shape_cast %580 : vector<2x16xf32> to vector<2x1x16xf32>
    %825 = vector.shape_cast %640 : vector<2x16xf32> to vector<2x1x16xf32>
    %826 = vector.shape_cast %700 : vector<2x16xf32> to vector<2x1x16xf32>
    %827 = vector.shape_cast %760 : vector<2x16xf32> to vector<2x1x16xf32>
    %828 = vector.shape_cast %820 : vector<2x16xf32> to vector<2x1x16xf32>
    %829 = tpu.concatenate %821, %822, %823, %824, %825, %826, %827, %828 in 1 : vector<2x1x16xf32>, vector<2x1x16xf32>, vector<2x1x16xf32>, vector<2x1x16xf32>, vector<2x1x16xf32>, vector<2x1x16xf32>, vector<2x1x16xf32>, vector<2x1x16xf32> -> vector<2x8x16xf32>
    %c0_142 = arith.constant 0 : index
    %c0_143 = arith.constant 0 : index
    %c0_144 = arith.constant 0 : index
    %830 = vector.load %arg10[%c0_142, %c0_143, %c0_144] : memref<2x8x16xf32, #tpu.memory_space<vmem>>, vector<2x8x16xf32>
    tpu.vector_store %arg10[%c0_142, %c0_143, %c0_144], %829 {strides = array<i32>} : memref<2x8x16xf32, #tpu.memory_space<vmem>>, vector<2x8x16xf32>,
    return
  }
}

</mosaic_0001>

<bundles_post_ra>
// kernel: encdec_forward.1
= control target key start
LH: loop header
LB: loop body
LE: loop exit
PB: predicated region body
PF: predicated region fallthrough
CT: control target
= control target key end

     0   :  { %15 = vsyncpa [#allocation3], 0  ;;  %s8566_s0 = inlined_call_operand.vmem [shape: s32[2,8], index: 0, kind: input, shape index: {}]   ;;  %s8567_s1 = inlined_call_operand.vmem [shape: s32[2,8], index: 1, kind: input, shape index: {}]   ;;  %s8568_s2 = inlined_call_operand.vmem [shape: f32[16,32], index: 2, kind: input, shape index: {}]   ;;  %s8569_s3 = inlined_call_operand.hbm [shape: f32[16,32], index: 3, kind: input, shape index: {}]   ;;  %s8570_s4 = inlined_call_operand.vmem [shape: f32[64,128], index: 4, kind: input, shape index: {}]   ;;  %s8571_s5 = inlined_call_operand.vmem [shape: f32[1,128], index: 5, kind: input, shape index: {}]   ;;  %s8572_s6 = inlined_call_operand.hbm [shape: f32[64,128], index: 6, kind: input, shape index: {}]   ;;  %s8573_s7 = inlined_call_operand.vmem [shape: f32[1,128], index: 7, kind: input, shape index: {}]   ;;  %s8574_s8 = inlined_call_operand.vmem [shape: f32[64,16], index: 8, kind: input, shape index: {}]   ;;  %s8575_s9 = inlined_call_operand.vmem [shape: f32[1,16], index: 9, kind: input, shape index: {}]   ;;  %s8576_s10 = inlined_call_operand.hbm [shape: f32[2,8,16], index: 10, kind: output, shape index: {}]  }
   0x1   :  { %16 = vsyncpa [#allocation6], 0 }
   0x2   :  { %17 = vsyncpa [#allocation4], 0  ;;  %s7190_s13 = smov [#allocation2]   ;;  %s7118_s17 = scalar_lea.hbm %s8569_s3, 256 }
   0x3   :  { %s29_s14 = sshll.u32 %s7190_s13, 4  ;;  %p7119_p0 = scmp.ne.s32.totalorder %s8569_s3, %s7118_s17  ;;  %s30_s14 = int_to_ptr.vmem [resolvable:$true] %s29_s14 }
   0x4   :  { %p7122_p1 = scmp.lt.u32.totalorder %s7118_s17, %s8569_s3 }
   0x6   :  { %p7124_p2 = pnand %p7122_p1, %p7119_p0 }
   0x8   :  { %7127 = shalt.err (!%p7124_p2)
}
   0x9   :  { %s7128_s22 = scalar_lea.vmem %s30_s14, 256  ;;  %p7133_p4 = scmp.lt.s32.totalorder %s30_s14, %s30_s14 }
   0xa   :  { %p7129_p3 = scmp.ne.s32.totalorder %s30_s14, %s7128_s22  ;;  %p7134_p5 = scmp.lt.s32.totalorder %s7128_s22, %s7128_s22 }
   0xc   :  { %p7135_p6 = por %p7134_p5, %p7133_p4 }
   0xe   :  { %p7136_p7 = pnand %p7135_p6, %p7129_p3 }
  0x10   :  { %7139 = shalt.err (!%p7136_p7)
}
  0x11   :  { %s7191_s23 = smov 128   ;;  %s7192_s24 = smov 8  }
  0x12   :  { %35 = dma.hbm_to_vmem [thread:$0]  %s8569_s3, 256, %s30_s14, [#allocation3], %s7191_s23, %s7191_s23, %s7192_s24  }
  0x13   :  { %s7193_s27 = smov [#allocation5]   ;;  %s7140_s11 = scalar_lea.hbm %s8572_s6, 1024 }
  0x14   :  { %s45_s28 = sshll.u32 %s7193_s27, 4  ;;  %p7141_p8 = scmp.ne.s32.totalorder %s8572_s6, %s7140_s11  ;;  %s46_s28 = int_to_ptr.vmem [resolvable:$true] %s45_s28 }
  0x15   :  { %p7144_p9 = scmp.lt.u32.totalorder %s7140_s11, %s8572_s6 }
  0x17   :  { %p7146_p10 = pnand %p7144_p9, %p7141_p8 }
  0x19   :  { %7149 = shalt.err (!%p7146_p10)
}
  0x1a   :  { %s7150_s17 = scalar_lea.vmem %s46_s28, 1024  ;;  %p7155_p12 = scmp.lt.s32.totalorder %s46_s28, %s46_s28 }
  0x1b   :  { %p7151_p11 = scmp.ne.s32.totalorder %s46_s28, %s7150_s17  ;;  %p7156_p13 = scmp.lt.s32.totalorder %s7150_s17, %s7150_s17 }
  0x1d   :  { %p7157_p0 = por %p7156_p13, %p7155_p12 }
  0x1f   :  { %p7158_p1 = pnand %p7157_p0, %p7151_p11 }
  0x21   :  { %7161 = shalt.err (!%p7158_p1)
}
  0x22   :  { %51 = dma.hbm_to_vmem [thread:$0]  %s8572_s6, 1024, %s46_s28, [#allocation6], %s7191_s23, %s7191_s23, %s7192_s24  }
  0x23   :  { %7184 = dma.done.wait [#allocation3], 256  }
  0x24   :  { %7185 = vsyncadd [#allocation3], 4294967040 }
  0x25   :  { %7186 = dma.done.wait [#allocation6], 1024  }
  0x26   :  { %7187 = vsyncadd [#allocation6], 4294966272  ;;  %v7194_v0 = vmov 0   ;;  %v7195_v1 = vmov 0.0|0.0   ;;  %v7301_v2 = vld [vmem:[%s8566_s0] sm:$0x3]  ;;  %v102_v19 = vlaneseq }
  0x27   :  { %6874 = vset.pattern.permute.xlu0 %v7194_v0  ;;  %6519 = vmatprep.subr.bf16.mxu0 %v7195_v1  ;;  %v66_v3 = vld [vmem:[%s8568_s2] sm:$0xff]  ;;  %v67_v4 = vld [vmem:[%s8568_s2 + $0x8] sm:$0xff]  ;;  %vm7196_vm0 = vmmov 0   ;;  %v7197_v6 = vmov 0.0   ;;  %v72_v9 = vld [vmem:[%s8570_s4 + $0x10] sm:$0xff]  ;;  %vm113_vm1 = vcmask 130048  }
  0x28   :  { %6522 = vmatprep.subr.bf16.mxu1 %v7195_v1  ;;  %6876 = vset.pattern.permute.xlu1 %v7194_v0  ;;  %v7310_v5 = vpack.c.bf16 %v67_v4, %v66_v3  ;;  %v70_v7 = vld [vmem:[%s8570_s4] sm:$0xff]  ;;  %v71_v8 = vld [vmem:[%s8570_s4 + $0x8] sm:$0xff]  ;;  %v73_v11 = vld [vmem:[%s8570_s4 + $0x18] sm:$0xff]  ;;  %v7359_v20 = vand.u32 127, %v102_v19  ;;  %vm187_vm3 = vcmask 261120   ;;  %vm195_vm4 = vcmask 523264  }
  0x29   :  { %108 = vperm.xlu0 %6874, %v7301_v2   ;;  %5955 = vmatprep.mubr.msk.f32.mxu0 %vm7196_vm0, %v7197_v6  ;;  %v7326_v10 = vpack.c.bf16 %v71_v8, %v70_v7  ;;  %v7333_v12 = vpack.c.bf16 %v73_v11, %v72_v9  ;;  %v74_v13 = vld [vmem:[%s8570_s4 + $0x20] sm:$0xff]  ;;  %v75_v14 = vld [vmem:[%s8570_s4 + $0x28] sm:$0xff]  ;;  %v76_v16 = vld [vmem:[%s8570_s4 + $0x30] sm:$0xff]  ;;  %v7198_v33 = vmov 1   ;;  %vm97_vm8 = vcmp.ne.s32.totalorder %v7301_v2, 0  ;;  %s7200_s19 = smov 32  }
  0x2a   :  { %5974 = vmatprep.mubr.msk.f32.mxu1 %vm7196_vm0, %v7197_v6  ;;  %6521 = vmatpush3.bf16.msra.mxu0 %v7310_v5  ;;  %v7343_v15 = vpack.c.bf16 %v75_v14, %v74_v13  ;;  %v77_v17 = vld [vmem:[%s8570_s4 + $0x38] sm:$0xff]  ;;  %v7377_v26 = vld [vmem:[%s8571_s5] ss:$0 sm:$0xff]  ;;  %vm104_vm5 = vcmp.ge.s32.totalorder %v7359_v20, 64  ;;  %vm105_vm6 = vcmp.lt.s32.totalorder %v7359_v20, 96  ;;  %s7199_s5 = smov 64  }
  0x2b   :  { %6534 = vmatprep.subr.bf16.mxu0 %v7195_v1  ;;  %6524 = vmatpush3.bf16.msra.mxu1 %v7326_v10  ;;  %v7353_v18 = vpack.c.bf16 %v77_v17, %v76_v16  ;;  %vm7384_vm7 = vmand %vm104_vm5, %vm105_vm6  ;;  %v7393_v38 = vsel %vm97_vm8, 1.0, %v7197_v6  ;;  %v7201_v56 = vmov 2  }
  0x2c   :  { %6525 = vmatprep.subr.bf16.mxu1 %v7195_v1  ;;  %vm294_vm9 = vcmp.gt.f32.partialorder %v7393_v38, 0.0 }
  0x2d   :  { %6875 = vset.pattern.permute.xlu0 %v7198_v33  ;;  %v7398_v41 = vsel %vm294_vm9, 1, %v7194_v0 }
  0x2e   :  { %303 = vperm.xlu0 %6875, %v7301_v2  }
  0x2f   :  { %6527 = vmatpush3.bf16.msra.mxu1 %v7333_v12 }
  0x30   :  { %6528 = vmatprep.subr.bf16.mxu1 %v7195_v1 }
  0x32   :  { %6877 = vset.pattern.permute.xlu0 %v7201_v56 }
  0x33   :  { %6530 = vmatpush3.bf16.msra.mxu1 %v7343_v15 }
  0x34   :  { %6531 = vmatprep.subr.bf16.mxu1 %v7195_v1 }
  0x37   :  { %6533 = vmatpush3.bf16.msra.mxu1 %v7353_v18 }
  0x38   :  { %6549 = vmatprep.subr.bf16.mxu1 %v7195_v1 }
  0xa8   :  { %v109_v21 = vpop.permute.xlu0 %108 }
  0xa9   :  { %vm110_vm2 = vcmp.eq.s32.totalorder %v109_v21, %v7359_v20 }
  0xaa   :  { %v5612_v22 = vsel %vm110_vm2, 1.0, %v7197_v6 }
  0xab   :  { %5956 = vmatmul.mubr.msk.f32.vlgmr.msra.gmra.mrb[0].mxu0 %vm113_vm1, %v5612_v22 }
  0xac   :  { %6536 = vmatpush3.bf16.msra.mxu0 %v7310_v5  ;;  %5981 = vmatprep.mubr.msk.f32.mxu0 %vm7196_vm0, %v7197_v6 }
  0xad   :  { %6537 = vmatprep.subr.bf16.mxu0 %v7195_v1  ;;  %v304_v42 = vpop.permute.xlu0 %303 }
  0xae   :  { %vm305_vm10 = vcmp.eq.s32.totalorder %v304_v42, %v7359_v20 }
  0xaf   :  { %v5617_v43 = vsel %vm305_vm10, 1.0, %v7197_v6 }
  0xb0   :  { %5982 = vmatmul.mubr.msk.f32.vlgmr.msra.gmra.mrb[2].mxu0 %vm113_vm1, %v5617_v43 }
  0xb1   :  { %6539 = vmatpush3.bf16.msra.mxu0 %v7326_v10  ;;  %6000 = vmatprep.mubr.msk.f32.mxu0 %vm7196_vm0, %v7197_v6 }
  0xb2   :  { %6540 = vmatprep.subr.bf16.mxu0 %v7195_v1 }
  0xb5   :  { %6542 = vmatpush3.bf16.msra.mxu0 %v7333_v12 }
  0xb6   :  { %6543 = vmatprep.subr.bf16.mxu0 %v7195_v1 }
  0xb9   :  { %6545 = vmatpush3.bf16.msra.mxu0 %v7343_v15 }
  0xba   :  { %6546 = vmatprep.subr.bf16.mxu0 %v7195_v1 }
  0xbd   :  { %6548 = vmatpush3.bf16.msra.mxu0 %v7353_v18 }
  0xbe   :  { %6564 = vmatprep.subr.bf16.mxu0 %v7195_v1 }
 0x17e   :  { %v183_v23 = vpop.f32.mrb[0].mxu0 }
 0x17f   :  { %v188_v24 = vsel %vm187_vm3, %v183_v23, 0.0  ;;  %v5957_v25 = vpop.f32.mrb[1].mxu0 }
 0x180   :  { %5975 = vmatmul.mubr.msk.f32.vlgmr.msra.gmra.mrb[0].mxu1 %vm195_vm4, %v188_v24 }
 0x181   :  { %6551 = vmatpush3.bf16.msra.mxu1 %v7310_v5  ;;  %6007 = vmatprep.mubr.msk.f32.mxu1 %vm7196_vm0, %v7197_v6 }
 0x182   :  { %6552 = vmatprep.subr.bf16.mxu1 %v7195_v1 }
 0x183   :  { %v377_v48 = vpop.f32.mrb[2].mxu0 }
 0x184   :  { %v5983_v49 = vpop.f32.mrb[3].mxu0 }
 0x253   :  { %v265_v27 = vpop.f32.mrb[0].mxu1 }
 0x254   :  { %v266_v28 = vadd.f32 %v7377_v26, %v265_v27  ;;  %v5976_v29 = vpop.f32.mrb[1].mxu1 }
 0x256   :  { %v5616_v30 = vmul.f32 -1.442695, %v266_v28 }
 0x258   :  { %6906 = vpow2.f32 %v5616_v30 }
 0x259   :  { %6908 = vtanh.f32 %v266_v28 }
 0x262   :  { %v6907_v31 = vpop.eup %6906 }
 0x263   :  { %v273_v32 = vadd.f32 1.0, %v6907_v31  ;;  %v6909_v35 = vpop.eup %6908  ;;  %v7202_v31 = vmov 3  }
 0x265   :  { %6910 = vrcp.f32 %v273_v32 }
 0x26f   :  { %v6911_v36 = vpop.eup %6910 }
 0x270   :  { %v276_v37 = vsel %vm7384_vm7, %v6909_v35, %v6911_v36 }
 0x271   :  { %279 = vrot.lane.b32.xlu1 %v276_v37, %s7199_s5  ;;  %v277_v44 = vmul.f32 0.0, %v276_v37 }
 0x2e3   :  { %v280_v39 = vpop.permute.xlu1 %279 }
 0x2e4   :  { %v282_v40 = vmul.f32 %v280_v39, %v276_v37 }
 0x2e6   :  { %284 = vrot.lane.b32.xlu1 %v282_v40, %s7200_s19 }
 0x2ea   :  { %297 = vperm.xlu1 %6876, %v7398_v41  }
 0x358   :  { %v285_v45 = vpop.permute.xlu1 %284 }
 0x359   :  { %v287_v46 = vadd.f32 %v285_v45, %v277_v44 }
 0x35b   :  { %6912 = vtanh.f32 %v287_v46 }
 0x365   :  { %v6913_v47 = vpop.eup %6912 }
 0x366   :  { %290 = vrot.lane.b32.xlu0 %v6913_v47, %s7199_s5 }
 0x369   :  { %v298_v50 = vpop.permute.xlu1 %297 }
 0x36a   :  { %vm299_vm11 = vcmp.eq.s32.totalorder %v298_v50, 1  ;;  %491 = vperm.xlu0 %6877, %v7301_v2  }
 0x36b   :  { %v301_v13 = vsel %vm299_vm11, %v287_v46, 0.0 }
 0x36e   :  { %6878 = vset.pattern.permute.xlu0 %v7198_v33 }
 0x36f   :  { %485 = vperm.xlu0 %6878, %v7398_v41  }
 0x373   :  { %6879 = vset.pattern.permute.xlu0 %v7202_v31 }
 0x374   :  { %679 = vperm.xlu0 %6879, %v7301_v2  }
 0x378   :  { %6880 = vset.pattern.permute.xlu0 %v7201_v56 }
 0x379   :  { %673 = vperm.xlu0 %6880, %v7398_v41  }
 0x3d8   :  { %v291_v51 = vpop.permute.xlu0 %290 }
 0x3d9   :  { %v293_v52 = vmul.f32 %v291_v51, %v276_v37 }
 0x3db   :  { %v7416_v53 = vsel %vm299_vm11, %v293_v52, 0.0 }
 0x3dc   :  { %382 = vrot.lane.b32.xlu1 %v7416_v53, %s7199_s5 }
 0x3e9   :  { %v492_v7 = vpop.permute.xlu0 %491 }
 0x3ea   :  { %vm493_vm12 = vcmp.eq.s32.totalorder %v492_v7, %v7359_v20 }
 0x3eb   :  { %v5621_v8 = vsel %vm493_vm12, 1.0, %v7197_v6 }
 0x3ec   :  { %6008 = vmatmul.mubr.msk.f32.vlgmr.msra.gmra.mrb[2].mxu1 %vm113_vm1, %v5621_v8 }
 0x3ed   :  { %6554 = vmatpush3.bf16.msra.mxu1 %v7326_v10  ;;  %6026 = vmatprep.mubr.msk.f32.mxu1 %vm7196_vm0, %v7197_v6 }
 0x3ee   :  { %6555 = vmatprep.subr.bf16.mxu1 %v7195_v1  ;;  %v486_v24 = vpop.permute.xlu0 %485 }
 0x3ef   :  { %vm487_vm13 = vcmp.eq.s32.totalorder %v486_v24, 1 }
 0x3f1   :  { %6557 = vmatpush3.bf16.msra.mxu1 %v7333_v12 }
 0x3f2   :  { %6558 = vmatprep.subr.bf16.mxu1 %v7195_v1 }
 0x3f3   :  { %v680_v45 = vpop.permute.xlu0 %679 }
 0x3f4   :  { %vm681_vm14 = vcmp.eq.s32.totalorder %v680_v45, %v7359_v20  ;;  %v7204_v45 = vmov 5  }
 0x3f5   :  { %6560 = vmatpush3.bf16.msra.mxu1 %v7343_v15  ;;  %v5625_v46 = vsel %vm681_vm14, 1.0, %v7197_v6 }
 0x3f6   :  { %6561 = vmatprep.subr.bf16.mxu1 %v7195_v1 }
 0x3f9   :  { %6563 = vmatpush3.bf16.msra.mxu1 %v7353_v18 }
 0x3fa   :  { %6579 = vmatprep.subr.bf16.mxu1 %v7195_v1 }
 0x44e   :  { %v383_v54 = vpop.permute.xlu1 %382 }
 0x44f   :  { %v385_v55 = vsel %vm187_vm3, %v377_v48, %v383_v54 }
 0x450   :  { %6001 = vmatmul.mubr.msk.f32.vlgmr.msra.gmra.mrb[4].mxu0 %vm195_vm4, %v385_v55 }
 0x451   :  { %6566 = vmatpush3.bf16.msra.mxu0 %v7310_v5  ;;  %6033 = vmatprep.mubr.msk.f32.mxu0 %vm7196_vm0, %v7197_v6 }
 0x452   :  { %6567 = vmatprep.subr.bf16.mxu0 %v7195_v1 }
 0x454   :  { %6034 = vmatmul.mubr.msk.f32.vlgmr.msra.gmra.mrb[6].mxu0 %vm113_vm1, %v5625_v46 }
 0x455   :  { %6569 = vmatpush3.bf16.msra.mxu0 %v7326_v10  ;;  %6052 = vmatprep.mubr.msk.f32.mxu0 %vm7196_vm0, %v7197_v6 }
 0x456   :  { %6570 = vmatprep.subr.bf16.mxu0 %v7195_v1 }
 0x459   :  { %6572 = vmatpush3.bf16.msra.mxu0 %v7333_v12 }
 0x45a   :  { %6573 = vmatprep.subr.bf16.mxu0 %v7195_v1 }
 0x45d   :  { %6575 = vmatpush3.bf16.msra.mxu0 %v7343_v15 }
 0x45e   :  { %6576 = vmatprep.subr.bf16.mxu0 %v7195_v1 }
 0x461   :  { %6578 = vmatpush3.bf16.msra.mxu0 %v7353_v18 }
 0x462   :  { %6594 = vmatprep.subr.bf16.mxu0 %v7195_v1 }
 0x4bf   :  { %v565_v21 = vpop.f32.mrb[2].mxu1 }
 0x4c0   :  { %v6009_v23 = vpop.f32.mrb[3].mxu1 }
 0x523   :  { %v455_v57 = vpop.f32.mrb[4].mxu0 }
 0x524   :  { %v456_v58 = vadd.f32 %v7377_v26, %v455_v57  ;;  %v6002_v59 = vpop.f32.mrb[5].mxu0 }
 0x526   :  { %v5620_v60 = vmul.f32 -1.442695, %v456_v58 }
 0x527   :  { %v753_v54 = vpop.f32.mrb[6].mxu0 }
 0x528   :  { %6914 = vpow2.f32 %v5620_v60  ;;  %v6035_v57 = vpop.f32.mrb[7].mxu0 }
 0x529   :  { %6916 = vtanh.f32 %v456_v58  ;;  %v674_v58 = vpop.permute.xlu0 %673 }
 0x52a   :  { %vm675_vm15 = vcmp.eq.s32.totalorder %v674_v58, 1 }
 0x532   :  { %v6915_v61 = vpop.eup %6914 }
 0x533   :  { %v463_v62 = vadd.f32 1.0, %v6915_v61  ;;  %v6917_v63 = vpop.eup %6916 }
 0x535   :  { %6918 = vrcp.f32 %v463_v62 }
 0x53f   :  { %v6919_v3 = vpop.eup %6918 }
 0x540   :  { %v466_v4 = vsel %vm7384_vm7, %v6917_v63, %v6919_v3  ;;  %v7203_v3 = vmov 4  }
 0x541   :  { %469 = vrot.lane.b32.xlu1 %v466_v4, %s7199_s5  ;;  %v467_v14 = vmul.f32 %v466_v4, %v301_v13  ;;  %6881 = vset.pattern.permute.xlu0 %v7203_v3 }
 0x542   :  { %867 = vperm.xlu0 %6881, %v7301_v2  }
 0x546   :  { %6882 = vset.pattern.permute.xlu0 %v7202_v31 }
 0x547   :  { %861 = vperm.xlu0 %6882, %v7398_v41  }
 0x54b   :  { %6883 = vset.pattern.permute.xlu0 %v7204_v45 }
 0x54c   :  { %1055 = vperm.xlu0 %6883, %v7301_v2  }
 0x550   :  { %6884 = vset.pattern.permute.xlu0 %v7203_v3 }
 0x551   :  { %1049 = vperm.xlu0 %6884, %v7398_v41  }
 0x5b3   :  { %v470_v9 = vpop.permute.xlu1 %469 }
 0x5b4   :  { %v472_v11 = vmul.f32 %v470_v9, %v466_v4 }
 0x5b6   :  { %474 = vrot.lane.b32.xlu1 %v472_v11, %s7200_s19 }
 0x628   :  { %v475_v16 = vpop.permute.xlu1 %474 }
 0x629   :  { %v477_v17 = vadd.f32 %v475_v16, %v467_v14 }
 0x62b   :  { %6920 = vtanh.f32 %v477_v17  ;;  %v489_v49 = vsel %vm487_vm13, %v477_v17, %v301_v13 }
 0x635   :  { %v6921_v22 = vpop.eup %6920 }
 0x636   :  { %480 = vrot.lane.b32.xlu1 %v6921_v22, %s7199_s5 }
 0x6a8   :  { %v481_v25 = vpop.permute.xlu1 %480 }
 0x6a9   :  { %v483_v27 = vmul.f32 %v481_v25, %v466_v4 }
 0x6ab   :  { %v7452_v28 = vsel %vm487_vm13, %v483_v27, %v7416_v53 }
 0x6ac   :  { %570 = vrot.lane.b32.xlu1 %v7452_v28, %s7199_s5 }
 0x71e   :  { %v571_v29 = vpop.permute.xlu1 %570 }
 0x71f   :  { %v573_v30 = vsel %vm187_vm3, %v565_v21, %v571_v29  ;;  %v868_v21 = vpop.permute.xlu0 %867 }
 0x720   :  { %6027 = vmatmul.mubr.msk.f32.vlgmr.msra.gmra.mrb[4].mxu1 %vm195_vm4, %v573_v30  ;;  %vm869_vm2 = vcmp.eq.s32.totalorder %v868_v21, %v7359_v20 }
 0x721   :  { %6581 = vmatpush3.bf16.msra.mxu1 %v7310_v5  ;;  %6059 = vmatprep.mubr.msk.f32.mxu1 %vm7196_vm0, %v7197_v6  ;;  %v5629_v22 = vsel %vm869_vm2, 1.0, %v7197_v6  ;;  %vm1870_vm2 = vcmask 1041408  }
 0x722   :  { %6582 = vmatprep.subr.bf16.mxu1 %v7195_v1 }
 0x724   :  { %6060 = vmatmul.mubr.msk.f32.vlgmr.msra.gmra.mrb[6].mxu1 %vm113_vm1, %v5629_v22 }
 0x725   :  { %6584 = vmatpush3.bf16.msra.mxu1 %v7326_v10  ;;  %6078 = vmatprep.mubr.msk.f32.mxu1 %vm7196_vm0, %v7197_v6 }
 0x726   :  { %6585 = vmatprep.subr.bf16.mxu1 %v7195_v1 }
 0x729   :  { %6587 = vmatpush3.bf16.msra.mxu1 %v7333_v12 }
 0x72a   :  { %6588 = vmatprep.subr.bf16.mxu1 %v7195_v1 }
 0x72d   :  { %6590 = vmatpush3.bf16.msra.mxu1 %v7343_v15 }
 0x72e   :  { %6591 = vmatprep.subr.bf16.mxu1 %v7195_v1 }
 0x731   :  { %6593 = vmatpush3.bf16.msra.mxu1 %v7353_v18 }
 0x732   :  { %6609 = vmatprep.subr.bf16.mxu1 %v7195_v1 }
 0x7f3   :  { %v643_v32 = vpop.f32.mrb[4].mxu1 }
 0x7f4   :  { %v644_v35 = vadd.f32 %v7377_v26, %v643_v32  ;;  %v6028_v36 = vpop.f32.mrb[5].mxu1 }
 0x7f6   :  { %v5624_v37 = vmul.f32 -1.442695, %v644_v35 }
 0x7f7   :  { %v941_v32 = vpop.f32.mrb[6].mxu1 }
 0x7f8   :  { %6922 = vpow2.f32 %v5624_v37  ;;  %v6061_v36 = vpop.f32.mrb[7].mxu1  ;;  %v862_v37 = vpop.permute.xlu0 %861 }
 0x7f9   :  { %6924 = vtanh.f32 %v644_v35  ;;  %vm863_vm5 = vcmp.eq.s32.totalorder %v862_v37, 1 }
 0x7fc   :  { %v1056_v57 = vpop.permute.xlu0 %1055 }
 0x7fd   :  { %vm1057_vm6 = vcmp.eq.s32.totalorder %v1056_v57, %v7359_v20 }
 0x7fe   :  { %v5633_v58 = vsel %vm1057_vm6, 1.0, %v7197_v6  ;;  %vm1876_vm6 = vcmask 1043456  }
 0x802   :  { %v6923_v39 = vpop.eup %6922 }
 0x803   :  { %v651_v40 = vadd.f32 1.0, %v6923_v39  ;;  %v6925_v42 = vpop.eup %6924 }
 0x805   :  { %6926 = vrcp.f32 %v651_v40 }
 0x80f   :  { %v6927_v43 = vpop.eup %6926 }
 0x810   :  { %v654_v44 = vsel %vm7384_vm7, %v6925_v42, %v6927_v43 }
 0x811   :  { %657 = vrot.lane.b32.xlu1 %v654_v44, %s7199_s5  ;;  %v655_v50 = vmul.f32 %v654_v44, %v489_v49 }
 0x883   :  { %v658_v47 = vpop.permute.xlu1 %657 }
 0x884   :  { %v660_v48 = vmul.f32 %v658_v47, %v654_v44 }
 0x886   :  { %662 = vrot.lane.b32.xlu1 %v660_v48, %s7200_s19 }
 0x8f8   :  { %v663_v51 = vpop.permute.xlu1 %662 }
 0x8f9   :  { %v665_v52 = vadd.f32 %v663_v51, %v655_v50 }
 0x8fb   :  { %6928 = vtanh.f32 %v665_v52  ;;  %v677_v25 = vsel %vm675_vm15, %v665_v52, %v489_v49 }
 0x905   :  { %v6929_v55 = vpop.eup %6928 }
 0x906   :  { %668 = vrot.lane.b32.xlu1 %v6929_v55, %s7199_s5 }
 0x978   :  { %v669_v59 = vpop.permute.xlu1 %668 }
 0x979   :  { %v671_v60 = vmul.f32 %v669_v59, %v654_v44 }
 0x97b   :  { %v7488_v61 = vsel %vm675_vm15, %v671_v60, %v7452_v28  ;;  %vm1867_vm15 = vcmask 1040384  }
 0x97c   :  { %758 = vrot.lane.b32.xlu1 %v7488_v61, %s7199_s5 }
 0x9ee   :  { %v759_v62 = vpop.permute.xlu1 %758 }
 0x9ef   :  { %v761_v63 = vsel %vm187_vm3, %v753_v54, %v759_v62 }
 0x9f0   :  { %6053 = vmatmul.mubr.msk.f32.vlgmr.msra.gmra.mrb[8].mxu0 %vm195_vm4, %v761_v63 }
 0x9f1   :  { %6596 = vmatpush3.bf16.msra.mxu0 %v7310_v5  ;;  %6085 = vmatprep.mubr.msk.f32.mxu0 %vm7196_vm0, %v7197_v6 }
 0x9f2   :  { %6597 = vmatprep.subr.bf16.mxu0 %v7195_v1 }
 0x9f4   :  { %6086 = vmatmul.mubr.msk.f32.vlgmr.msra.gmra.mrb[10].mxu0 %vm113_vm1, %v5633_v58 }
 0x9f5   :  { %6599 = vmatpush3.bf16.msra.mxu0 %v7326_v10  ;;  %6104 = vmatprep.mubr.msk.f32.mxu0 %vm7196_vm0, %v7197_v6 }
 0x9f6   :  { %6600 = vmatprep.subr.bf16.mxu0 %v7195_v1 }
 0x9f9   :  { %6602 = vmatpush3.bf16.msra.mxu0 %v7333_v12 }
 0x9fa   :  { %6603 = vmatprep.subr.bf16.mxu0 %v7195_v1 }
 0x9fd   :  { %6605 = vmatpush3.bf16.msra.mxu0 %v7343_v15 }
 0x9fe   :  { %6606 = vmatprep.subr.bf16.mxu0 %v7195_v1 }
 0xa01   :  { %6608 = vmatpush3.bf16.msra.mxu0 %v7353_v18 }
 0xa02   :  { %6624 = vmatprep.subr.bf16.mxu0 %v7195_v1 }
 0xac3   :  { %v831_v4 = vpop.f32.mrb[8].mxu0 }
 0xac4   :  { %v832_v7 = vadd.f32 %v7377_v26, %v831_v4  ;;  %v6054_v8 = vpop.f32.mrb[9].mxu0 }
 0xac6   :  { %v5628_v9 = vmul.f32 -1.442695, %v832_v7 }
 0xac7   :  { %v1129_v8 = vpop.f32.mrb[10].mxu0 }
 0xac8   :  { %6930 = vpow2.f32 %v5628_v9 }
 0xac9   :  { %6932 = vtanh.f32 %v832_v7 }
 0xad2   :  { %v6931_v11 = vpop.eup %6930 }
 0xad3   :  { %v839_v13 = vadd.f32 1.0, %v6931_v11  ;;  %v6933_v14 = vpop.eup %6932  ;;  %v6087_v11 = vpop.f32.mrb[11].mxu0 }
 0xad5   :  { %6934 = vrcp.f32 %v839_v13  ;;  %v1050_v13 = vpop.permute.xlu0 %1049 }
 0xad6   :  { %vm1051_vm8 = vcmp.eq.s32.totalorder %v1050_v13, 1 }
 0xadf   :  { %v6935_v16 = vpop.eup %6934 }
 0xae0   :  { %v842_v17 = vsel %vm7384_vm7, %v6933_v14, %v6935_v16 }
 0xae1   :  { %845 = vrot.lane.b32.xlu1 %v842_v17, %s7199_s5  ;;  %v843_v27 = vmul.f32 %v842_v17, %v677_v25 }
 0xb53   :  { %v846_v23 = vpop.permute.xlu1 %845 }
 0xb54   :  { %v848_v24 = vmul.f32 %v846_v23, %v842_v17  ;;  %v7205_v23 = vmov 6  }
 0xb55   :  { %6885 = vset.pattern.permute.xlu0 %v7205_v23 }
 0xb56   :  { %850 = vrot.lane.b32.xlu1 %v848_v24, %s7200_s19  ;;  %1243 = vperm.xlu0 %6885, %v7301_v2  }
 0xb5a   :  { %6886 = vset.pattern.permute.xlu0 %v7204_v45 }
 0xb5b   :  { %1237 = vperm.xlu0 %6886, %v7398_v41  }
 0xbc8   :  { %v851_v29 = vpop.permute.xlu1 %850 }
 0xbc9   :  { %v853_v30 = vadd.f32 %v851_v29, %v843_v27 }
 0xbcb   :  { %6936 = vtanh.f32 %v853_v30  ;;  %v865_v62 = vsel %vm863_vm5, %v853_v30, %v677_v25 }
 0xbd5   :  { %v6937_v35 = vpop.eup %6936  ;;  %v1244_v37 = vpop.permute.xlu0 %1243 }
 0xbd6   :  { %856 = vrot.lane.b32.xlu1 %v6937_v35, %s7199_s5  ;;  %vm1245_vm9 = vcmp.eq.s32.totalorder %v1244_v37, %v7359_v20  ;;  %v7642_v37 = vld [vmem:[%s8567_s1] sm:$0x3] }
 0xc48   :  { %v857_v39 = vpop.permute.xlu1 %856 }
 0xc49   :  { %v859_v40 = vmul.f32 %v857_v39, %v842_v17  ;;  %v5637_v39 = vsel %vm1245_vm9, 1.0, %v7197_v6  ;;  %vm1882_vm9 = vcmask 1045504  }
 0xc4b   :  { %v7524_v42 = vsel %vm863_vm5, %v859_v40, %v7488_v61  ;;  %vm1873_vm5 = vcmask 1042432  }
 0xc4c   :  { %946 = vrot.lane.b32.xlu1 %v7524_v42, %s7199_s5 }
 0xcbe   :  { %v947_v43 = vpop.permute.xlu1 %946 }
 0xcbf   :  { %v949_v44 = vsel %vm187_vm3, %v941_v32, %v947_v43 }
 0xcc0   :  { %6079 = vmatmul.mubr.msk.f32.vlgmr.msra.gmra.mrb[8].mxu1 %vm195_vm4, %v949_v44 }
 0xcc1   :  { %6611 = vmatpush3.bf16.msra.mxu1 %v7310_v5  ;;  %6111 = vmatprep.mubr.msk.f32.mxu1 %vm7196_vm0, %v7197_v6 }
 0xcc2   :  { %6612 = vmatprep.subr.bf16.mxu1 %v7195_v1 }
 0xcc4   :  { %6112 = vmatmul.mubr.msk.f32.vlgmr.msra.gmra.mrb[10].mxu1 %vm113_vm1, %v5637_v39 }
 0xcc5   :  { %6614 = vmatpush3.bf16.msra.mxu1 %v7326_v10  ;;  %6130 = vmatprep.mubr.msk.f32.mxu1 %vm7196_vm0, %v7197_v6 }
 0xcc6   :  { %6615 = vmatprep.subr.bf16.mxu1 %v7195_v1 }
 0xcc9   :  { %6617 = vmatpush3.bf16.msra.mxu1 %v7333_v12 }
 0xcca   :  { %6618 = vmatprep.subr.bf16.mxu1 %v7195_v1 }
 0xccd   :  { %6620 = vmatpush3.bf16.msra.mxu1 %v7343_v15 }
 0xcce   :  { %6621 = vmatprep.subr.bf16.mxu1 %v7195_v1 }
 0xcd1   :  { %6623 = vmatpush3.bf16.msra.mxu1 %v7353_v18 }
 0xcd2   :  { %6639 = vmatprep.subr.bf16.mxu1 %v7195_v1 }
 0xd93   :  { %v1019_v46 = vpop.f32.mrb[8].mxu1 }
 0xd94   :  { %v1020_v47 = vadd.f32 %v7377_v26, %v1019_v46  ;;  %v6080_v48 = vpop.f32.mrb[9].mxu1 }
 0xd96   :  { %v5632_v49 = vmul.f32 -1.442695, %v1020_v47 }
 0xd98   :  { %6938 = vpow2.f32 %v5632_v49  ;;  %v1317_v49 = vpop.f32.mrb[10].mxu1 }
 0xd99   :  { %6940 = vtanh.f32 %v1020_v47 }
 0xda2   :  { %v6939_v50 = vpop.eup %6938 }
 0xda3   :  { %v1027_v51 = vadd.f32 1.0, %v6939_v50  ;;  %v6941_v52 = vpop.eup %6940 }
 0xda5   :  { %6942 = vrcp.f32 %v1027_v51  ;;  %v6113_v51 = vpop.f32.mrb[11].mxu1 }
 0xdaf   :  { %v6943_v54 = vpop.eup %6942 }
 0xdb0   :  { %v1030_v55 = vsel %vm7384_vm7, %v6941_v52, %v6943_v54  ;;  %v1238_v52 = vpop.permute.xlu0 %1237 }
 0xdb1   :  { %1033 = vrot.lane.b32.xlu1 %v1030_v55, %s7199_s5  ;;  %v1031_v63 = vmul.f32 %v1030_v55, %v865_v62  ;;  %vm1239_vm10 = vcmp.eq.s32.totalorder %v1238_v52, 1 }
 0xe23   :  { %v1034_v59 = vpop.permute.xlu1 %1033 }
 0xe24   :  { %v1036_v60 = vmul.f32 %v1034_v59, %v1030_v55 }
 0xe26   :  { %1038 = vrot.lane.b32.xlu1 %v1036_v60, %s7200_s19  ;;  %v7206_v60 = vmov 7  }
 0xe27   :  { %6887 = vset.pattern.permute.xlu0 %v7206_v60 }
 0xe28   :  { %1431 = vperm.xlu0 %6887, %v7301_v2  }
 0xe2c   :  { %6888 = vset.pattern.permute.xlu0 %v7205_v23 }
 0xe2d   :  { %1425 = vperm.xlu0 %6888, %v7398_v41  }
 0xe31   :  { %6889 = vset.pattern.permute.xlu0 %v7194_v0 }
 0xe32   :  { %1889 = vperm.xlu0 %6889, %v7642_v37  }
 0xe36   :  { %6890 = vset.pattern.permute.xlu0 %v7206_v60 }
 0xe37   :  { %1613 = vperm.xlu0 %6890, %v7398_v41  }
 0xe3b   :  { %6891 = vset.pattern.permute.xlu0 %v7194_v0 }
 0xe98   :  { %v1039_v4 = vpop.permute.xlu1 %1038 }
 0xe99   :  { %v1041_v7 = vadd.f32 %v1039_v4, %v1031_v63 }
 0xe9b   :  { %6944 = vtanh.f32 %v1041_v7  ;;  %v1053_v44 = vsel %vm1051_vm8, %v1041_v7, %v865_v62 }
 0xea5   :  { %v6945_v9 = vpop.eup %6944 }
 0xea6   :  { %1044 = vrot.lane.b32.xlu1 %v6945_v9, %s7199_s5 }
 0xf18   :  { %v1045_v14 = vpop.permute.xlu1 %1044 }
 0xf19   :  { %v1047_v16 = vmul.f32 %v1045_v14, %v1030_v55  ;;  %v1432_v14 = vpop.permute.xlu0 %1431 }
 0xf1a   :  { %vm1433_vm11 = vcmp.eq.s32.totalorder %v1432_v14, %v7359_v20 }
 0xf1b   :  { %v7560_v17 = vsel %vm1051_vm8, %v1047_v16, %v7524_v42  ;;  %v5641_v16 = vsel %vm1433_vm11, 1.0, %v7197_v6  ;;  %vm1879_vm8 = vcmask 1044480   ;;  %vm2159_vm11 = vcmask 1041409  }
 0xf1c   :  { %1134 = vrot.lane.b32.xlu1 %v7560_v17, %s7199_s5 }
 0xf8e   :  { %v1135_v21 = vpop.permute.xlu1 %1134 }
 0xf8f   :  { %v1137_v22 = vsel %vm187_vm3, %v1129_v8, %v1135_v21 }
 0xf90   :  { %6105 = vmatmul.mubr.msk.f32.vlgmr.msra.gmra.mrb[12].mxu0 %vm195_vm4, %v1137_v22 }
 0xf91   :  { %6626 = vmatpush3.bf16.msra.mxu0 %v7310_v5  ;;  %6137 = vmatprep.mubr.msk.f32.mxu0 %vm7196_vm0, %v7197_v6 }
 0xf92   :  { %6627 = vmatprep.subr.bf16.mxu0 %v7195_v1 }
 0xf94   :  { %6138 = vmatmul.mubr.msk.f32.vlgmr.msra.gmra.mrb[14].mxu0 %vm113_vm1, %v5641_v16  ;;  %v83_v16 = vld [vmem:[#allocation5 + $0x20] sm:$0xff] }
 0xf95   :  { %6629 = vmatpush3.bf16.msra.mxu0 %v7326_v10  ;;  %6156 = vmatprep.mubr.msk.f32.mxu0 %vm7196_vm0, %v7197_v6 }
 0xf96   :  { %6630 = vmatprep.subr.bf16.mxu0 %v7195_v1 }
 0xf99   :  { %6632 = vmatpush3.bf16.msra.mxu0 %v7333_v12 }
 0xf9a   :  { %6633 = vmatprep.subr.bf16.mxu0 %v7195_v1 }
 0xf9d   :  { %6635 = vmatpush3.bf16.msra.mxu0 %v7343_v15  ;;  %v1426_v15 = vpop.permute.xlu0 %1425 }
 0xf9e   :  { %6636 = vmatprep.subr.bf16.mxu0 %v7195_v1  ;;  %vm1427_vm12 = vcmp.eq.s32.totalorder %v1426_v15, 1 }
 0xfa1   :  { %6638 = vmatpush3.bf16.msra.mxu0 %v7353_v18  ;;  %v1890_v52 = vpop.permute.xlu0 %1889 }
 0xfa2   :  { %6654 = vmatprep.subr.bf16.mxu0 %v7195_v1  ;;  %vm1891_vm13 = vcmp.eq.s32.totalorder %v1890_v52, %v7359_v20 }
0x1063   :  { %v1207_v24 = vpop.f32.mrb[12].mxu0 }
0x1064   :  { %v1208_v25 = vadd.f32 %v7377_v26, %v1207_v24  ;;  %v6106_v27 = vpop.f32.mrb[13].mxu0 }
0x1066   :  { %v5636_v29 = vmul.f32 -1.442695, %v1208_v25 }
0x1067   :  { %v1505_v12 = vpop.f32.mrb[14].mxu0 }
0x1068   :  { %6946 = vpow2.f32 %v5636_v29 }
0x1069   :  { %6948 = vtanh.f32 %v1208_v25 }
0x1072   :  { %v6947_v5 = vpop.eup %6946 }
0x1073   :  { %v1215_v30 = vadd.f32 1.0, %v6947_v5  ;;  %v6949_v32 = vpop.eup %6948  ;;  %v6139_v5 = vpop.f32.mrb[15].mxu0 }
0x1075   :  { %6950 = vrcp.f32 %v1215_v30 }
0x107f   :  { %v6951_v35 = vpop.eup %6950 }
0x1080   :  { %v1218_v36 = vsel %vm7384_vm7, %v6949_v32, %v6951_v35 }
0x1081   :  { %1221 = vrot.lane.b32.xlu1 %v1218_v36, %s7199_s5  ;;  %v1219_v46 = vmul.f32 %v1218_v36, %v1053_v44 }
0x10f3   :  { %v1222_v40 = vpop.permute.xlu1 %1221 }
0x10f4   :  { %v1224_v43 = vmul.f32 %v1222_v40, %v1218_v36 }
0x10f6   :  { %1226 = vrot.lane.b32.xlu1 %v1224_v43, %s7200_s19 }
0x1168   :  { %v1227_v47 = vpop.permute.xlu1 %1226 }
0x1169   :  { %v1229_v48 = vadd.f32 %v1227_v47, %v1219_v46 }
0x116b   :  { %6952 = vtanh.f32 %v1229_v48  ;;  %v1241_v10 = vsel %vm1239_vm10, %v1229_v48, %v1053_v44 }
0x1175   :  { %v6953_v50 = vpop.eup %6952 }
0x1176   :  { %1232 = vrot.lane.b32.xlu1 %v6953_v50, %s7199_s5 }
0x11e8   :  { %v1233_v54 = vpop.permute.xlu1 %1232 }
0x11e9   :  { %v1235_v55 = vmul.f32 %v1233_v54, %v1218_v36  ;;  %v69_v54 = vld [vmem:[#allocation2 + $0x8] sm:$0xff] }
0x11eb   :  { %v7596_v57 = vsel %vm1239_vm10, %v1235_v55, %v7560_v17  ;;  %vm1885_vm10 = vcmask 1046528  }
0x11ec   :  { %1322 = vrot.lane.b32.xlu1 %v7596_v57, %s7199_s5 }
0x125e   :  { %v1323_v58 = vpop.permute.xlu1 %1322 }
0x125f   :  { %v1325_v59 = vsel %vm187_vm3, %v1317_v49, %v1323_v58  ;;  %v5645_v58 = vsel %vm1891_vm13, 1.0, %v7197_v6 }
0x1260   :  { %6131 = vmatmul.mubr.msk.f32.vlgmr.msra.gmra.mrb[12].mxu1 %vm195_vm4, %v1325_v59 }
0x1261   :  { %6163 = vmatprep.mubr.msk.f32.mxu1 %vm7196_vm0, %v7197_v6 }
0x1333   :  { %v1395_v62 = vpop.f32.mrb[12].mxu1 }
0x1334   :  { %v1396_v63 = vadd.f32 %v7377_v26, %v1395_v62  ;;  %v6132_v4 = vpop.f32.mrb[13].mxu1 }
0x1336   :  { %v5640_v7 = vmul.f32 -1.442695, %v1396_v63 }
0x1338   :  { %6954 = vpow2.f32 %v5640_v7  ;;  %v79_v7 = vld [vmem:[#allocation5] sm:$0xff] }
0x1339   :  { %6956 = vtanh.f32 %v1396_v63 }
0x1342   :  { %v6955_v8 = vpop.eup %6954 }
0x1343   :  { %v1403_v9 = vadd.f32 1.0, %v6955_v8  ;;  %v6957_v11 = vpop.eup %6956  ;;  %v80_v8 = vld [vmem:[#allocation5 + $0x8] sm:$0xff] }
0x1345   :  { %6958 = vrcp.f32 %v1403_v9  ;;  %v81_v9 = vld [vmem:[#allocation5 + $0x10] sm:$0xff] }
0x134f   :  { %v6959_v13 = vpop.eup %6958 }
0x1350   :  { %v1406_v2 = vsel %vm7384_vm7, %v6957_v11, %v6959_v13  ;;  %v7663_v13 = vpack.c.bf16 %v80_v8, %v79_v7 }
0x1351   :  { %1409 = vrot.lane.b32.xlu1 %v1406_v2, %s7199_s5  ;;  %v1407_v24 = vmul.f32 %v1406_v2, %v1241_v10 }
0x13c3   :  { %v1410_v21 = vpop.permute.xlu1 %1409 }
0x13c4   :  { %v1412_v22 = vmul.f32 %v1410_v21, %v1406_v2  ;;  %v84_v21 = vld [vmem:[#allocation5 + $0x28] sm:$0xff] }
0x13c6   :  { %1414 = vrot.lane.b32.xlu1 %v1412_v22, %s7200_s19  ;;  %v7671_v22 = vpack.c.bf16 %v84_v21, %v83_v16 }
0x1438   :  { %v1415_v25 = vpop.permute.xlu1 %1414 }
0x1439   :  { %v1417_v27 = vadd.f32 %v1415_v25, %v1407_v24  ;;  %v86_v24 = vld [vmem:[#allocation5 + $0x38] sm:$0xff] }
0x143b   :  { %6960 = vtanh.f32 %v1417_v27  ;;  %v1429_v59 = vsel %vm1427_vm12, %v1417_v27, %v1241_v10  ;;  %v85_v10 = vld [vmem:[#allocation5 + $0x30] sm:$0xff] }
0x143c   :  { %v7675_v25 = vpack.c.bf16 %v86_v24, %v85_v10 }
0x1445   :  { %v6961_v29 = vpop.eup %6960 }
0x1446   :  { %1420 = vrot.lane.b32.xlu1 %v6961_v29, %s7199_s5  ;;  %v1614_v29 = vpop.permute.xlu0 %1613 }
0x1447   :  { %vm1615_vm14 = vcmp.eq.s32.totalorder %v1614_v29, 1 }
0x14b8   :  { %v1421_v30 = vpop.permute.xlu1 %1420 }
0x14b9   :  { %v1423_v18 = vmul.f32 %v1421_v30, %v1406_v2  ;;  %v82_v2 = vld [vmem:[#allocation5 + $0x18] sm:$0xff] }
0x14ba   :  { %v7667_v14 = vpack.c.bf16 %v82_v2, %v81_v9  ;;  %v7710_v9 = vshrl.u32 %v102_v19, 7 }
0x14bb   :  { %v7631_v32 = vsel %vm1427_vm12, %v1423_v18, %v7596_v57  ;;  %vm2162_vm12 = vcmask 58368  }
0x14bc   :  { %1510 = vrot.lane.b32.xlu1 %v7631_v32, %s7199_s5  ;;  %v7722_v21 = vsub.s32 0, %v7710_v9 }
0x152e   :  { %v1511_v35 = vpop.permute.xlu1 %1510 }
0x152f   :  { %v1513_v36 = vsel %vm187_vm3, %v1505_v12, %v1511_v35 }
0x1530   :  { %6157 = vmatmul.mubr.msk.f32.vlgmr.msra.gmra.mrb[16].mxu0 %vm195_vm4, %v1513_v36  ;;  %v7692_v36 = vld [vmem:[%s8573_s7] ss:$0 sm:$0xff] }
0x1531   :  { %6201 = vmatprep.mubr.msk.f32.mxu0 %vm7196_vm0, %v7197_v6 }
0x1603   :  { %v1583_v39 = vpop.f32.mrb[16].mxu0 }
0x1604   :  { %v1584_v40 = vadd.f32 %v7377_v26, %v1583_v39  ;;  %v6158_v43 = vpop.f32.mrb[17].mxu0  ;;  %v68_v26 = vld [vmem:[#allocation2] sm:$0xff] }
0x1605   :  { %v7654_v55 = vpack.c.bf16 %v69_v54, %v68_v26 }
0x1606   :  { %v5644_v44 = vmul.f32 -1.442695, %v1584_v40 }
0x1607   :  { %6641 = vmatpush3.bf16.msra.mxu1 %v7654_v55 }
0x1608   :  { %6962 = vpow2.f32 %v5644_v44  ;;  %6642 = vmatprep.subr.bf16.mxu1 %v7195_v1 }
0x1609   :  { %6964 = vtanh.f32 %v1584_v40 }
0x160a   :  { %6164 = vmatmul.mubr.msk.f32.vlgmr.msra.gmra.mrb[14].mxu1 %vm113_vm1, %v5645_v58 }
0x160b   :  { %6182 = vmatprep.mubr.msk.f32.mxu1 %vm7196_vm0, %v7197_v6  ;;  %6644 = vmatpush3.bf16.msra.mxu1 %v7663_v13 }
0x160c   :  { %6645 = vmatprep.subr.bf16.mxu1 %v7195_v1 }
0x160f   :  { %6647 = vmatpush3.bf16.msra.mxu1 %v7667_v14 }
0x1610   :  { %6648 = vmatprep.subr.bf16.mxu1 %v7195_v1 }
0x1612   :  { %v6963_v46 = vpop.eup %6962 }
0x1613   :  { %v1591_v47 = vadd.f32 1.0, %v6963_v46  ;;  %v6965_v48 = vpop.eup %6964  ;;  %6650 = vmatpush3.bf16.msra.mxu1 %v7671_v22 }
0x1614   :  { %6651 = vmatprep.subr.bf16.mxu1 %v7195_v1 }
0x1615   :  { %6966 = vrcp.f32 %v1591_v47 }
0x1617   :  { %6653 = vmatpush3.bf16.msra.mxu1 %v7675_v25 }
0x1618   :  { %6666 = vmatprep.subr.bf16.mxu1 %v7195_v1 }
0x161f   :  { %v6967_v49 = vpop.eup %6966 }
0x1620   :  { %v1594_v50 = vsel %vm7384_vm7, %v6965_v48, %v6967_v49 }
0x1621   :  { %1597 = vrot.lane.b32.xlu1 %v1594_v50, %s7199_s5  ;;  %v1595_v62 = vmul.f32 %v1594_v50, %v1429_v59 }
0x1693   :  { %v1598_v41 = vpop.permute.xlu1 %1597 }
0x1694   :  { %v1600_v51 = vmul.f32 %v1598_v41, %v1594_v50 }
0x1696   :  { %1602 = vrot.lane.b32.xlu1 %v1600_v51, %s7200_s19 }
0x16dd   :  { %v1963_v27 = vpop.f32.mrb[14].mxu1 }
0x16de   :  { %v6165_v12 = vpop.f32.mrb[15].mxu1 }
0x1708   :  { %v1603_v63 = vpop.permute.xlu1 %1602 }
0x1709   :  { %v1605_v4 = vadd.f32 %v1603_v63, %v1595_v62  ;;  %v7207_v63 = vmov 1966171168  }
0x170a   :  { %v1619_v7 = vunpack.c.l.s4 %v7207_v63 }
0x170b   :  { %6968 = vtanh.f32 %v1605_v4  ;;  %v1617_v52 = vsel %vm1615_vm14, %v1605_v4, %v1429_v59 }
0x170c   :  { %v1620_v8 = vunpack.c.0.s8 %v1619_v7 }
0x1715   :  { %v6969_v11 = vpop.eup %6968 }
0x1716   :  { %1608 = vrot.lane.b32.xlu1 %v6969_v11, %s7199_s5  ;;  %v7713_v11 = vsub.s32 %v1620_v8, %v7710_v9 }
0x1718   :  { %v1648_v59 = vrot.slane %v7452_v28, %v7713_v11  ;;  %v1670_v4 = vrot.slane %v7488_v61, %v7713_v11  ;;  %v1624_v16 = vrot.slane %v7416_v53, %v7713_v11  ;;  %v1692_v24 = vrot.slane %v7524_v42, %v7713_v11 }
0x1719   :  { %v1714_v28 = vrot.slane %v7560_v17, %v7713_v11  ;;  %v1736_v53 = vrot.slane %v7596_v57, %v7713_v11 }
0x171a   :  { %v1649_v2 = vcombine.high %v1648_v59, %v1648_v59  ;;  %v1656_v10 = vrot.slane %v1648_v59, %v7713_v11  ;;  %v1671_v19 = vcombine.high %v1670_v4, %v1670_v4  ;;  %v1625_v12 = vcombine.high %v1624_v16, %v1624_v16 }
0x171b   :  { %v1678_v61 = vrot.slane %v1670_v4, %v7713_v11  ;;  %v1693_v42 = vcombine.high %v1692_v24, %v1692_v24  ;;  %v1632_v17 = vrot.slane %v1624_v16, %v7713_v11 }
0x171c   :  { %v1800_v29 = vrot.slane %v1656_v10, %v7722_v21  ;;  %v1639_v57 = vrot.slane %v1625_v12, %v7713_v11 }
0x1788   :  { %v1609_v5 = vpop.permute.xlu1 %1608 }
0x1789   :  { %v1611_v15 = vmul.f32 %v1609_v5, %v1594_v50  ;;  %v1685_v5 = vrot.slane %v1671_v19, %v7713_v11 }
0x178b   :  { %v1616_v30 = vsel %vm1615_vm14, %v1611_v15, %v7631_v32  ;;  %v1758_v15 = vrot.slane %v7631_v32, %v7713_v11  ;;  %v1868_v32 = vsel %vm1867_vm15, %v1632_v17, %v1800_v29  ;;  %vm2230_vm14 = vcmask 1048320  }
0x178c   :  { %1967 = vrot.lane.b32.xlu1 %v1616_v30, %s7199_s5 }
0x17fe   :  { %v1968_v18 = vpop.permute.xlu1 %1967 }
0x17ff   :  { %v1970_v35 = vsel %vm187_vm3, %v1963_v27, %v1968_v18  ;;  %v1663_v27 = vrot.slane %v1649_v2, %v7713_v11  ;;  %v1700_v18 = vrot.slane %v1692_v24, %v7713_v11 }
0x1800   :  { %6183 = vmatmul.mubr.msk.f32.vlgmr.msra.gmra.mrb[16].mxu1 %vm195_vm4, %v1970_v35  ;;  %v1781_v35 = vrot.slane %v1616_v30, %v7713_v11  ;;  %v1707_v30 = vrot.slane %v1693_v42, %v7713_v11 }
0x1801   :  { %6668 = vmatpush3.bf16.msra.mxu1 %v7654_v55  ;;  %6208 = vmatprep.mubr.msk.f32.mxu1 %vm7196_vm0, %v7197_v6 }
0x1802   :  { %6681 = vmatprep.subr.bf16.mxu1 %v7195_v1  ;;  %v1789_v8 = vrot.slane %v1781_v35, %v7713_v11  ;;  %v1824_v10 = vrot.slane %v1707_v30, %v7722_v21 }
0x1804   :  { %v1860_v29 = vrot.slane %v1789_v8, %v7722_v21 }
0x18d3   :  { %v2046_v39 = vpop.f32.mrb[16].mxu1 }
0x18d4   :  { %v2047_v40 = vadd.f32 %v7692_v36, %v2046_v39  ;;  %v6184_v43 = vpop.f32.mrb[17].mxu1  ;;  %v1804_v39 = vrot.slane %v1663_v27, %v7722_v21 }
0x18d5   :  { %v1810_v43 = vrot.slane %v1678_v61, %v7722_v21 }
0x18d6   :  { %v5649_v44 = vmul.f32 -1.442695, %v2047_v40 }
0x18d8   :  { %6970 = vpow2.f32 %v5649_v44  ;;  %v1722_v44 = vrot.slane %v1714_v28, %v7713_v11 }
0x18d9   :  { %6972 = vtanh.f32 %v2047_v40  ;;  %v1715_v40 = vcombine.high %v1714_v28, %v1714_v28 }
0x18da   :  { %v1830_v63 = vrot.slane %v1722_v44, %v7722_v21 }
0x18e2   :  { %v6971_v46 = vpop.eup %6970 }
0x18e3   :  { %v2054_v47 = vadd.f32 1.0, %v6971_v46  ;;  %v6973_v48 = vpop.eup %6972  ;;  %v1737_v46 = vcombine.high %v1736_v53, %v1736_v53 }
0x18e5   :  { %6974 = vrcp.f32 %v2054_v47  ;;  %v1814_v47 = vrot.slane %v1685_v5, %v7722_v21  ;;  %v1751_v7 = vrot.slane %v1737_v46, %v7713_v11 }
0x18ef   :  { %v6975_v49 = vpop.eup %6974 }
0x18f0   :  { %v7697_v50 = vsel %vm7384_vm7, %v6973_v48, %v6975_v49  ;;  %v1759_v48 = vcombine.high %v1758_v15, %v1758_v15  ;;  %v1820_v49 = vrot.slane %v1700_v18, %v7722_v21 }
0x18f1   :  { %2060 = vrot.lane.b32.xlu0 %v7697_v50, %s7199_s5  ;;  %v2058_v26 = vmul.f32 %v7697_v50, %v1617_v52  ;;  %v1869_v52 = vsel %vm1867_vm15, %v1639_v57, %v1804_v39 }
0x18f2   :  { %v1872_v4 = vsel %vm1870_vm2, %v1869_v52, %v1814_v47  ;;  %v1773_v2 = vrot.slane %v1759_v48, %v7713_v11 }
0x18f3   :  { %v1875_v18 = vsel %vm1873_vm5, %v1872_v4, %v1824_v10 }
0x18f4   :  { %v1854_v5 = vrot.slane %v1773_v2, %v7722_v21 }
0x1963   :  { %v2061_v41 = vpop.permute.xlu0 %2060 }
0x1964   :  { %v2063_v51 = vmul.f32 %v2061_v41, %v7697_v50  ;;  %v1744_v41 = vrot.slane %v1736_v53, %v7713_v11 }
0x1966   :  { %2065 = vrot.lane.b32.xlu1 %v2063_v51, %s7200_s19  ;;  %v1782_v51 = vcombine.high %v1781_v35, %v1781_v35  ;;  %v1840_v24 = vrot.slane %v1744_v41, %v7722_v21 }
0x1968   :  { %v1796_v27 = vrot.slane %v1782_v51, %v7713_v11 }
0x196a   :  { %v1864_v17 = vrot.slane %v1796_v27, %v7722_v21 }
0x19d8   :  { %v2066_v54 = vpop.permute.xlu1 %2065 }
0x19d9   :  { %v7705_v58 = vadd.f32 %v2066_v54, %v2058_v26  ;;  %v1729_v26 = vrot.slane %v1715_v40, %v7713_v11  ;;  %v1766_v54 = vrot.slane %v1758_v15, %v7713_v11 }
0x19db   :  { %6976 = vtanh.f32 %v7705_v58  ;;  %v1834_v28 = vrot.slane %v1729_v26, %v7722_v21  ;;  %v1850_v12 = vrot.slane %v1766_v54, %v7722_v21  ;;  %v100_v54 = vsub.f32 1.0, %v7393_v38 }
0x19dd   :  { %v1878_v39 = vsel %vm1876_vm6, %v1875_v18, %v1834_v28 }
0x19e5   :  { %v6977_v62 = vpop.eup %6976 }
0x19e6   :  { %2071 = vrot.lane.b32.xlu0 %v6977_v62, %s7199_s5  ;;  %v1871_v62 = vsel %vm1870_vm2, %v1868_v32, %v1810_v43 }
0x19e7   :  { %v1874_v19 = vsel %vm1873_vm5, %v1871_v62, %v1820_v49  ;;  %v101_v62 = vmul.f32 -1e+09, %v100_v54 }
0x19e8   :  { %v1877_v53 = vsel %vm1876_vm6, %v1874_v19, %v1830_v63  ;;  %v7798_v63 = vsub.s32 1, %v7710_v9 }
0x19e9   :  { %v1880_v35 = vsel %vm1879_vm8, %v1877_v53, %v1840_v24  ;;  %v2128_v8 = vrot.slane %v101_v62, %v7722_v21  ;;  %v7810_v24 = vsub.s32 %v7359_v20, %v7710_v9 }
0x19ea   :  { %v1883_v40 = vsel %vm1882_vm9, %v1880_v35, %v1850_v12 }
0x19eb   :  { %v7783_v46 = vsel %vm1885_vm10, %v1883_v40, %v1860_v29 }
0x1a58   :  { %v2072_v59 = vpop.permute.xlu0 %2071 }
0x1a59   :  { %v7759_v16 = vmul.f32 %v2072_v59, %v7697_v50  ;;  %v1844_v50 = vrot.slane %v1751_v7, %v7722_v21  ;;  %v2135_v7 = vrot.slane %v101_v62, %v7798_v63  ;;  %v88_v62 = vld [vmem:[%s8574_s8] sm:$0xff] }
0x1a5b   :  { %v2082_v61 = vrot.slane %v7759_v16, %v7713_v11  ;;  %v1881_v44 = vsel %vm1879_vm8, %v1878_v39, %v1844_v50 }
0x1a5c   :  { %v1884_v32 = vsel %vm1882_vm9, %v1881_v44, %v1854_v5 }
0x1a5d   :  { %v2083_v15 = vcombine.high %v2082_v61, %v2082_v61  ;;  %v2090_v42 = vrot.slane %v2082_v61, %v7713_v11  ;;  %v7789_v30 = vsel %vm1885_vm10, %v1884_v32, %v1864_v17 }
0x1a5f   :  { %v2101_v57 = vrot.slane %v2090_v42, %v7722_v21  ;;  %v2097_v43 = vrot.slane %v2083_v15, %v7713_v11 }
0x1a61   :  { %v2108_v47 = vmul.f32 %v2101_v57, %v7783_v46  ;;  %v2105_v48 = vrot.slane %v2097_v43, %v7722_v21 }
0x1a63   :  { %2112 = vrot.lane.b32.xlu1 %v2108_v47, %s7200_s19  ;;  %v2109_v49 = vmul.f32 %v2105_v48, %v7789_v30 }
0x1a65   :  { %2114 = vrot.lane.b32.xlu0 %v2109_v49, %s7200_s19 }
0x1ad5   :  { %v2113_v41 = vpop.permute.xlu1 %2112 }
0x1ad6   :  { %v2118_v51 = vsel %vm187_vm3, %v2113_v41, 0.0 }
0x1ad7   :  { %2119 = vadd.xlane.f32.xlu1 %v2118_v51  ;;  %v2115_v52 = vpop.permute.xlu0 %2114 }
0x1ad8   :  { %v2121_v26 = vsel %vm187_vm3, %v2115_v52, 0.0 }
0x1ad9   :  { %2122 = vadd.xlane.f32.xlu0 %v2121_v26 }
0x1ae8   :  { %2137 = vbcast.lane.b32.xlu1 %v2135_v7, 256  ;;  %v89_v7 = vld [vmem:[%s8574_s8 + $0x8] sm:$0xff] }
0x1aef   :  { %2130 = vbcast.lane.b32.xlu0 %v2128_v8, 256  ;;  %v90_v8 = vld [vmem:[%s8574_s8 + $0x10] sm:$0xff] }
0x1b64   :  { %v2120_v59 = vpop.xlane.xlu1 %2119 }
0x1b66   :  { %v2123_v4 = vpop.xlane.xlu0 %2122 }
0x1b68   :  { %v7802_v2 = vpop.permute.xlu1 %2137 }
0x1b69   :  { %v2142_v10 = vadd.f32 %v7802_v2, %v2123_v4  ;;  %v91_v4 = vld [vmem:[%s8574_s8 + $0x18] sm:$0xff] }
0x1b6a   :  { %v7805_v19 = vpop.permute.xlu0 %2130 }
0x1b6b   :  { %2149 = vperm.xlu0 %6891, %v2142_v10   ;;  %v2141_v38 = vadd.f32 %v7805_v19, %v2120_v59  ;;  %v7843_v59 = vpack.c.bf16 %v89_v7, %v88_v62 }
0x1b6d   :  { %2146 = vperm.xlu1 %6876, %v2141_v38   ;;  %6656 = vmatpush3.bf16.msra.mxu0 %v7843_v59 }
0x1b6e   :  { %6657 = vmatprep.subr.bf16.mxu0 %v7195_v1 }
0x1bea   :  { %v2150_v27 = vpop.permute.xlu0 %2149 }
0x1beb   :  { %v2158_v12 = vrot.slane %v2150_v27, %v7810_v24  ;;  %v93_v27 = vld [vmem:[%s8574_s8 + $0x28] sm:$0xff] }
0x1bec   :  { %v2147_v28 = vpop.permute.xlu1 %2146 }
0x1bed   :  { %v2154_v61 = vrot.slane %v2147_v28, %v7810_v24 }
0x1bef   :  { %v2160_v53 = vsel %vm2159_vm11, %v2158_v12, %v2154_v61  ;;  %v94_v12 = vld [vmem:[%s8574_s8 + $0x30] sm:$0xff]  ;;  %v95_v61 = vld [vmem:[%s8574_s8 + $0x38] sm:$0xff] }
0x1bf0   :  { %v2163_v50 = vsel %vm2162_vm12, %v2160_v53, -inf  ;;  %v7873_v53 = vpack.c.bf16 %v95_v61, %v94_v12 }
0x1bf1   :  { %2164 = vmax.xlane.f32.xlu1 %v2163_v50 }
0x1c7e   :  { %v2165_v29 = vpop.xlane.xlu1 %2164 }
0x1c7f   :  { %v2170_v5 = vrot.slane %v2165_v29, %v7722_v21  ;;  %v2174_v15 = vrot.slane %v2165_v29, %v7798_v63 }
0x1c81   :  { %v2177_v9 = vsub.f32 %v2141_v38, %v2170_v5  ;;  %v2178_v42 = vsub.f32 %v2142_v10, %v2174_v15  ;;  %v7849_v10 = vpack.c.bf16 %v91_v4, %v90_v8  ;;  %v92_v38 = vld [vmem:[%s8574_s8 + $0x20] sm:$0xff] }
0x1c82   :  { %v7861_v28 = vpack.c.bf16 %v93_v27, %v92_v38 }
0x1c83   :  { %v2179_v18 = vmul.f32 1.442695, %v2177_v9  ;;  %v2181_v35 = vmul.f32 1.442695, %v2178_v42  ;;  %6659 = vmatpush3.bf16.msra.mxu0 %v7849_v10 }
0x1c84   :  { %6660 = vmatprep.subr.bf16.mxu0 %v7195_v1 }
0x1c85   :  { %6978 = vpow2.f32 %v2179_v18 }
0x1c86   :  { %6980 = vpow2.f32 %v2181_v35 }
0x1c87   :  { %6662 = vmatpush3.bf16.msra.mxu0 %v7861_v28 }
0x1c88   :  { %6663 = vmatprep.subr.bf16.mxu0 %v7195_v1 }
0x1c8b   :  { %6665 = vmatpush3.bf16.msra.mxu0 %v7873_v53 }
0x1c8c   :  { %6669 = vmatprep.subr.bf16.mxu0 %v7195_v1 }
0x1c8f   :  { %v6979_v17 = vpop.eup %6978 }
0x1c90   :  { %2186 = vperm.xlu0 %6891, %v6979_v17   ;;  %v6981_v39 = vpop.eup %6980 }
0x1c94   :  { %2189 = vperm.xlu0 %6891, %v6981_v39  }
0x1c98   :  { %6892 = vset.pattern.permute.xlu0 %v7198_v33 }
0x1c99   :  { %2347 = vperm.xlu0 %6892, %v7642_v37  }
0x1c9d   :  { %6893 = vset.pattern.permute.xlu0 %v7194_v0 }
0x1d0f   :  { %v2187_v40 = vpop.permute.xlu0 %2186 }
0x1d10   :  { %v2194_v43 = vrot.slane %v2187_v40, %v7810_v24 }
0x1d13   :  { %v2190_v57 = vpop.permute.xlu0 %2189 }
0x1d14   :  { %v2198_v44 = vrot.slane %v2190_v57, %v7810_v24 }
0x1d16   :  { %v2199_v32 = vsel %vm2159_vm11, %v2198_v44, %v2194_v43 }
0x1d17   :  { %v2201_v47 = vsel %vm2162_vm12, %v2199_v32, 0.0 }
0x1d18   :  { %2202 = vadd.xlane.f32.xlu0 %v2201_v47  ;;  %v2348_v48 = vpop.permute.xlu0 %2347 }
0x1d19   :  { %vm2349_vm13 = vcmp.eq.s32.totalorder %v2348_v48, %v7359_v20 }
0x1d1a   :  { %v5652_v33 = vsel %vm2349_vm13, 1.0, %v7197_v6 }
0x1d1b   :  { %6209 = vmatmul.mubr.msk.f32.vlgmr.msra.gmra.mrb[18].mxu1 %vm113_vm1, %v5652_v33 }
0x1d1c   :  { %6246 = vmatprep.mubr.msk.f32.mxu1 %vm7196_vm0, %v7197_v6  ;;  %6683 = vmatpush3.bf16.msra.mxu1 %v7843_v59 }
0x1d1d   :  { %6684 = vmatprep.subr.bf16.mxu1 %v7195_v1 }
0x1d20   :  { %6686 = vmatpush3.bf16.msra.mxu1 %v7849_v10 }
0x1d21   :  { %6687 = vmatprep.subr.bf16.mxu1 %v7195_v1 }
0x1d24   :  { %6689 = vmatpush3.bf16.msra.mxu1 %v7861_v28 }
0x1d25   :  { %6690 = vmatprep.subr.bf16.mxu1 %v7195_v1 }
0x1d28   :  { %6692 = vmatpush3.bf16.msra.mxu1 %v7873_v53 }
0x1d29   :  { %6696 = vmatprep.subr.bf16.mxu1 %v7195_v1 }
0x1d2e   :  { %2245 = vrot.lane.b32.xlu0 %v7759_v16, %s7200_s19 }
0x1da5   :  { %v2203_v49 = vpop.xlane.xlu0 %2202 }
0x1da6   :  { %6982 = vrcp.f32 %v2203_v49 }
0x1db0   :  { %v6983_v41 = vpop.eup %6982 }
0x1db1   :  { %v2209_v51 = vrot.slane %v6983_v41, %v7722_v21  ;;  %v2213_v26 = vrot.slane %v6983_v41, %v7798_v63 }
0x1db3   :  { %v2216_v52 = vmul.f32 %v6979_v17, %v2209_v51  ;;  %v2217_v54 = vmul.f32 %v6981_v39, %v2213_v26 }
0x1db5   :  { %2220 = vperm.xlu1 %6876, %v2216_v52   ;;  %v2246_v52 = vpop.permute.xlu0 %2245 }
0x1db9   :  { %2225 = vperm.xlu1 %6876, %v2217_v54  }
0x1dee   :  { %v2421_v50 = vpop.f32.mrb[18].mxu1 }
0x1def   :  { %v6210_v29 = vpop.f32.mrb[19].mxu1 }
0x1e34   :  { %v2221_v5 = vpop.permute.xlu1 %2220 }
0x1e35   :  { %v2228_v15 = vmul.f32 %v2221_v5, %v7783_v46 }
0x1e37   :  { %v2231_v9 = vsel %vm2230_vm14, %v2228_v15, 0.0 }
0x1e38   :  { %v2232_v42 = vrot.slane %v2231_v9, 4  ;;  %v2226_v18 = vpop.permute.xlu1 %2225 }
0x1e39   :  { %v2229_v35 = vmul.f32 %v2226_v18, %v7789_v30 }
0x1e3a   :  { %v2233_v17 = vadd.f32 %v2232_v42, %v2231_v9 }
0x1e3b   :  { %v2238_v39 = vsel %vm2230_vm14, %v2229_v35, 0.0 }
0x1e3c   :  { %v2234_v40 = vrot.slane %v2233_v17, 2  ;;  %v2239_v57 = vrot.slane %v2238_v39, 4 }
0x1e3e   :  { %v2235_v43 = vadd.f32 %v2234_v40, %v2233_v17  ;;  %v2240_v44 = vadd.f32 %v2239_v57, %v2238_v39 }
0x1e40   :  { %v2241_v32 = vrot.slane %v2240_v44, 2  ;;  %v2236_v48 = vrot.slane %v2235_v43, 1 }
0x1e42   :  { %v2242_v47 = vadd.f32 %v2241_v32, %v2240_v44  ;;  %v2237_v49 = vadd.f32 %v2236_v48, %v2235_v43 }
0x1e44   :  { %v2243_v33 = vrot.slane %v2242_v47, 1 }
0x1e46   :  { %v2244_v41 = vadd.f32 %v2243_v33, %v2242_v47 }
0x1e48   :  { %v2250_v51 = vsel %vm2159_vm11, %v2244_v41, %v2237_v49 }
0x1e49   :  { %2251 = vrot.lane.b32.xlu1 %v2250_v51, %s7199_s5 }
0x1e4d   :  { %2425 = vrot.lane.b32.xlu1 %v7759_v16, %s7199_s5 }
0x1ebb   :  { %v2252_v26 = vpop.permute.xlu1 %2251 }
0x1ebc   :  { %v2254_v54 = vsel %vm187_vm3, %v2246_v52, %v2252_v26 }
0x1ebd   :  { %6202 = vmatmul.mubr.msk.f32.vlgmr.msra.gmra.mrb[18].mxu0 %vm195_vm4, %v2254_v54 }
0x1ebe   :  { %6671 = vmatpush3.bf16.msra.mxu0 %v7663_v13  ;;  %6227 = vmatprep.mubr.msk.f32.mxu0 %vm7196_vm0, %v7197_v6 }
0x1ebf   :  { %6672 = vmatprep.subr.bf16.mxu0 %v7195_v1  ;;  %v2426_v16 = vpop.permute.xlu1 %2425 }
0x1ec0   :  { %v2428_v62 = vsel %vm187_vm3, %v2421_v50, %v2426_v16 }
0x1ec2   :  { %6674 = vmatpush3.bf16.msra.mxu0 %v7667_v14 }
0x1ec3   :  { %6675 = vmatprep.subr.bf16.mxu0 %v7195_v1 }
0x1ec6   :  { %6677 = vmatpush3.bf16.msra.mxu0 %v7671_v22 }
0x1ec7   :  { %6678 = vmatprep.subr.bf16.mxu0 %v7195_v1 }
0x1eca   :  { %6680 = vmatpush3.bf16.msra.mxu0 %v7675_v25 }
0x1ecb   :  { %6693 = vmatprep.subr.bf16.mxu0 %v7195_v1 }
0x1ecd   :  { %6228 = vmatmul.mubr.msk.f32.vlgmr.msra.gmra.mrb[20].mxu0 %vm195_vm4, %v2428_v62 }
0x1ece   :  { %6695 = vmatpush3.bf16.msra.mxu0 %v7654_v55  ;;  %6253 = vmatprep.mubr.msk.f32.mxu0 %vm7196_vm0, %v7197_v6 }
0x1ecf   :  { %6708 = vmatprep.subr.bf16.mxu0 %v7195_v1 }
0x1f90   :  { %v7908_v7 = vpop.f32.mrb[18].mxu0 }
0x1f91   :  { %v6203_v8 = vpop.f32.mrb[19].mxu0 }
0x1fa0   :  { %v2498_v4 = vpop.f32.mrb[20].mxu0 }
0x1fa1   :  { %v2499_v38 = vadd.f32 %v7692_v36, %v2498_v4  ;;  %v6229_v27 = vpop.f32.mrb[21].mxu0 }
0x1fa3   :  { %v5655_v12 = vmul.f32 -1.442695, %v2499_v38 }
0x1fa5   :  { %6984 = vpow2.f32 %v5655_v12 }
0x1fa6   :  { %6986 = vtanh.f32 %v2499_v38 }
0x1faf   :  { %v6985_v61 = vpop.eup %6984 }
0x1fb0   :  { %v2506_v50 = vadd.f32 1.0, %v6985_v61  ;;  %v6987_v29 = vpop.eup %6986 }
0x1fb2   :  { %6988 = vrcp.f32 %v2506_v50 }
0x1fbc   :  { %v6989_v5 = vpop.eup %6988 }
0x1fbd   :  { %v2509_v15 = vsel %vm7384_vm7, %v6987_v29, %v6989_v5 }
0x1fbe   :  { %2512 = vrot.lane.b32.xlu1 %v2509_v15, %s7199_s5  ;;  %v2510_v18 = vmul.f32 %v2509_v15, %v7705_v58 }
0x2030   :  { %v2513_v9 = vpop.permute.xlu1 %2512 }
0x2031   :  { %v2515_v42 = vmul.f32 %v2513_v9, %v2509_v15 }
0x2033   :  { %2517 = vrot.lane.b32.xlu1 %v2515_v42, %s7200_s19 }
0x20a5   :  { %v2518_v35 = vpop.permute.xlu1 %2517 }
0x20a6   :  { %v7916_v17 = vadd.f32 %v2518_v35, %v2510_v18 }
0x20a8   :  { %6990 = vtanh.f32 %v7916_v17 }
0x20b2   :  { %v6991_v39 = vpop.eup %6990 }
0x20b3   :  { %2523 = vrot.lane.b32.xlu1 %v6991_v39, %s7199_s5 }
0x2125   :  { %v2524_v40 = vpop.permute.xlu1 %2523 }
0x2126   :  { %v7920_v57 = vmul.f32 %v2524_v40, %v2509_v15 }
0x2128   :  { %v2534_v43 = vrot.slane %v7920_v57, %v7713_v11 }
0x212a   :  { %v2535_v44 = vcombine.high %v2534_v43, %v2534_v43  ;;  %v2542_v32 = vrot.slane %v2534_v43, %v7713_v11 }
0x212c   :  { %v2553_v47 = vrot.slane %v2542_v32, %v7722_v21  ;;  %v2549_v58 = vrot.slane %v2535_v44, %v7713_v11 }
0x212e   :  { %v2560_v48 = vmul.f32 %v2553_v47, %v7783_v46  ;;  %v2557_v33 = vrot.slane %v2549_v58, %v7722_v21 }
0x2130   :  { %2564 = vrot.lane.b32.xlu0 %v2560_v48, %s7200_s19  ;;  %v2561_v49 = vmul.f32 %v2557_v33, %v7789_v30 }
0x2132   :  { %2566 = vrot.lane.b32.xlu1 %v2561_v49, %s7200_s19 }
0x21a2   :  { %v2565_v41 = vpop.permute.xlu0 %2564 }
0x21a3   :  { %v2570_v51 = vsel %vm187_vm3, %v2565_v41, 0.0 }
0x21a4   :  { %2571 = vadd.xlane.f32.xlu0 %v2570_v51  ;;  %v2567_v52 = vpop.permute.xlu1 %2566 }
0x21a5   :  { %v2573_v26 = vsel %vm187_vm3, %v2567_v52, 0.0 }
0x21a6   :  { %2574 = vadd.xlane.f32.xlu1 %v2573_v26 }
0x2231   :  { %v2572_v54 = vpop.xlane.xlu0 %2571 }
0x2232   :  { %v2576_v16 = vadd.f32 %v2572_v54, %v7805_v19 }
0x2233   :  { %v2575_v62 = vpop.xlane.xlu1 %2574 }
0x2234   :  { %v2577_v8 = vadd.f32 %v2575_v62, %v7802_v2  ;;  %2581 = vperm.xlu0 %6893, %v2576_v16  }
0x2236   :  { %2584 = vperm.xlu1 %6876, %v2577_v8  }
0x22b3   :  { %v2582_v4 = vpop.permute.xlu0 %2581 }
0x22b4   :  { %v2589_v27 = vrot.slane %v2582_v4, %v7810_v24 }
0x22b5   :  { %v2585_v38 = vpop.permute.xlu1 %2584 }
0x22b6   :  { %v2593_v12 = vrot.slane %v2585_v38, %v7810_v24 }
0x22b8   :  { %v2594_v61 = vsel %vm2159_vm11, %v2593_v12, %v2589_v27 }
0x22b9   :  { %v2596_v50 = vsel %vm2162_vm12, %v2594_v61, -inf }
0x22ba   :  { %2597 = vmax.xlane.f32.xlu1 %v2596_v50 }
0x2347   :  { %v2598_v29 = vpop.xlane.xlu1 %2597 }
0x2348   :  { %v2603_v5 = vrot.slane %v2598_v29, %v7722_v21  ;;  %v2607_v15 = vrot.slane %v2598_v29, %v7798_v63 }
0x234a   :  { %v2610_v9 = vsub.f32 %v2576_v16, %v2603_v5  ;;  %v2611_v42 = vsub.f32 %v2577_v8, %v2607_v15 }
0x234c   :  { %v2612_v18 = vmul.f32 1.442695, %v2610_v9  ;;  %v2614_v35 = vmul.f32 1.442695, %v2611_v42 }
0x234e   :  { %6992 = vpow2.f32 %v2612_v18 }
0x234f   :  { %6994 = vpow2.f32 %v2614_v35 }
0x2358   :  { %v6993_v39 = vpop.eup %6992 }
0x2359   :  { %2619 = vperm.xlu0 %6893, %v6993_v39   ;;  %v6995_v40 = vpop.eup %6994 }
0x235d   :  { %2622 = vperm.xlu0 %6893, %v6995_v40  }
0x2361   :  { %6894 = vset.pattern.permute.xlu0 %v7201_v56 }
0x2362   :  { %2772 = vperm.xlu0 %6894, %v7642_v37  }
0x2366   :  { %6895 = vset.pattern.permute.xlu0 %v7194_v0 }
0x23d8   :  { %v2620_v43 = vpop.permute.xlu0 %2619 }
0x23d9   :  { %v2627_v32 = vrot.slane %v2620_v43, %v7810_v24 }
0x23dc   :  { %v2623_v44 = vpop.permute.xlu0 %2622 }
0x23dd   :  { %v2631_v47 = vrot.slane %v2623_v44, %v7810_v24 }
0x23df   :  { %v2632_v58 = vsel %vm2159_vm11, %v2631_v47, %v2627_v32 }
0x23e0   :  { %v2634_v48 = vsel %vm2162_vm12, %v2632_v58, 0.0 }
0x23e1   :  { %2635 = vadd.xlane.f32.xlu1 %v2634_v48  ;;  %v2773_v33 = vpop.permute.xlu0 %2772 }
0x23e2   :  { %vm2774_vm13 = vcmp.eq.s32.totalorder %v2773_v33, %v7359_v20 }
0x23e3   :  { %v5657_v56 = vsel %vm2774_vm13, 1.0, %v7197_v6 }
0x23e4   :  { %6254 = vmatmul.mubr.msk.f32.vlgmr.msra.gmra.mrb[22].mxu0 %vm113_vm1, %v5657_v56 }
0x23e5   :  { %6710 = vmatpush3.bf16.msra.mxu0 %v7843_v59  ;;  %6291 = vmatprep.mubr.msk.f32.mxu0 %vm7196_vm0, %v7197_v6 }
0x23e6   :  { %6711 = vmatprep.subr.bf16.mxu0 %v7195_v1 }
0x23e9   :  { %6713 = vmatpush3.bf16.msra.mxu0 %v7849_v10 }
0x23ea   :  { %6714 = vmatprep.subr.bf16.mxu0 %v7195_v1 }
0x23ed   :  { %6716 = vmatpush3.bf16.msra.mxu0 %v7861_v28 }
0x23ee   :  { %6717 = vmatprep.subr.bf16.mxu0 %v7195_v1 }
0x23f1   :  { %6719 = vmatpush3.bf16.msra.mxu0 %v7873_v53 }
0x23f2   :  { %6723 = vmatprep.subr.bf16.mxu0 %v7195_v1 }
0x246e   :  { %v2636_v37 = vpop.xlane.xlu1 %2635 }
0x246f   :  { %6996 = vrcp.f32 %v2636_v37 }
0x2479   :  { %v6997_v49 = vpop.eup %6996 }
0x247a   :  { %v2646_v41 = vrot.slane %v6997_v49, %v7798_v63  ;;  %v2642_v51 = vrot.slane %v6997_v49, %v7722_v21 }
0x247c   :  { %v2650_v52 = vmul.f32 %v6995_v40, %v2646_v41  ;;  %v2649_v26 = vmul.f32 %v6993_v39, %v2642_v51 }
0x247e   :  { %2658 = vperm.xlu1 %6876, %v2650_v52   ;;  %2653 = vperm.xlu0 %6895, %v2649_v26  }
0x2482   :  { %2677 = vrot.lane.b32.xlu0 %v7920_v57, %s7200_s19 }
0x24b7   :  { %v2846_v29 = vpop.f32.mrb[22].mxu0 }
0x24b8   :  { %v6255_v9 = vpop.f32.mrb[23].mxu0 }
0x24fd   :  { %v2659_v54 = vpop.permute.xlu1 %2658  ;;  %v2654_v16 = vpop.permute.xlu0 %2653 }
0x24fe   :  { %v2662_v62 = vmul.f32 %v2659_v54, %v7789_v30  ;;  %v2661_v8 = vmul.f32 %v2654_v16, %v7783_v46 }
0x2500   :  { %v2670_v4 = vsel %vm2230_vm14, %v2662_v62, 0.0  ;;  %v2663_v38 = vsel %vm2230_vm14, %v2661_v8, 0.0 }
0x2501   :  { %v2671_v27 = vrot.slane %v2670_v4, 4  ;;  %v2664_v12 = vrot.slane %v2663_v38, 4  ;;  %v2678_v32 = vpop.permute.xlu0 %2677 }
0x2503   :  { %v2672_v61 = vadd.f32 %v2671_v27, %v2670_v4  ;;  %v2665_v50 = vadd.f32 %v2664_v12, %v2663_v38 }
0x2505   :  { %v2673_v5 = vrot.slane %v2672_v61, 2  ;;  %v2666_v15 = vrot.slane %v2665_v50, 2 }
0x2507   :  { %v2674_v42 = vadd.f32 %v2673_v5, %v2672_v61  ;;  %v2667_v18 = vadd.f32 %v2666_v15, %v2665_v50 }
0x2509   :  { %v2668_v35 = vrot.slane %v2667_v18, 1  ;;  %v2675_v39 = vrot.slane %v2674_v42, 1 }
0x250b   :  { %v2669_v40 = vadd.f32 %v2668_v35, %v2667_v18  ;;  %v2676_v43 = vadd.f32 %v2675_v39, %v2674_v42 }
0x250d   :  { %v2682_v44 = vsel %vm2159_vm11, %v2676_v43, %v2669_v40 }
0x250e   :  { %2683 = vrot.lane.b32.xlu0 %v2682_v44, %s7199_s5 }
0x2512   :  { %2850 = vrot.lane.b32.xlu0 %v7920_v57, %s7199_s5 }
0x2580   :  { %v2684_v47 = vpop.permute.xlu0 %2683 }
0x2581   :  { %v2686_v58 = vsel %vm187_vm3, %v2678_v32, %v2684_v47 }
0x2582   :  { %6247 = vmatmul.mubr.msk.f32.vlgmr.msra.gmra.mrb[20].mxu1 %vm195_vm4, %v2686_v58 }
0x2583   :  { %6698 = vmatpush3.bf16.msra.mxu1 %v7663_v13  ;;  %6272 = vmatprep.mubr.msk.f32.mxu1 %vm7196_vm0, %v7197_v6 }
0x2584   :  { %6699 = vmatprep.subr.bf16.mxu1 %v7195_v1  ;;  %v2851_v57 = vpop.permute.xlu0 %2850 }
0x2585   :  { %v2853_v48 = vsel %vm187_vm3, %v2846_v29, %v2851_v57 }
0x2587   :  { %6701 = vmatpush3.bf16.msra.mxu1 %v7667_v14 }
0x2588   :  { %6702 = vmatprep.subr.bf16.mxu1 %v7195_v1 }
0x258b   :  { %6704 = vmatpush3.bf16.msra.mxu1 %v7671_v22 }
0x258c   :  { %6705 = vmatprep.subr.bf16.mxu1 %v7195_v1 }
0x258f   :  { %6707 = vmatpush3.bf16.msra.mxu1 %v7675_v25 }
0x2590   :  { %6720 = vmatprep.subr.bf16.mxu1 %v7195_v1 }
0x2592   :  { %6273 = vmatmul.mubr.msk.f32.vlgmr.msra.gmra.mrb[22].mxu1 %vm195_vm4, %v2853_v48 }
0x2593   :  { %6722 = vmatpush3.bf16.msra.mxu1 %v7654_v55  ;;  %6298 = vmatprep.mubr.msk.f32.mxu1 %vm7196_vm0, %v7197_v6 }
0x2594   :  { %6735 = vmatprep.subr.bf16.mxu1 %v7195_v1 }
0x2655   :  { %v7992_v33 = vpop.f32.mrb[20].mxu1 }
0x2656   :  { %v6248_v56 = vpop.f32.mrb[21].mxu1 }
0x2665   :  { %v2923_v37 = vpop.f32.mrb[22].mxu1 }
0x2666   :  { %v2924_v49 = vadd.f32 %v7692_v36, %v2923_v37  ;;  %v6274_v41 = vpop.f32.mrb[23].mxu1 }
0x2668   :  { %v5660_v51 = vmul.f32 -1.442695, %v2924_v49 }
0x266a   :  { %6998 = vpow2.f32 %v5660_v51 }
0x266b   :  { %7000 = vtanh.f32 %v2924_v49 }
0x2674   :  { %v6999_v52 = vpop.eup %6998 }
0x2675   :  { %v2931_v26 = vadd.f32 1.0, %v6999_v52  ;;  %v7001_v54 = vpop.eup %7000 }
0x2677   :  { %7002 = vrcp.f32 %v2931_v26 }
0x2681   :  { %v7003_v16 = vpop.eup %7002 }
0x2682   :  { %v2934_v62 = vsel %vm7384_vm7, %v7001_v54, %v7003_v16 }
0x2683   :  { %2937 = vrot.lane.b32.xlu1 %v2934_v62, %s7199_s5  ;;  %v2935_v36 = vmul.f32 %v2934_v62, %v7916_v17 }
0x26f5   :  { %v2938_v8 = vpop.permute.xlu1 %2937 }
0x26f6   :  { %v2940_v4 = vmul.f32 %v2938_v8, %v2934_v62 }
0x26f8   :  { %2942 = vrot.lane.b32.xlu0 %v2940_v4, %s7200_s19 }
0x276a   :  { %v2943_v38 = vpop.permute.xlu0 %2942 }
0x276b   :  { %v8000_v27 = vadd.f32 %v2943_v38, %v2935_v36 }
0x276d   :  { %7004 = vtanh.f32 %v8000_v27 }
0x2777   :  { %v7005_v12 = vpop.eup %7004 }
0x2778   :  { %2948 = vrot.lane.b32.xlu1 %v7005_v12, %s7199_s5  ;;  %v8030_v12 = vld [vmem:[%s8567_s1] sm:$0x3] }
0x27ea   :  { %v2949_v61 = vpop.permute.xlu1 %2948 }
0x27eb   :  { %v8004_v50 = vmul.f32 %v2949_v61, %v2934_v62 }
0x27ed   :  { %v2959_v29 = vrot.slane %v8004_v50, %v7713_v11 }
0x27ef   :  { %v2960_v5 = vcombine.high %v2959_v29, %v2959_v29  ;;  %v2967_v15 = vrot.slane %v2959_v29, %v7713_v11 }
0x27f1   :  { %v2974_v9 = vrot.slane %v2960_v5, %v7713_v11  ;;  %v2978_v17 = vrot.slane %v2967_v15, %v7722_v21 }
0x27f3   :  { %v2985_v42 = vmul.f32 %v2978_v17, %v7783_v46  ;;  %v2982_v18 = vrot.slane %v2974_v9, %v7722_v21 }
0x27f5   :  { %2989 = vrot.lane.b32.xlu0 %v2985_v42, %s7200_s19  ;;  %v2986_v35 = vmul.f32 %v2982_v18, %v7789_v30 }
0x27f7   :  { %2991 = vrot.lane.b32.xlu1 %v2986_v35, %s7200_s19 }
0x2867   :  { %v2990_v39 = vpop.permute.xlu0 %2989 }
0x2868   :  { %v2995_v40 = vsel %vm187_vm3, %v2990_v39, 0.0 }
0x2869   :  { %2996 = vadd.xlane.f32.xlu0 %v2995_v40  ;;  %v2992_v43 = vpop.permute.xlu1 %2991 }
0x286a   :  { %v2998_v44 = vsel %vm187_vm3, %v2992_v43, 0.0 }
0x286b   :  { %2999 = vadd.xlane.f32.xlu1 %v2998_v44 }
0x28f6   :  { %v2997_v32 = vpop.xlane.xlu0 %2996 }
0x28f7   :  { %v3001_v47 = vadd.f32 %v2997_v32, %v7805_v19 }
0x28f8   :  { %v3000_v58 = vpop.xlane.xlu1 %2999 }
0x28f9   :  { %v3002_v57 = vadd.f32 %v3000_v58, %v7802_v2  ;;  %3006 = vperm.xlu0 %6895, %v3001_v47  }
0x28fb   :  { %3009 = vperm.xlu1 %6876, %v3002_v57  }
0x2978   :  { %v3007_v48 = vpop.permute.xlu0 %3006 }
0x2979   :  { %v3014_v37 = vrot.slane %v3007_v48, %v7810_v24 }
0x297a   :  { %v3010_v56 = vpop.permute.xlu1 %3009 }
0x297b   :  { %v3018_v49 = vrot.slane %v3010_v56, %v7810_v24 }
0x297d   :  { %v3019_v41 = vsel %vm2159_vm11, %v3018_v49, %v3014_v37 }
0x297e   :  { %v3021_v51 = vsel %vm2162_vm12, %v3019_v41, -inf }
0x297f   :  { %3022 = vmax.xlane.f32.xlu0 %v3021_v51 }
0x2a0c   :  { %v3023_v52 = vpop.xlane.xlu0 %3022 }
0x2a0d   :  { %v3028_v26 = vrot.slane %v3023_v52, %v7722_v21  ;;  %v3032_v54 = vrot.slane %v3023_v52, %v7798_v63 }
0x2a0f   :  { %v3035_v16 = vsub.f32 %v3001_v47, %v3028_v26  ;;  %v3036_v62 = vsub.f32 %v3002_v57, %v3032_v54 }
0x2a11   :  { %v3037_v8 = vmul.f32 1.442695, %v3035_v16  ;;  %v3039_v4 = vmul.f32 1.442695, %v3036_v62 }
0x2a13   :  { %7006 = vpow2.f32 %v3037_v8 }
0x2a14   :  { %7008 = vpow2.f32 %v3039_v4 }
0x2a1d   :  { %v7007_v36 = vpop.eup %7006 }
0x2a1e   :  { %3044 = vperm.xlu1 %6876, %v7007_v36   ;;  %v7009_v38 = vpop.eup %7008 }
0x2a22   :  { %3047 = vperm.xlu1 %6876, %v7009_v38  }
0x2a26   :  { %6896 = vset.pattern.permute.xlu1 %v7202_v31 }
0x2a27   :  { %3197 = vperm.xlu1 %6896, %v8030_v12  }
0x2a2b   :  { %6897 = vset.pattern.permute.xlu1 %v7194_v0 }
0x2a9d   :  { %v3045_v61 = vpop.permute.xlu1 %3044 }
0x2a9e   :  { %v3052_v5 = vrot.slane %v3045_v61, %v7810_v24 }
0x2aa1   :  { %v3048_v29 = vpop.permute.xlu1 %3047 }
0x2aa2   :  { %v3056_v15 = vrot.slane %v3048_v29, %v7810_v24 }
0x2aa4   :  { %v3057_v9 = vsel %vm2159_vm11, %v3056_v15, %v3052_v5 }
0x2aa5   :  { %v3059_v17 = vsel %vm2162_vm12, %v3057_v9, 0.0 }
0x2aa6   :  { %3060 = vadd.xlane.f32.xlu1 %v3059_v17  ;;  %v3198_v31 = vpop.permute.xlu1 %3197 }
0x2aa7   :  { %vm3199_vm13 = vcmp.eq.s32.totalorder %v3198_v31, %v7359_v20 }
0x2aa8   :  { %v5662_v42 = vsel %vm3199_vm13, 1.0, %v7197_v6 }
0x2aa9   :  { %6299 = vmatmul.mubr.msk.f32.vlgmr.msra.gmra.mrb[24].mxu1 %vm113_vm1, %v5662_v42 }
0x2aaa   :  { %6737 = vmatpush3.bf16.msra.mxu1 %v7843_v59  ;;  %6336 = vmatprep.mubr.msk.f32.mxu1 %vm7196_vm0, %v7197_v6 }
0x2aab   :  { %6738 = vmatprep.subr.bf16.mxu1 %v7195_v1 }
0x2aae   :  { %6740 = vmatpush3.bf16.msra.mxu1 %v7849_v10 }
0x2aaf   :  { %6741 = vmatprep.subr.bf16.mxu1 %v7195_v1 }
0x2ab2   :  { %6743 = vmatpush3.bf16.msra.mxu1 %v7861_v28 }
0x2ab3   :  { %6744 = vmatprep.subr.bf16.mxu1 %v7195_v1 }
0x2ab6   :  { %6746 = vmatpush3.bf16.msra.mxu1 %v7873_v53 }
0x2ab7   :  { %6750 = vmatprep.subr.bf16.mxu1 %v7195_v1 }
0x2b33   :  { %v3061_v18 = vpop.xlane.xlu1 %3060 }
0x2b34   :  { %7010 = vrcp.f32 %v3061_v18 }
0x2b3e   :  { %v7011_v35 = vpop.eup %7010 }
0x2b3f   :  { %v3071_v39 = vrot.slane %v7011_v35, %v7798_v63  ;;  %v3067_v40 = vrot.slane %v7011_v35, %v7722_v21  ;;  %v8086_v35 = vld [vmem:[%s8573_s7] ss:$0 sm:$0xff] }
0x2b41   :  { %v3075_v43 = vmul.f32 %v7009_v38, %v3071_v39  ;;  %v3074_v44 = vmul.f32 %v7007_v36, %v3067_v40 }
0x2b43   :  { %3083 = vperm.xlu1 %6897, %v3075_v43   ;;  %3078 = vperm.xlu0 %6895, %v3074_v44  }
0x2b47   :  { %3102 = vrot.lane.b32.xlu0 %v8004_v50, %s7200_s19 }
0x2b7c   :  { %v3271_v32 = vpop.f32.mrb[24].mxu1 }
0x2b7d   :  { %v6300_v47 = vpop.f32.mrb[25].mxu1 }
0x2bc2   :  { %v3084_v58 = vpop.permute.xlu1 %3083  ;;  %v3079_v57 = vpop.permute.xlu0 %3078 }
0x2bc3   :  { %v3087_v48 = vmul.f32 %v3084_v58, %v7789_v30  ;;  %v3086_v56 = vmul.f32 %v3079_v57, %v7783_v46 }
0x2bc5   :  { %v3095_v37 = vsel %vm2230_vm14, %v3087_v48, 0.0  ;;  %v3088_v49 = vsel %vm2230_vm14, %v3086_v56, 0.0 }
0x2bc6   :  { %v3096_v41 = vrot.slane %v3095_v37, 4  ;;  %v3089_v51 = vrot.slane %v3088_v49, 4  ;;  %v3103_v5 = vpop.permute.xlu0 %3102 }
0x2bc8   :  { %v3097_v52 = vadd.f32 %v3096_v41, %v3095_v37  ;;  %v3090_v26 = vadd.f32 %v3089_v51, %v3088_v49 }
0x2bca   :  { %v3098_v54 = vrot.slane %v3097_v52, 2  ;;  %v3091_v16 = vrot.slane %v3090_v26, 2 }
0x2bcc   :  { %v3099_v62 = vadd.f32 %v3098_v54, %v3097_v52  ;;  %v3092_v8 = vadd.f32 %v3091_v16, %v3090_v26 }
0x2bce   :  { %v3093_v4 = vrot.slane %v3092_v8, 1  ;;  %v3100_v36 = vrot.slane %v3099_v62, 1 }
0x2bd0   :  { %v3094_v38 = vadd.f32 %v3093_v4, %v3092_v8  ;;  %v3101_v61 = vadd.f32 %v3100_v36, %v3099_v62 }
0x2bd2   :  { %v3107_v29 = vsel %vm2159_vm11, %v3101_v61, %v3094_v38 }
0x2bd3   :  { %3108 = vrot.lane.b32.xlu0 %v3107_v29, %s7199_s5 }
0x2bd7   :  { %3275 = vrot.lane.b32.xlu0 %v8004_v50, %s7199_s5 }
0x2c45   :  { %v3109_v15 = vpop.permute.xlu0 %3108 }
0x2c46   :  { %v3111_v9 = vsel %vm187_vm3, %v3103_v5, %v3109_v15 }
0x2c47   :  { %6292 = vmatmul.mubr.msk.f32.vlgmr.msra.gmra.mrb[24].mxu0 %vm195_vm4, %v3111_v9 }
0x2c48   :  { %6725 = vmatpush3.bf16.msra.mxu0 %v7663_v13  ;;  %6317 = vmatprep.mubr.msk.f32.mxu0 %vm7196_vm0, %v7197_v6 }
0x2c49   :  { %6726 = vmatprep.subr.bf16.mxu0 %v7195_v1  ;;  %v3276_v50 = vpop.permute.xlu0 %3275 }
0x2c4a   :  { %v3278_v17 = vsel %vm187_vm3, %v3271_v32, %v3276_v50 }
0x2c4c   :  { %6728 = vmatpush3.bf16.msra.mxu0 %v7667_v14 }
0x2c4d   :  { %6729 = vmatprep.subr.bf16.mxu0 %v7195_v1 }
0x2c50   :  { %6731 = vmatpush3.bf16.msra.mxu0 %v7671_v22 }
0x2c51   :  { %6732 = vmatprep.subr.bf16.mxu0 %v7195_v1 }
0x2c54   :  { %6734 = vmatpush3.bf16.msra.mxu0 %v7675_v25 }
0x2c55   :  { %6747 = vmatprep.subr.bf16.mxu0 %v7195_v1 }
0x2c57   :  { %6318 = vmatmul.mubr.msk.f32.vlgmr.msra.gmra.mrb[26].mxu0 %vm195_vm4, %v3278_v17 }
0x2c58   :  { %6749 = vmatpush3.bf16.msra.mxu0 %v7654_v55  ;;  %6343 = vmatprep.mubr.msk.f32.mxu0 %vm7196_vm0, %v7197_v6 }
0x2c59   :  { %6762 = vmatprep.subr.bf16.mxu0 %v7195_v1 }
0x2d1a   :  { %v8081_v31 = vpop.f32.mrb[24].mxu0 }
0x2d1b   :  { %v6293_v42 = vpop.f32.mrb[25].mxu0 }
0x2d2a   :  { %v3348_v18 = vpop.f32.mrb[26].mxu0 }
0x2d2b   :  { %v3349_v39 = vadd.f32 %v8086_v35, %v3348_v18  ;;  %v6319_v40 = vpop.f32.mrb[27].mxu0 }
0x2d2d   :  { %v5665_v43 = vmul.f32 -1.442695, %v3349_v39 }
0x2d2f   :  { %7012 = vpow2.f32 %v5665_v43 }
0x2d30   :  { %7014 = vtanh.f32 %v3349_v39 }
0x2d39   :  { %v7013_v44 = vpop.eup %7012 }
0x2d3a   :  { %v3356_v32 = vadd.f32 1.0, %v7013_v44  ;;  %v7015_v47 = vpop.eup %7014 }
0x2d3c   :  { %7016 = vrcp.f32 %v3356_v32 }
0x2d46   :  { %v7017_v58 = vpop.eup %7016 }
0x2d47   :  { %v3359_v57 = vsel %vm7384_vm7, %v7015_v47, %v7017_v58 }
0x2d48   :  { %3362 = vrot.lane.b32.xlu0 %v3359_v57, %s7199_s5  ;;  %v3360_v37 = vmul.f32 %v3359_v57, %v8000_v27 }
0x2dba   :  { %v3363_v48 = vpop.permute.xlu0 %3362 }
0x2dbb   :  { %v3365_v56 = vmul.f32 %v3363_v48, %v3359_v57 }
0x2dbd   :  { %3367 = vrot.lane.b32.xlu1 %v3365_v56, %s7200_s19 }
0x2e2f   :  { %v3368_v49 = vpop.permute.xlu1 %3367 }
0x2e30   :  { %v8094_v41 = vadd.f32 %v3368_v49, %v3360_v37 }
0x2e32   :  { %7018 = vtanh.f32 %v8094_v41 }
0x2e3c   :  { %v7019_v51 = vpop.eup %7018 }
0x2e3d   :  { %3373 = vrot.lane.b32.xlu0 %v7019_v51, %s7199_s5 }
0x2eaf   :  { %v3374_v52 = vpop.permute.xlu0 %3373 }
0x2eb0   :  { %v8098_v26 = vmul.f32 %v3374_v52, %v3359_v57 }
0x2eb2   :  { %v3384_v54 = vrot.slane %v8098_v26, %v7713_v11 }
0x2eb4   :  { %v3385_v16 = vcombine.high %v3384_v54, %v3384_v54  ;;  %v3392_v62 = vrot.slane %v3384_v54, %v7713_v11 }
0x2eb6   :  { %v3399_v8 = vrot.slane %v3385_v16, %v7713_v11  ;;  %v3403_v27 = vrot.slane %v3392_v62, %v7722_v21 }
0x2eb8   :  { %v3410_v4 = vmul.f32 %v3403_v27, %v7783_v46  ;;  %v3407_v36 = vrot.slane %v3399_v8, %v7722_v21 }
0x2eba   :  { %3414 = vrot.lane.b32.xlu1 %v3410_v4, %s7200_s19  ;;  %v3411_v38 = vmul.f32 %v3407_v36, %v7789_v30 }
0x2ebc   :  { %3416 = vrot.lane.b32.xlu0 %v3411_v38, %s7200_s19 }
0x2f2c   :  { %v3415_v61 = vpop.permute.xlu1 %3414 }
0x2f2d   :  { %v3420_v29 = vsel %vm187_vm3, %v3415_v61, 0.0 }
0x2f2e   :  { %3421 = vadd.xlane.f32.xlu1 %v3420_v29  ;;  %v3417_v5 = vpop.permute.xlu0 %3416 }
0x2f2f   :  { %v3423_v15 = vsel %vm187_vm3, %v3417_v5, 0.0 }
0x2f30   :  { %3424 = vadd.xlane.f32.xlu0 %v3423_v15 }
0x2fbb   :  { %v3422_v9 = vpop.xlane.xlu1 %3421 }
0x2fbc   :  { %v3426_v50 = vadd.f32 %v3422_v9, %v7805_v19 }
0x2fbd   :  { %v3425_v17 = vpop.xlane.xlu0 %3424 }
0x2fbe   :  { %v3427_v42 = vadd.f32 %v3425_v17, %v7802_v2  ;;  %3431 = vperm.xlu0 %6895, %v3426_v50  }
0x2fc0   :  { %3434 = vperm.xlu1 %6897, %v3427_v42  }
0x303d   :  { %v3432_v18 = vpop.permute.xlu0 %3431 }
0x303e   :  { %v3439_v40 = vrot.slane %v3432_v18, %v7810_v24 }
0x303f   :  { %v3435_v39 = vpop.permute.xlu1 %3434 }
0x3040   :  { %v3443_v43 = vrot.slane %v3435_v39, %v7810_v24 }
0x3042   :  { %v3444_v44 = vsel %vm2159_vm11, %v3443_v43, %v3439_v40 }
0x3043   :  { %v3446_v32 = vsel %vm2162_vm12, %v3444_v44, -inf }
0x3044   :  { %3447 = vmax.xlane.f32.xlu1 %v3446_v32 }
0x30d1   :  { %v3448_v47 = vpop.xlane.xlu1 %3447 }
0x30d2   :  { %v3453_v58 = vrot.slane %v3448_v47, %v7722_v21  ;;  %v3457_v57 = vrot.slane %v3448_v47, %v7798_v63 }
0x30d4   :  { %v3460_v48 = vsub.f32 %v3426_v50, %v3453_v58  ;;  %v3461_v56 = vsub.f32 %v3427_v42, %v3457_v57 }
0x30d6   :  { %v3462_v37 = vmul.f32 1.442695, %v3460_v48  ;;  %v3464_v49 = vmul.f32 1.442695, %v3461_v56 }
0x30d8   :  { %7020 = vpow2.f32 %v3462_v37 }
0x30d9   :  { %7022 = vpow2.f32 %v3464_v49 }
0x30e2   :  { %v7021_v51 = vpop.eup %7020 }
0x30e3   :  { %3469 = vperm.xlu0 %6895, %v7021_v51   ;;  %v7023_v52 = vpop.eup %7022 }
0x30e7   :  { %3472 = vperm.xlu0 %6895, %v7023_v52  }
0x30eb   :  { %6898 = vset.pattern.permute.xlu0 %v7203_v3 }
0x30ec   :  { %3622 = vperm.xlu0 %6898, %v8030_v12  }
0x30f0   :  { %6899 = vset.pattern.permute.xlu0 %v7194_v0 }
0x3162   :  { %v3470_v54 = vpop.permute.xlu0 %3469 }
0x3163   :  { %v3477_v62 = vrot.slane %v3470_v54, %v7810_v24 }
0x3166   :  { %v3473_v16 = vpop.permute.xlu0 %3472 }
0x3167   :  { %v3481_v8 = vrot.slane %v3473_v16, %v7810_v24 }
0x3169   :  { %v3482_v27 = vsel %vm2159_vm11, %v3481_v8, %v3477_v62 }
0x316a   :  { %v3484_v4 = vsel %vm2162_vm12, %v3482_v27, 0.0 }
0x316b   :  { %3485 = vadd.xlane.f32.xlu0 %v3484_v4  ;;  %v3623_v36 = vpop.permute.xlu0 %3622 }
0x316c   :  { %vm3624_vm13 = vcmp.eq.s32.totalorder %v3623_v36, %v7359_v20 }
0x316d   :  { %v5667_v3 = vsel %vm3624_vm13, 1.0, %v7197_v6 }
0x316e   :  { %6344 = vmatmul.mubr.msk.f32.vlgmr.msra.gmra.mrb[28].mxu0 %vm113_vm1, %v5667_v3 }
0x316f   :  { %6764 = vmatpush3.bf16.msra.mxu0 %v7843_v59  ;;  %6381 = vmatprep.mubr.msk.f32.mxu0 %vm7196_vm0, %v7197_v6 }
0x3170   :  { %6765 = vmatprep.subr.bf16.mxu0 %v7195_v1 }
0x3173   :  { %6767 = vmatpush3.bf16.msra.mxu0 %v7849_v10 }
0x3174   :  { %6768 = vmatprep.subr.bf16.mxu0 %v7195_v1 }
0x3177   :  { %6770 = vmatpush3.bf16.msra.mxu0 %v7861_v28 }
0x3178   :  { %6771 = vmatprep.subr.bf16.mxu0 %v7195_v1 }
0x317b   :  { %6773 = vmatpush3.bf16.msra.mxu0 %v7873_v53 }
0x317c   :  { %6777 = vmatprep.subr.bf16.mxu0 %v7195_v1 }
0x31f8   :  { %v3486_v38 = vpop.xlane.xlu0 %3485 }
0x31f9   :  { %7024 = vrcp.f32 %v3486_v38 }
0x3203   :  { %v7025_v61 = vpop.eup %7024 }
0x3204   :  { %v3496_v29 = vrot.slane %v7025_v61, %v7798_v63  ;;  %v3492_v5 = vrot.slane %v7025_v61, %v7722_v21 }
0x3206   :  { %v3500_v15 = vmul.f32 %v7023_v52, %v3496_v29  ;;  %v3499_v9 = vmul.f32 %v7021_v51, %v3492_v5 }
0x3208   :  { %3508 = vperm.xlu0 %6899, %v3500_v15   ;;  %3503 = vperm.xlu1 %6897, %v3499_v9  }
0x320c   :  { %3527 = vrot.lane.b32.xlu1 %v8098_v26, %s7200_s19 }
0x3241   :  { %v3696_v50 = vpop.f32.mrb[28].mxu0 }
0x3242   :  { %v6345_v17 = vpop.f32.mrb[29].mxu0 }
0x3287   :  { %v3509_v42 = vpop.permute.xlu0 %3508  ;;  %v3504_v18 = vpop.permute.xlu1 %3503 }
0x3288   :  { %v3512_v39 = vmul.f32 %v3509_v42, %v7789_v30  ;;  %v3511_v40 = vmul.f32 %v3504_v18, %v7783_v46 }
0x328a   :  { %v3520_v43 = vsel %vm2230_vm14, %v3512_v39, 0.0  ;;  %v3513_v44 = vsel %vm2230_vm14, %v3511_v40, 0.0 }
0x328b   :  { %v3521_v32 = vrot.slane %v3520_v43, 4  ;;  %v3514_v47 = vrot.slane %v3513_v44, 4  ;;  %v3528_v8 = vpop.permute.xlu1 %3527 }
0x328d   :  { %v3522_v58 = vadd.f32 %v3521_v32, %v3520_v43  ;;  %v3515_v57 = vadd.f32 %v3514_v47, %v3513_v44 }
0x328f   :  { %v3523_v48 = vrot.slane %v3522_v58, 2  ;;  %v3516_v56 = vrot.slane %v3515_v57, 2 }
0x3291   :  { %v3524_v37 = vadd.f32 %v3523_v48, %v3522_v58  ;;  %v3517_v49 = vadd.f32 %v3516_v56, %v3515_v57 }
0x3293   :  { %v3525_v51 = vrot.slane %v3524_v37, 1  ;;  %v3518_v52 = vrot.slane %v3517_v49, 1 }
0x3295   :  { %v3526_v54 = vadd.f32 %v3525_v51, %v3524_v37  ;;  %v3519_v16 = vadd.f32 %v3518_v52, %v3517_v49 }
0x3297   :  { %v3532_v62 = vsel %vm2159_vm11, %v3526_v54, %v3519_v16 }
0x3298   :  { %3533 = vrot.lane.b32.xlu1 %v3532_v62, %s7199_s5 }
0x329c   :  { %3700 = vrot.lane.b32.xlu1 %v8098_v26, %s7199_s5 }
0x330a   :  { %v3534_v27 = vpop.permute.xlu1 %3533 }
0x330b   :  { %v3536_v4 = vsel %vm187_vm3, %v3528_v8, %v3534_v27 }
0x330c   :  { %6337 = vmatmul.mubr.msk.f32.vlgmr.msra.gmra.mrb[26].mxu1 %vm195_vm4, %v3536_v4 }
0x330d   :  { %6752 = vmatpush3.bf16.msra.mxu1 %v7663_v13  ;;  %6362 = vmatprep.mubr.msk.f32.mxu1 %vm7196_vm0, %v7197_v6 }
0x330e   :  { %6753 = vmatprep.subr.bf16.mxu1 %v7195_v1  ;;  %v3701_v26 = vpop.permute.xlu1 %3700 }
0x330f   :  { %v3703_v36 = vsel %vm187_vm3, %v3696_v50, %v3701_v26 }
0x3311   :  { %6755 = vmatpush3.bf16.msra.mxu1 %v7667_v14 }
0x3312   :  { %6756 = vmatprep.subr.bf16.mxu1 %v7195_v1 }
0x3315   :  { %6758 = vmatpush3.bf16.msra.mxu1 %v7671_v22 }
0x3316   :  { %6759 = vmatprep.subr.bf16.mxu1 %v7195_v1 }
0x3319   :  { %6761 = vmatpush3.bf16.msra.mxu1 %v7675_v25 }
0x331a   :  { %6774 = vmatprep.subr.bf16.mxu1 %v7195_v1 }
0x331c   :  { %6363 = vmatmul.mubr.msk.f32.vlgmr.msra.gmra.mrb[28].mxu1 %vm195_vm4, %v3703_v36 }
0x331d   :  { %6776 = vmatpush3.bf16.msra.mxu1 %v7654_v55  ;;  %6388 = vmatprep.mubr.msk.f32.mxu1 %vm7196_vm0, %v7197_v6 }
0x331e   :  { %6789 = vmatprep.subr.bf16.mxu1 %v7195_v1 }
0x33df   :  { %v8170_v3 = vpop.f32.mrb[26].mxu1 }
0x33e0   :  { %v6338_v38 = vpop.f32.mrb[27].mxu1 }
0x33ef   :  { %v3773_v61 = vpop.f32.mrb[28].mxu1 }
0x33f0   :  { %v3774_v29 = vadd.f32 %v8086_v35, %v3773_v61  ;;  %v6364_v5 = vpop.f32.mrb[29].mxu1 }
0x33f2   :  { %v5670_v15 = vmul.f32 -1.442695, %v3774_v29 }
0x33f4   :  { %7026 = vpow2.f32 %v5670_v15 }
0x33f5   :  { %7028 = vtanh.f32 %v3774_v29 }
0x33fe   :  { %v7027_v9 = vpop.eup %7026 }
0x33ff   :  { %v3781_v50 = vadd.f32 1.0, %v7027_v9  ;;  %v7029_v17 = vpop.eup %7028 }
0x3401   :  { %7030 = vrcp.f32 %v3781_v50 }
0x340b   :  { %v7031_v42 = vpop.eup %7030 }
0x340c   :  { %v3784_v18 = vsel %vm7384_vm7, %v7029_v17, %v7031_v42 }
0x340d   :  { %3787 = vrot.lane.b32.xlu1 %v3784_v18, %s7199_s5  ;;  %v3785_v43 = vmul.f32 %v3784_v18, %v8094_v41 }
0x347f   :  { %v3788_v39 = vpop.permute.xlu1 %3787 }
0x3480   :  { %v3790_v40 = vmul.f32 %v3788_v39, %v3784_v18 }
0x3482   :  { %3792 = vrot.lane.b32.xlu1 %v3790_v40, %s7200_s19 }
0x34f4   :  { %v3793_v44 = vpop.permute.xlu1 %3792 }
0x34f5   :  { %v8178_v32 = vadd.f32 %v3793_v44, %v3785_v43 }
0x34f7   :  { %7032 = vtanh.f32 %v8178_v32 }
0x3501   :  { %v7033_v47 = vpop.eup %7032 }
0x3502   :  { %3798 = vrot.lane.b32.xlu1 %v7033_v47, %s7199_s5 }
0x3574   :  { %v3799_v58 = vpop.permute.xlu1 %3798 }
0x3575   :  { %v8182_v57 = vmul.f32 %v3799_v58, %v3784_v18 }
0x3577   :  { %v3809_v48 = vrot.slane %v8182_v57, %v7713_v11 }
0x3579   :  { %v3810_v56 = vcombine.high %v3809_v48, %v3809_v48  ;;  %v3817_v37 = vrot.slane %v3809_v48, %v7713_v11 }
0x357b   :  { %v3824_v49 = vrot.slane %v3810_v56, %v7713_v11  ;;  %v3828_v41 = vrot.slane %v3817_v37, %v7722_v21 }
0x357d   :  { %v3835_v51 = vmul.f32 %v3828_v41, %v7783_v46  ;;  %v3832_v52 = vrot.slane %v3824_v49, %v7722_v21 }
0x357f   :  { %3839 = vrot.lane.b32.xlu1 %v3835_v51, %s7200_s19  ;;  %v3836_v54 = vmul.f32 %v3832_v52, %v7789_v30 }
0x3583   :  { %3841 = vrot.lane.b32.xlu1 %v3836_v54, %s7200_s19 }
0x35f1   :  { %v3840_v16 = vpop.permute.xlu1 %3839 }
0x35f2   :  { %v3845_v62 = vsel %vm187_vm3, %v3840_v16, 0.0 }
0x35f3   :  { %3846 = vadd.xlane.f32.xlu1 %v3845_v62 }
0x35f5   :  { %v3842_v8 = vpop.permute.xlu1 %3841 }
0x35f6   :  { %v3848_v27 = vsel %vm187_vm3, %v3842_v8, 0.0 }
0x35f7   :  { %3849 = vadd.xlane.f32.xlu0 %v3848_v27 }
0x3680   :  { %v3847_v4 = vpop.xlane.xlu1 %3846 }
0x3681   :  { %v3851_v26 = vadd.f32 %v3847_v4, %v7805_v19 }
0x3683   :  { %3856 = vperm.xlu1 %6897, %v3851_v26  }
0x3684   :  { %v3850_v36 = vpop.xlane.xlu0 %3849 }
0x3685   :  { %v3852_v38 = vadd.f32 %v3850_v36, %v7802_v2 }
0x3687   :  { %3859 = vperm.xlu0 %6899, %v3852_v38  }
0x3702   :  { %v3857_v61 = vpop.permute.xlu1 %3856 }
0x3703   :  { %v3864_v5 = vrot.slane %v3857_v61, %v7810_v24 }
0x3706   :  { %v3860_v29 = vpop.permute.xlu0 %3859 }
0x3707   :  { %v3868_v15 = vrot.slane %v3860_v29, %v7810_v24 }
0x3709   :  { %v3869_v9 = vsel %vm2159_vm11, %v3868_v15, %v3864_v5 }
0x370a   :  { %v3871_v50 = vsel %vm2162_vm12, %v3869_v9, -inf }
0x370b   :  { %3872 = vmax.xlane.f32.xlu1 %v3871_v50 }
0x3798   :  { %v3873_v17 = vpop.xlane.xlu1 %3872 }
0x3799   :  { %v3878_v42 = vrot.slane %v3873_v17, %v7722_v21  ;;  %v3882_v18 = vrot.slane %v3873_v17, %v7798_v63 }
0x379b   :  { %v3885_v39 = vsub.f32 %v3851_v26, %v3878_v42  ;;  %v3886_v40 = vsub.f32 %v3852_v38, %v3882_v18 }
0x379d   :  { %v3887_v43 = vmul.f32 1.442695, %v3885_v39  ;;  %v3889_v44 = vmul.f32 1.442695, %v3886_v40 }
0x379f   :  { %7034 = vpow2.f32 %v3887_v43 }
0x37a0   :  { %7036 = vpow2.f32 %v3889_v44 }
0x37a9   :  { %v7035_v47 = vpop.eup %7034 }
0x37aa   :  { %3894 = vperm.xlu0 %6899, %v7035_v47   ;;  %v7037_v58 = vpop.eup %7036 }
0x37ae   :  { %3897 = vperm.xlu0 %6899, %v7037_v58  }
0x37b2   :  { %6900 = vset.pattern.permute.xlu0 %v7204_v45 }
0x37b3   :  { %4047 = vperm.xlu0 %6900, %v8030_v12  }
0x37b7   :  { %6901 = vset.pattern.permute.xlu0 %v7194_v0 }
0x3829   :  { %v3895_v48 = vpop.permute.xlu0 %3894 }
0x382a   :  { %v3902_v37 = vrot.slane %v3895_v48, %v7810_v24 }
0x382d   :  { %v3898_v56 = vpop.permute.xlu0 %3897 }
0x382e   :  { %v3906_v49 = vrot.slane %v3898_v56, %v7810_v24 }
0x3830   :  { %v3907_v41 = vsel %vm2159_vm11, %v3906_v49, %v3902_v37 }
0x3831   :  { %v3909_v51 = vsel %vm2162_vm12, %v3907_v41, 0.0 }
0x3832   :  { %3910 = vadd.xlane.f32.xlu0 %v3909_v51  ;;  %v4048_v52 = vpop.permute.xlu0 %4047 }
0x3833   :  { %vm4049_vm13 = vcmp.eq.s32.totalorder %v4048_v52, %v7359_v20 }
0x3834   :  { %v5672_v45 = vsel %vm4049_vm13, 1.0, %v7197_v6 }
0x3835   :  { %6389 = vmatmul.mubr.msk.f32.vlgmr.msra.gmra.mrb[30].mxu1 %vm113_vm1, %v5672_v45 }
0x3836   :  { %6791 = vmatpush3.bf16.msra.mxu1 %v7843_v59  ;;  %6426 = vmatprep.mubr.msk.f32.mxu1 %vm7196_vm0, %v7197_v6 }
0x3837   :  { %6792 = vmatprep.subr.bf16.mxu1 %v7195_v1 }
0x383a   :  { %6794 = vmatpush3.bf16.msra.mxu1 %v7849_v10 }
0x383b   :  { %6795 = vmatprep.subr.bf16.mxu1 %v7195_v1 }
0x383e   :  { %6797 = vmatpush3.bf16.msra.mxu1 %v7861_v28 }
0x383f   :  { %6798 = vmatprep.subr.bf16.mxu1 %v7195_v1 }
0x3842   :  { %6800 = vmatpush3.bf16.msra.mxu1 %v7873_v53 }
0x3843   :  { %6804 = vmatprep.subr.bf16.mxu1 %v7195_v1 }
0x3848   :  { %3952 = vrot.lane.b32.xlu0 %v8182_v57, %s7200_s19 }
0x38bf   :  { %v3911_v54 = vpop.xlane.xlu0 %3910 }
0x38c0   :  { %7038 = vrcp.f32 %v3911_v54 }
0x38c3   :  { %v3953_v49 = vpop.permute.xlu0 %3952 }
0x38ca   :  { %v7039_v16 = vpop.eup %7038 }
0x38cb   :  { %v3917_v62 = vrot.slane %v7039_v16, %v7722_v21  ;;  %v3921_v27 = vrot.slane %v7039_v16, %v7798_v63 }
0x38cd   :  { %v3924_v8 = vmul.f32 %v7035_v47, %v3917_v62  ;;  %v3925_v4 = vmul.f32 %v7037_v58, %v3921_v27 }
0x38cf   :  { %3928 = vperm.xlu1 %6897, %v3924_v8  }
0x38d3   :  { %3933 = vperm.xlu1 %6897, %v3925_v4  }
0x3908   :  { %v4121_v26 = vpop.f32.mrb[30].mxu1 }
0x3909   :  { %v6390_v36 = vpop.f32.mrb[31].mxu1 }
0x394e   :  { %v3929_v38 = vpop.permute.xlu1 %3928 }
0x394f   :  { %v3936_v61 = vmul.f32 %v3929_v38, %v7783_v46 }
0x3951   :  { %v3938_v29 = vsel %vm2230_vm14, %v3936_v61, 0.0 }
0x3952   :  { %v3939_v5 = vrot.slane %v3938_v29, 4  ;;  %v3934_v15 = vpop.permute.xlu1 %3933 }
0x3953   :  { %v3937_v9 = vmul.f32 %v3934_v15, %v7789_v30 }
0x3954   :  { %v3940_v50 = vadd.f32 %v3939_v5, %v3938_v29 }
0x3955   :  { %v3945_v17 = vsel %vm2230_vm14, %v3937_v9, 0.0 }
0x3956   :  { %v3941_v42 = vrot.slane %v3940_v50, 2  ;;  %v3946_v18 = vrot.slane %v3945_v17, 4 }
0x3958   :  { %v3942_v39 = vadd.f32 %v3941_v42, %v3940_v50  ;;  %v3947_v40 = vadd.f32 %v3946_v18, %v3945_v17 }
0x395a   :  { %v3948_v43 = vrot.slane %v3947_v40, 2  ;;  %v3943_v44 = vrot.slane %v3942_v39, 1 }
0x395c   :  { %v3949_v47 = vadd.f32 %v3948_v43, %v3947_v40  ;;  %v3944_v48 = vadd.f32 %v3943_v44, %v3942_v39 }
0x395e   :  { %v3950_v58 = vrot.slane %v3949_v47, 1 }
0x3960   :  { %v3951_v56 = vadd.f32 %v3950_v58, %v3949_v47 }
0x3962   :  { %v3957_v37 = vsel %vm2159_vm11, %v3951_v56, %v3944_v48 }
0x3963   :  { %3958 = vrot.lane.b32.xlu1 %v3957_v37, %s7199_s5 }
0x3967   :  { %4125 = vrot.lane.b32.xlu1 %v8182_v57, %s7199_s5 }
0x39d5   :  { %v3959_v41 = vpop.permute.xlu1 %3958 }
0x39d6   :  { %v3961_v51 = vsel %vm187_vm3, %v3953_v49, %v3959_v41 }
0x39d7   :  { %6382 = vmatmul.mubr.msk.f32.vlgmr.msra.gmra.mrb[30].mxu0 %vm195_vm4, %v3961_v51 }
0x39d8   :  { %6779 = vmatpush3.bf16.msra.mxu0 %v7663_v13  ;;  %6407 = vmatprep.mubr.msk.f32.mxu0 %vm7196_vm0, %v7197_v6 }
0x39d9   :  { %6780 = vmatprep.subr.bf16.mxu0 %v7195_v1  ;;  %v4126_v57 = vpop.permute.xlu1 %4125 }
0x39da   :  { %v4128_v52 = vsel %vm187_vm3, %v4121_v26, %v4126_v57 }
0x39dc   :  { %6782 = vmatpush3.bf16.msra.mxu0 %v7667_v14 }
0x39dd   :  { %6783 = vmatprep.subr.bf16.mxu0 %v7195_v1 }
0x39e0   :  { %6785 = vmatpush3.bf16.msra.mxu0 %v7671_v22 }
0x39e1   :  { %6786 = vmatprep.subr.bf16.mxu0 %v7195_v1 }
0x39e4   :  { %6788 = vmatpush3.bf16.msra.mxu0 %v7675_v25 }
0x39e5   :  { %6801 = vmatprep.subr.bf16.mxu0 %v7195_v1 }
0x39e7   :  { %6408 = vmatmul.mubr.msk.f32.vlgmr.msra.gmra.mrb[32].mxu0 %vm195_vm4, %v4128_v52 }
0x39e8   :  { %6803 = vmatpush3.bf16.msra.mxu0 %v7654_v55  ;;  %6433 = vmatprep.mubr.msk.f32.mxu0 %vm7196_vm0, %v7197_v6 }
0x39e9   :  { %6816 = vmatprep.subr.bf16.mxu0 %v7195_v1 }
0x3aaa   :  { %v8254_v45 = vpop.f32.mrb[30].mxu0 }
0x3aab   :  { %v6383_v54 = vpop.f32.mrb[31].mxu0 }
0x3aba   :  { %v4198_v16 = vpop.f32.mrb[32].mxu0 }
0x3abb   :  { %v4199_v62 = vadd.f32 %v8086_v35, %v4198_v16  ;;  %v6409_v8 = vpop.f32.mrb[33].mxu0 }
0x3abd   :  { %v5675_v27 = vmul.f32 -1.442695, %v4199_v62 }
0x3abf   :  { %7040 = vpow2.f32 %v5675_v27 }
0x3ac0   :  { %7042 = vtanh.f32 %v4199_v62 }
0x3ac9   :  { %v7041_v4 = vpop.eup %7040 }
0x3aca   :  { %v4206_v26 = vadd.f32 1.0, %v7041_v4  ;;  %v7043_v36 = vpop.eup %7042 }
0x3acc   :  { %7044 = vrcp.f32 %v4206_v26 }
0x3ad6   :  { %v7045_v38 = vpop.eup %7044 }
0x3ad7   :  { %v4209_v61 = vsel %vm7384_vm7, %v7043_v36, %v7045_v38 }
0x3ad8   :  { %4212 = vrot.lane.b32.xlu1 %v4209_v61, %s7199_s5  ;;  %v4210_v15 = vmul.f32 %v4209_v61, %v8178_v32 }
0x3b4a   :  { %v4213_v29 = vpop.permute.xlu1 %4212 }
0x3b4b   :  { %v4215_v5 = vmul.f32 %v4213_v29, %v4209_v61 }
0x3b4d   :  { %4217 = vrot.lane.b32.xlu1 %v4215_v5, %s7200_s19 }
0x3bbf   :  { %v4218_v9 = vpop.permute.xlu1 %4217 }
0x3bc0   :  { %v8262_v50 = vadd.f32 %v4218_v9, %v4210_v15 }
0x3bc2   :  { %7046 = vtanh.f32 %v8262_v50 }
0x3bcc   :  { %v7047_v17 = vpop.eup %7046 }
0x3bcd   :  { %4223 = vrot.lane.b32.xlu1 %v7047_v17, %s7199_s5 }
0x3c3f   :  { %v4224_v42 = vpop.permute.xlu1 %4223 }
0x3c40   :  { %v8266_v18 = vmul.f32 %v4224_v42, %v4209_v61 }
0x3c42   :  { %v4234_v39 = vrot.slane %v8266_v18, %v7713_v11 }
0x3c44   :  { %v4235_v40 = vcombine.high %v4234_v39, %v4234_v39  ;;  %v4242_v43 = vrot.slane %v4234_v39, %v7713_v11 }
0x3c46   :  { %v4249_v44 = vrot.slane %v4235_v40, %v7713_v11  ;;  %v4253_v32 = vrot.slane %v4242_v43, %v7722_v21 }
0x3c48   :  { %v4260_v47 = vmul.f32 %v4253_v32, %v7783_v46  ;;  %v4257_v58 = vrot.slane %v4249_v44, %v7722_v21 }
0x3c4a   :  { %4264 = vrot.lane.b32.xlu0 %v4260_v47, %s7200_s19  ;;  %v4261_v48 = vmul.f32 %v4257_v58, %v7789_v30 }
0x3c4c   :  { %4266 = vrot.lane.b32.xlu1 %v4261_v48, %s7200_s19 }
0x3cbc   :  { %v4265_v56 = vpop.permute.xlu0 %4264 }
0x3cbd   :  { %v4270_v37 = vsel %vm187_vm3, %v4265_v56, 0.0 }
0x3cbe   :  { %4271 = vadd.xlane.f32.xlu0 %v4270_v37  ;;  %v4267_v49 = vpop.permute.xlu1 %4266 }
0x3cbf   :  { %v4273_v41 = vsel %vm187_vm3, %v4267_v49, 0.0 }
0x3cc0   :  { %4274 = vadd.xlane.f32.xlu1 %v4273_v41 }
0x3d4b   :  { %v4272_v51 = vpop.xlane.xlu0 %4271 }
0x3d4c   :  { %v4276_v57 = vadd.f32 %v4272_v51, %v7805_v19 }
0x3d4d   :  { %v4275_v52 = vpop.xlane.xlu1 %4274 }
0x3d4e   :  { %v4277_v54 = vadd.f32 %v4275_v52, %v7802_v2  ;;  %4281 = vperm.xlu0 %6901, %v4276_v57  }
0x3d50   :  { %4284 = vperm.xlu1 %6897, %v4277_v54  }
0x3dcd   :  { %v4282_v16 = vpop.permute.xlu0 %4281 }
0x3dce   :  { %v4289_v8 = vrot.slane %v4282_v16, %v7810_v24 }
0x3dcf   :  { %v4285_v62 = vpop.permute.xlu1 %4284 }
0x3dd0   :  { %v4293_v27 = vrot.slane %v4285_v62, %v7810_v24 }
0x3dd2   :  { %v4294_v4 = vsel %vm2159_vm11, %v4293_v27, %v4289_v8 }
0x3dd3   :  { %v4296_v26 = vsel %vm2162_vm12, %v4294_v4, -inf }
0x3dd4   :  { %4297 = vmax.xlane.f32.xlu1 %v4296_v26 }
0x3e61   :  { %v4298_v36 = vpop.xlane.xlu1 %4297 }
0x3e62   :  { %v4303_v38 = vrot.slane %v4298_v36, %v7722_v21  ;;  %v4307_v61 = vrot.slane %v4298_v36, %v7798_v63 }
0x3e64   :  { %v4310_v29 = vsub.f32 %v4276_v57, %v4303_v38  ;;  %v4311_v5 = vsub.f32 %v4277_v54, %v4307_v61 }
0x3e66   :  { %v4312_v15 = vmul.f32 1.442695, %v4310_v29  ;;  %v4314_v9 = vmul.f32 1.442695, %v4311_v5 }
0x3e68   :  { %7048 = vpow2.f32 %v4312_v15 }
0x3e69   :  { %7050 = vpow2.f32 %v4314_v9 }
0x3e72   :  { %v7049_v17 = vpop.eup %7048 }
0x3e73   :  { %4319 = vperm.xlu0 %6901, %v7049_v17   ;;  %v7051_v42 = vpop.eup %7050 }
0x3e77   :  { %4322 = vperm.xlu0 %6901, %v7051_v42  }
0x3e7b   :  { %6902 = vset.pattern.permute.xlu0 %v7205_v23 }
0x3e7c   :  { %4472 = vperm.xlu0 %6902, %v8030_v12  }
0x3e80   :  { %6903 = vset.pattern.permute.xlu0 %v7194_v0 }
0x3ef2   :  { %v4320_v39 = vpop.permute.xlu0 %4319 }
0x3ef3   :  { %v4327_v43 = vrot.slane %v4320_v39, %v7810_v24 }
0x3ef6   :  { %v4323_v40 = vpop.permute.xlu0 %4322 }
0x3ef7   :  { %v4331_v44 = vrot.slane %v4323_v40, %v7810_v24 }
0x3ef9   :  { %v4332_v32 = vsel %vm2159_vm11, %v4331_v44, %v4327_v43 }
0x3efa   :  { %v4334_v47 = vsel %vm2162_vm12, %v4332_v32, 0.0 }
0x3efb   :  { %4335 = vadd.xlane.f32.xlu1 %v4334_v47  ;;  %v4473_v58 = vpop.permute.xlu0 %4472 }
0x3efc   :  { %vm4474_vm13 = vcmp.eq.s32.totalorder %v4473_v58, %v7359_v20 }
0x3efd   :  { %v5677_v23 = vsel %vm4474_vm13, 1.0, %v7197_v6 }
0x3efe   :  { %6434 = vmatmul.mubr.msk.f32.vlgmr.msra.gmra.mrb[34].mxu0 %vm113_vm1, %v5677_v23 }
0x3eff   :  { %6818 = vmatpush3.bf16.msra.mxu0 %v7843_v59  ;;  %6471 = vmatprep.mubr.msk.f32.mxu0 %vm7196_vm0, %v7197_v6 }
0x3f00   :  { %6819 = vmatprep.subr.bf16.mxu0 %v7195_v1 }
0x3f03   :  { %6821 = vmatpush3.bf16.msra.mxu0 %v7849_v10 }
0x3f04   :  { %6822 = vmatprep.subr.bf16.mxu0 %v7195_v1 }
0x3f07   :  { %6824 = vmatpush3.bf16.msra.mxu0 %v7861_v28 }
0x3f08   :  { %6825 = vmatprep.subr.bf16.mxu0 %v7195_v1 }
0x3f0b   :  { %6827 = vmatpush3.bf16.msra.mxu0 %v7873_v53 }
0x3f0c   :  { %6831 = vmatprep.subr.bf16.mxu0 %v7195_v1 }
0x3f88   :  { %v4336_v12 = vpop.xlane.xlu1 %4335 }
0x3f89   :  { %7052 = vrcp.f32 %v4336_v12 }
0x3f93   :  { %v7053_v48 = vpop.eup %7052 }
0x3f94   :  { %v4346_v56 = vrot.slane %v7053_v48, %v7798_v63  ;;  %v4342_v37 = vrot.slane %v7053_v48, %v7722_v21 }
0x3f96   :  { %v4350_v49 = vmul.f32 %v7051_v42, %v4346_v56  ;;  %v4349_v41 = vmul.f32 %v7049_v17, %v4342_v37 }
0x3f98   :  { %4358 = vperm.xlu1 %6897, %v4350_v49   ;;  %4353 = vperm.xlu0 %6903, %v4349_v41  }
0x3f9c   :  { %4377 = vrot.lane.b32.xlu0 %v8266_v18, %s7200_s19 }
0x3fd1   :  { %v4546_v36 = vpop.f32.mrb[34].mxu0 }
0x3fd2   :  { %v6435_v29 = vpop.f32.mrb[35].mxu0 }
0x4017   :  { %v4359_v51 = vpop.permute.xlu1 %4358  ;;  %v4354_v57 = vpop.permute.xlu0 %4353 }
0x4018   :  { %v4362_v52 = vmul.f32 %v4359_v51, %v7789_v30  ;;  %v4361_v54 = vmul.f32 %v4354_v57, %v7783_v46 }
0x401a   :  { %v4370_v16 = vsel %vm2230_vm14, %v4362_v52, 0.0  ;;  %v4363_v62 = vsel %vm2230_vm14, %v4361_v54, 0.0 }
0x401b   :  { %v4371_v8 = vrot.slane %v4370_v16, 4  ;;  %v4364_v27 = vrot.slane %v4363_v62, 4  ;;  %v4378_v43 = vpop.permute.xlu0 %4377 }
0x401d   :  { %v4372_v4 = vadd.f32 %v4371_v8, %v4370_v16  ;;  %v4365_v26 = vadd.f32 %v4364_v27, %v4363_v62 }
0x401f   :  { %v4373_v38 = vrot.slane %v4372_v4, 2  ;;  %v4366_v61 = vrot.slane %v4365_v26, 2 }
0x4021   :  { %v4374_v5 = vadd.f32 %v4373_v38, %v4372_v4  ;;  %v4367_v15 = vadd.f32 %v4366_v61, %v4365_v26 }
0x4023   :  { %v4375_v9 = vrot.slane %v4374_v5, 1  ;;  %v4368_v17 = vrot.slane %v4367_v15, 1 }
0x4025   :  { %v4376_v42 = vadd.f32 %v4375_v9, %v4374_v5  ;;  %v4369_v39 = vadd.f32 %v4368_v17, %v4367_v15 }
0x4027   :  { %v4382_v40 = vsel %vm2159_vm11, %v4376_v42, %v4369_v39 }
0x4028   :  { %4383 = vrot.lane.b32.xlu0 %v4382_v40, %s7199_s5 }
0x402c   :  { %4550 = vrot.lane.b32.xlu0 %v8266_v18, %s7199_s5 }
0x409a   :  { %v4384_v44 = vpop.permute.xlu0 %4383 }
0x409b   :  { %v4386_v32 = vsel %vm187_vm3, %v4378_v43, %v4384_v44 }
0x409c   :  { %6427 = vmatmul.mubr.msk.f32.vlgmr.msra.gmra.mrb[32].mxu1 %vm195_vm4, %v4386_v32 }
0x409d   :  { %6806 = vmatpush3.bf16.msra.mxu1 %v7663_v13  ;;  %6452 = vmatprep.mubr.msk.f32.mxu1 %vm7196_vm0, %v7197_v6 }
0x409e   :  { %6807 = vmatprep.subr.bf16.mxu1 %v7195_v1  ;;  %v4551_v18 = vpop.permute.xlu0 %4550 }
0x409f   :  { %v4553_v47 = vsel %vm187_vm3, %v4546_v36, %v4551_v18 }
0x40a1   :  { %6809 = vmatpush3.bf16.msra.mxu1 %v7667_v14 }
0x40a2   :  { %6810 = vmatprep.subr.bf16.mxu1 %v7195_v1 }
0x40a5   :  { %6812 = vmatpush3.bf16.msra.mxu1 %v7671_v22 }
0x40a6   :  { %6813 = vmatprep.subr.bf16.mxu1 %v7195_v1 }
0x40a9   :  { %6815 = vmatpush3.bf16.msra.mxu1 %v7675_v25 }
0x40aa   :  { %6828 = vmatprep.subr.bf16.mxu1 %v7195_v1 }
0x40ac   :  { %6453 = vmatmul.mubr.msk.f32.vlgmr.msra.gmra.mrb[34].mxu1 %vm195_vm4, %v4553_v47 }
0x40ad   :  { %6830 = vmatpush3.bf16.msra.mxu1 %v7654_v55  ;;  %6478 = vmatprep.mubr.msk.f32.mxu1 %vm7196_vm0, %v7197_v6 }
0x40ae   :  { %6843 = vmatprep.subr.bf16.mxu1 %v7195_v1 }
0x416f   :  { %v8338_v58 = vpop.f32.mrb[32].mxu1 }
0x4170   :  { %v6428_v23 = vpop.f32.mrb[33].mxu1 }
0x417f   :  { %v4623_v12 = vpop.f32.mrb[34].mxu1 }
0x4180   :  { %v4624_v48 = vadd.f32 %v8086_v35, %v4623_v12  ;;  %v6454_v56 = vpop.f32.mrb[35].mxu1 }
0x4182   :  { %v5680_v37 = vmul.f32 -1.442695, %v4624_v48 }
0x4184   :  { %7054 = vpow2.f32 %v5680_v37 }
0x4185   :  { %7056 = vtanh.f32 %v4624_v48 }
0x418e   :  { %v7055_v49 = vpop.eup %7054 }
0x418f   :  { %v4631_v41 = vadd.f32 1.0, %v7055_v49  ;;  %v7057_v51 = vpop.eup %7056 }
0x4191   :  { %7058 = vrcp.f32 %v4631_v41 }
0x419b   :  { %v7059_v55 = vpop.eup %7058 }
0x419c   :  { %v4634_v57 = vsel %vm7384_vm7, %v7057_v51, %v7059_v55 }
0x419d   :  { %4637 = vrot.lane.b32.xlu0 %v4634_v57, %s7199_s5  ;;  %v4635_v35 = vmul.f32 %v4634_v57, %v8262_v50 }
0x420f   :  { %v4638_v52 = vpop.permute.xlu0 %4637 }
0x4210   :  { %v4640_v54 = vmul.f32 %v4638_v52, %v4634_v57 }
0x4212   :  { %4642 = vrot.lane.b32.xlu1 %v4640_v54, %s7200_s19 }
0x4284   :  { %v4643_v16 = vpop.permute.xlu1 %4642 }
0x4285   :  { %v8346_v62 = vadd.f32 %v4643_v16, %v4635_v35  ;;  %v7116_v16 = vld [vmem:[%s8567_s1] sm:$0x3] }
0x4287   :  { %7060 = vtanh.f32 %v8346_v62 }
0x4291   :  { %v7061_v8 = vpop.eup %7060 }
0x4292   :  { %4648 = vrot.lane.b32.xlu0 %v7061_v8, %s7199_s5 }
0x4304   :  { %v4649_v27 = vpop.permute.xlu0 %4648 }
0x4305   :  { %v8350_v4 = vmul.f32 %v4649_v27, %v4634_v57 }
0x4307   :  { %v4659_v26 = vrot.slane %v8350_v4, %v7713_v11 }
0x4309   :  { %v4660_v36 = vcombine.high %v4659_v26, %v4659_v26  ;;  %v4667_v38 = vrot.slane %v4659_v26, %v7713_v11 }
0x430b   :  { %v4674_v61 = vrot.slane %v4660_v36, %v7713_v11  ;;  %v4678_v50 = vrot.slane %v4667_v38, %v7722_v21 }
0x430d   :  { %v4685_v29 = vmul.f32 %v4678_v50, %v7783_v46  ;;  %v4682_v5 = vrot.slane %v4674_v61, %v7722_v21 }
0x430f   :  { %4689 = vrot.lane.b32.xlu1 %v4685_v29, %s7200_s19  ;;  %v4686_v15 = vmul.f32 %v4682_v5, %v7789_v30 }
0x4311   :  { %4691 = vrot.lane.b32.xlu0 %v4686_v15, %s7200_s19 }
0x4381   :  { %v4690_v9 = vpop.permute.xlu1 %4689 }
0x4382   :  { %v4695_v17 = vsel %vm187_vm3, %v4690_v9, 0.0 }
0x4383   :  { %4696 = vadd.xlane.f32.xlu1 %v4695_v17  ;;  %v4692_v42 = vpop.permute.xlu0 %4691 }
0x4384   :  { %v4698_v39 = vsel %vm187_vm3, %v4692_v42, 0.0 }
0x4385   :  { %4699 = vadd.xlane.f32.xlu0 %v4698_v39 }
0x4410   :  { %v4697_v40 = vpop.xlane.xlu1 %4696 }
0x4411   :  { %v4701_v43 = vadd.f32 %v4697_v40, %v7805_v19 }
0x4412   :  { %v4700_v44 = vpop.xlane.xlu0 %4699 }
0x4413   :  { %v4702_v32 = vadd.f32 %v4700_v44, %v7802_v2  ;;  %4706 = vperm.xlu0 %6903, %v4701_v43  }
0x4415   :  { %4709 = vperm.xlu1 %6897, %v4702_v32  }
0x4492   :  { %v4707_v18 = vpop.permute.xlu0 %4706 }
0x4493   :  { %v4714_v23 = vrot.slane %v4707_v18, %v7810_v24 }
0x4494   :  { %v4710_v47 = vpop.permute.xlu1 %4709 }
0x4495   :  { %v4718_v12 = vrot.slane %v4710_v47, %v7810_v24 }
0x4497   :  { %v4719_v48 = vsel %vm2159_vm11, %v4718_v12, %v4714_v23 }
0x4498   :  { %v4721_v56 = vsel %vm2162_vm12, %v4719_v48, -inf }
0x4499   :  { %4722 = vmax.xlane.f32.xlu1 %v4721_v56 }
0x4526   :  { %v4723_v37 = vpop.xlane.xlu1 %4722 }
0x4527   :  { %v4728_v49 = vrot.slane %v4723_v37, %v7722_v21  ;;  %v4732_v41 = vrot.slane %v4723_v37, %v7798_v63 }
0x4529   :  { %v4735_v51 = vsub.f32 %v4701_v43, %v4728_v49  ;;  %v4736_v55 = vsub.f32 %v4702_v32, %v4732_v41 }
0x452b   :  { %v4737_v57 = vmul.f32 1.442695, %v4735_v51  ;;  %v4739_v52 = vmul.f32 1.442695, %v4736_v55 }
0x452d   :  { %7062 = vpow2.f32 %v4737_v57 }
0x452e   :  { %7064 = vpow2.f32 %v4739_v52 }
0x4537   :  { %v7063_v54 = vpop.eup %7062 }
0x4538   :  { %4744 = vperm.xlu0 %6903, %v7063_v54   ;;  %v7065_v35 = vpop.eup %7064 }
0x453c   :  { %4747 = vperm.xlu0 %6903, %v7065_v35  }
0x4540   :  { %6904 = vset.pattern.permute.xlu0 %v7206_v60 }
0x4541   :  { %4897 = vperm.xlu0 %6904, %v7116_v16  }
0x4545   :  { %6905 = vset.pattern.permute.xlu0 %v7194_v0 }
0x45b7   :  { %v4745_v8 = vpop.permute.xlu0 %4744 }
0x45b8   :  { %v4752_v26 = vrot.slane %v4745_v8, %v7810_v24 }
0x45bb   :  { %v4748_v27 = vpop.permute.xlu0 %4747 }
0x45bc   :  { %v4756_v36 = vrot.slane %v4748_v27, %v7810_v24 }
0x45be   :  { %v4757_v38 = vsel %vm2159_vm11, %v4756_v36, %v4752_v26 }
0x45bf   :  { %v4759_v61 = vsel %vm2162_vm12, %v4757_v38, 0.0 }
0x45c0   :  { %4760 = vadd.xlane.f32.xlu0 %v4759_v61  ;;  %v4898_v50 = vpop.permute.xlu0 %4897 }
0x45c1   :  { %vm4899_vm13 = vcmp.eq.s32.totalorder %v4898_v50, %v7359_v20 }
0x45c2   :  { %v5682_v60 = vsel %vm4899_vm13, 1.0, %v7197_v6 }
0x45c3   :  { %6479 = vmatmul.mubr.msk.f32.vlgmr.msra.gmra.mrb[36].mxu1 %vm113_vm1, %v5682_v60 }
0x45c4   :  { %6845 = vmatpush3.bf16.msra.mxu1 %v7843_v59  ;;  %6516 = vmatprep.mubr.msk.f32.mxu1 %vm7196_vm0, %v7197_v6 }
0x45c5   :  { %6846 = vmatprep.subr.bf16.mxu1 %v7195_v1 }
0x45c8   :  { %6848 = vmatpush3.bf16.msra.mxu1 %v7849_v10 }
0x45c9   :  { %6849 = vmatprep.subr.bf16.mxu1 %v7195_v1 }
0x45cc   :  { %6851 = vmatpush3.bf16.msra.mxu1 %v7861_v28 }
0x45cd   :  { %6852 = vmatprep.subr.bf16.mxu1 %v7195_v1 }
0x45d0   :  { %6854 = vmatpush3.bf16.msra.mxu1 %v7873_v53 }
0x464d   :  { %v4761_v0 = vpop.xlane.xlu0 %4760 }
0x464e   :  { %7066 = vrcp.f32 %v4761_v0 }
0x4658   :  { %v7067_v20 = vpop.eup %7066 }
0x4659   :  { %v4771_v59 = vrot.slane %v7067_v20, %v7798_v63  ;;  %v4767_v29 = vrot.slane %v7067_v20, %v7722_v21 }
0x465b   :  { %v4775_v5 = vmul.f32 %v7065_v35, %v4771_v59  ;;  %v4774_v15 = vmul.f32 %v7063_v54, %v4767_v29 }
0x465d   :  { %4783 = vperm.xlu0 %6905, %v4775_v5   ;;  %4778 = vperm.xlu1 %6897, %v4774_v15  }
0x4661   :  { %4802 = vrot.lane.b32.xlu1 %v8350_v4, %s7200_s19 }
0x4696   :  { %v4971_v10 = vpop.f32.mrb[36].mxu1 }
0x4697   :  { %v6480_v28 = vpop.f32.mrb[37].mxu1 }
0x46dc   :  { %v4784_v9 = vpop.permute.xlu0 %4783  ;;  %v4779_v17 = vpop.permute.xlu1 %4778 }
0x46dd   :  { %v4787_v53 = vmul.f32 %v4784_v9, %v7789_v30  ;;  %v4786_v42 = vmul.f32 %v4779_v17, %v7783_v46 }
0x46df   :  { %v4795_v39 = vsel %vm2230_vm14, %v4787_v53, 0.0  ;;  %v4788_v40 = vsel %vm2230_vm14, %v4786_v42, 0.0 }
0x46e0   :  { %v4796_v43 = vrot.slane %v4795_v39, 4  ;;  %v4789_v44 = vrot.slane %v4788_v40, 4  ;;  %v4803_v55 = vpop.permute.xlu1 %4802 }
0x46e2   :  { %v4797_v32 = vadd.f32 %v4796_v43, %v4795_v39  ;;  %v4790_v18 = vadd.f32 %v4789_v44, %v4788_v40 }
0x46e4   :  { %v4798_v47 = vrot.slane %v4797_v32, 2  ;;  %v4791_v23 = vrot.slane %v4790_v18, 2 }
0x46e6   :  { %v4799_v12 = vadd.f32 %v4798_v47, %v4797_v32  ;;  %v4792_v48 = vadd.f32 %v4791_v23, %v4790_v18 }
0x46e8   :  { %v4800_v56 = vrot.slane %v4799_v12, 1  ;;  %v4793_v37 = vrot.slane %v4792_v48, 1 }
0x46ea   :  { %v4801_v49 = vadd.f32 %v4800_v56, %v4799_v12  ;;  %v4794_v41 = vadd.f32 %v4793_v37, %v4792_v48 }
0x46ec   :  { %v4807_v51 = vsel %vm2159_vm11, %v4801_v49, %v4794_v41 }
0x46ed   :  { %4808 = vrot.lane.b32.xlu1 %v4807_v51, %s7199_s5 }
0x46f1   :  { %4975 = vrot.lane.b32.xlu1 %v8350_v4, %s7199_s5 }
0x475f   :  { %v4809_v57 = vpop.permute.xlu1 %4808 }
0x4760   :  { %v4811_v52 = vsel %vm187_vm3, %v4803_v55, %v4809_v57 }
0x4761   :  { %6472 = vmatmul.mubr.msk.f32.vlgmr.msra.gmra.mrb[36].mxu0 %vm195_vm4, %v4811_v52 }
0x4762   :  { %6833 = vmatpush3.bf16.msra.mxu0 %v7663_v13  ;;  %6497 = vmatprep.mubr.msk.f32.mxu0 %vm7196_vm0, %v7197_v6  ;;  %vm2334_vm0 = vcmask 123904  }
0x4763   :  { %6834 = vmatprep.subr.bf16.mxu0 %v7195_v1  ;;  %v4976_v4 = vpop.permute.xlu1 %4975 }
0x4764   :  { %v4978_v54 = vsel %vm187_vm3, %v4971_v10, %v4976_v4 }
0x4766   :  { %6836 = vmatpush3.bf16.msra.mxu0 %v7667_v14  ;;  %v7117_v14 = vld [vmem:[%s8573_s7] ss:$0 sm:$0xff] }
0x4767   :  { %6837 = vmatprep.subr.bf16.mxu0 %v7195_v1 }
0x476a   :  { %6839 = vmatpush3.bf16.msra.mxu0 %v7671_v22 }
0x476b   :  { %6840 = vmatprep.subr.bf16.mxu0 %v7195_v1 }
0x476e   :  { %6842 = vmatpush3.bf16.msra.mxu0 %v7675_v25 }
0x4771   :  { %6498 = vmatmul.mubr.msk.f32.vlgmr.msra.gmra.mrb[38].mxu0 %vm195_vm4, %v4978_v54 }
0x4834   :  { %v8418_v13 = vpop.f32.mrb[36].mxu0 }
0x4835   :  { %v6473_v6 = vpop.f32.mrb[37].mxu0 }
0x4844   :  { %v5048_v35 = vpop.f32.mrb[38].mxu0 }
0x4845   :  { %v5049_v16 = vadd.f32 %v7117_v14, %v5048_v35  ;;  %v6499_v8 = vpop.f32.mrb[39].mxu0 }
0x4847   :  { %v5685_v22 = vmul.f32 -1.442695, %v5049_v16 }
0x4849   :  { %7068 = vpow2.f32 %v5685_v22 }
0x484a   :  { %7070 = vtanh.f32 %v5049_v16 }
0x4853   :  { %v7069_v1 = vpop.eup %7068 }
0x4854   :  { %v5056_v27 = vadd.f32 1.0, %v7069_v1  ;;  %v7071_v25 = vpop.eup %7070 }
0x4856   :  { %7072 = vrcp.f32 %v5056_v27 }
0x4860   :  { %v7073_v26 = vpop.eup %7072 }
0x4861   :  { %v5059_v36 = vsel %vm7384_vm7, %v7071_v25, %v7073_v26 }
0x4862   :  { %5062 = vrot.lane.b32.xlu1 %v5059_v36, %s7199_s5  ;;  %v5060_v50 = vmul.f32 %v5059_v36, %v8346_v62 }
0x48d4   :  { %v5063_v38 = vpop.permute.xlu1 %5062 }
0x48d5   :  { %v5065_v61 = vmul.f32 %v5063_v38, %v5059_v36 }
0x48d7   :  { %5067 = vrot.lane.b32.xlu1 %v5065_v61, %s7200_s19 }
0x4949   :  { %v5068_v60 = vpop.permute.xlu1 %5067 }
0x494a   :  { %v5070_v0 = vadd.f32 %v5068_v60, %v5060_v50 }
0x494c   :  { %7074 = vtanh.f32 %v5070_v0 }
0x4956   :  { %v7075_v20 = vpop.eup %7074 }
0x4957   :  { %5073 = vrot.lane.b32.xlu1 %v7075_v20, %s7199_s5 }
0x49c9   :  { %v5074_v59 = vpop.permute.xlu1 %5073 }
0x49ca   :  { %v5076_v29 = vmul.f32 %v5074_v59, %v5059_v36 }
0x49cc   :  { %v5084_v5 = vrot.slane %v5076_v29, %v7713_v11 }
0x49ce   :  { %v5085_v34 = vcombine.high %v5084_v5, %v5084_v5  ;;  %v5092_v15 = vrot.slane %v5084_v5, %v7713_v11 }
0x49d0   :  { %v5099_v10 = vrot.slane %v5085_v34, %v7713_v11  ;;  %v5103_v28 = vrot.slane %v5092_v15, %v7722_v21 }
0x49d2   :  { %v5107_v9 = vrot.slane %v5099_v10, %v7722_v21  ;;  %v5110_v62 = vmul.f32 %v5103_v28, %v7783_v46 }
0x49d4   :  { %5114 = vrot.lane.b32.xlu1 %v5110_v62, %s7200_s19  ;;  %v5111_v17 = vmul.f32 %v5107_v9, %v7789_v30 }
0x49d8   :  { %5116 = vrot.lane.b32.xlu1 %v5111_v17, %s7200_s19 }
0x4a46   :  { %v5115_v53 = vpop.permute.xlu1 %5114 }
0x4a47   :  { %v5120_v42 = vsel %vm187_vm3, %v5115_v53, 0.0 }
0x4a48   :  { %5121 = vadd.xlane.f32.xlu1 %v5120_v42 }
0x4a4a   :  { %v5117_v39 = vpop.permute.xlu1 %5116 }
0x4a4b   :  { %v5123_v40 = vsel %vm187_vm3, %v5117_v39, 0.0 }
0x4a4c   :  { %5124 = vadd.xlane.f32.xlu0 %v5123_v40 }
0x4ad5   :  { %v5122_v43 = vpop.xlane.xlu1 %5121 }
0x4ad6   :  { %v5126_v44 = vadd.f32 %v5122_v43, %v7805_v19 }
0x4ad8   :  { %5131 = vperm.xlu1 %6897, %v5126_v44  }
0x4ad9   :  { %v5125_v32 = vpop.xlane.xlu0 %5124 }
0x4ada   :  { %v5127_v18 = vadd.f32 %v5125_v32, %v7802_v2 }
0x4adc   :  { %5134 = vperm.xlu0 %6905, %v5127_v18  }
0x4b57   :  { %v5132_v47 = vpop.permute.xlu1 %5131 }
0x4b58   :  { %v5139_v12 = vrot.slane %v5132_v47, %v7810_v24 }
0x4b5b   :  { %v5135_v23 = vpop.permute.xlu0 %5134 }
0x4b5c   :  { %v5143_v48 = vrot.slane %v5135_v23, %v7810_v24 }
0x4b5e   :  { %v5144_v56 = vsel %vm2159_vm11, %v5143_v48, %v5139_v12 }
0x4b5f   :  { %v5146_v37 = vsel %vm2162_vm12, %v5144_v56, -inf }
0x4b60   :  { %5147 = vmax.xlane.f32.xlu1 %v5146_v37 }
0x4bed   :  { %v5148_v49 = vpop.xlane.xlu1 %5147 }
0x4bee   :  { %v5153_v41 = vrot.slane %v5148_v49, %v7722_v21  ;;  %v5157_v19 = vrot.slane %v5148_v49, %v7798_v63 }
0x4bf0   :  { %v5160_v51 = vsub.f32 %v5126_v44, %v5153_v41  ;;  %v5161_v55 = vsub.f32 %v5127_v18, %v5157_v19 }
0x4bf2   :  { %v5162_v2 = vmul.f32 1.442695, %v5160_v51  ;;  %v5164_v57 = vmul.f32 1.442695, %v5161_v55 }
0x4bf4   :  { %7076 = vpow2.f32 %v5162_v2 }
0x4bf5   :  { %7078 = vpow2.f32 %v5164_v57 }
0x4bfe   :  { %v7077_v52 = vpop.eup %7076 }
0x4bff   :  { %5169 = vperm.xlu0 %6905, %v7077_v52   ;;  %v7079_v4 = vpop.eup %7078 }
0x4c03   :  { %5172 = vperm.xlu0 %6905, %v7079_v4  }
0x4c7e   :  { %v5170_v54 = vpop.permute.xlu0 %5169 }
0x4c7f   :  { %v5177_v35 = vrot.slane %v5170_v54, %v7810_v24 }
0x4c82   :  { %v5173_v6 = vpop.permute.xlu0 %5172 }
0x4c83   :  { %v5181_v14 = vrot.slane %v5173_v6, %v7810_v24 }
0x4c85   :  { %v5182_v16 = vsel %vm2159_vm11, %v5181_v14, %v5177_v35 }
0x4c86   :  { %v5184_v8 = vsel %vm2162_vm12, %v5182_v16, 0.0 }
0x4c87   :  { %5185 = vadd.xlane.f32.xlu0 %v5184_v8 }
0x4d14   :  { %v5186_v22 = vpop.xlane.xlu0 %5185 }
0x4d15   :  { %7080 = vrcp.f32 %v5186_v22 }
0x4d1f   :  { %v7081_v1 = vpop.eup %7080 }
0x4d20   :  { %v5196_v27 = vrot.slane %v7081_v1, %v7798_v63  ;;  %v5192_v25 = vrot.slane %v7081_v1, %v7722_v21 }
0x4d22   :  { %v5200_v26 = vmul.f32 %v7079_v4, %v5196_v27  ;;  %v5199_v36 = vmul.f32 %v7077_v52, %v5192_v25 }
0x4d24   :  { %5208 = vperm.xlu0 %6905, %v5200_v26   ;;  %5203 = vperm.xlu1 %6897, %v5199_v36  }
0x4d28   :  { %5227 = vrot.lane.b32.xlu1 %v5076_v29, %s7200_s19 }
0x4da3   :  { %v5209_v38 = vpop.permute.xlu0 %5208  ;;  %v5204_v24 = vpop.permute.xlu1 %5203 }
0x4da4   :  { %v5212_v61 = vmul.f32 %v5209_v38, %v7789_v30  ;;  %v5211_v50 = vmul.f32 %v5204_v24, %v7783_v46  ;;  %v5650_v46 = vld [vmem:[%s8575_s9] ss:$0 sm:$0xff]  ;;  %s7208_s9 = smov [#allocation7]  }
0x4da5   :  { %v2331_v53 = vadd.f32 %v5650_v46, %v7908_v7  ;;  %v2757_v42 = vadd.f32 %v5650_v46, %v7992_v33  ;;  %v3182_v56 = vadd.f32 %v5650_v46, %v8081_v31  ;;  %v3607_v41 = vadd.f32 %v5650_v46, %v8170_v3 }
0x4da6   :  { %v5220_v60 = vsel %vm2230_vm14, %v5212_v61, 0.0  ;;  %v5213_v0 = vsel %vm2230_vm14, %v5211_v50, 0.0  ;;  %v4032_v55 = vadd.f32 %v5650_v46, %v8254_v45  ;;  %v4457_v31 = vadd.f32 %v5650_v46, %v8338_v58 }
0x4da7   :  { %v5221_v20 = vrot.slane %v5220_v60, 4  ;;  %v5214_v63 = vrot.slane %v5213_v0, 4  ;;  %v2335_v39 = vsel %vm2334_vm0, %v2331_v53, -inf  ;;  %v2760_v40 = vsel %vm2334_vm0, %v2757_v42, -inf  ;;  %v5228_v43 = vpop.permute.xlu1 %5227 }
0x4da8   :  { %v3185_v19 = vsel %vm2334_vm0, %v3182_v56, -inf  ;;  %v3610_v2 = vsel %vm2334_vm0, %v3607_v41, -inf  ;;  %v4035_v57 = vsel %vm2334_vm0, %v4032_v55, -inf  ;;  %v4882_v52 = vadd.f32 %v5650_v46, %v8418_v13 }
0x4da9   :  { %v5222_v59 = vadd.f32 %v5221_v20, %v5220_v60  ;;  %v5215_v5 = vadd.f32 %v5214_v63, %v5213_v0  ;;  %v4460_v3 = vsel %vm2334_vm0, %v4457_v31, -inf }
0x4daa   :  { %v4885_v4 = vsel %vm2334_vm0, %v4882_v52, -inf }
0x4dab   :  { %v5223_v34 = vrot.slane %v5222_v59, 2  ;;  %v5216_v15 = vrot.slane %v5215_v5, 2 }
0x4dad   :  { %v5224_v10 = vadd.f32 %v5223_v34, %v5222_v59  ;;  %v5217_v28 = vadd.f32 %v5216_v15, %v5215_v5 }
0x4daf   :  { %v5225_v9 = vrot.slane %v5224_v10, 1  ;;  %v5218_v29 = vrot.slane %v5217_v28, 1 }
0x4db1   :  { %v5226_v62 = vadd.f32 %v5225_v9, %v5224_v10  ;;  %v5219_v17 = vadd.f32 %v5218_v29, %v5217_v28 }
0x4db3   :  { %v5232_v30 = vsel %vm2159_vm11, %v5226_v62, %v5219_v17 }
0x4db4   :  { %5233 = vrot.lane.b32.xlu1 %v5232_v30, %s7199_s5  ;;  %s5598_s5 = sshll.u32 %s7208_s9, 4  ;;  %s5599_s5 = int_to_ptr.vmem [resolvable:$true] %s5598_s5 }
0x4db5   :  { %s7162_s0 = scalar_lea.vmem %s5599_s5, 256  ;;  %p7167_p3 = scmp.lt.s32.totalorder %s5599_s5, %s5599_s5 }
0x4db6   :  { %p7163_p2 = scmp.ne.s32.totalorder %s5599_s5, %s7162_s0  ;;  %p7168_p4 = scmp.lt.s32.totalorder %s7162_s0, %s7162_s0 }
0x4db8   :  { %p7169_p5 = por %p7168_p4, %p7167_p3 }
0x4dba   :  { %p7170_p6 = pnand %p7169_p5, %p7163_p2 }
0x4dd8   :  { %2336 = vmax.xlane.f32.xlu1 %v2335_v39 }
0x4ddc   :  { %2761 = vmax.xlane.f32.xlu1 %v2760_v40 }
0x4e26   :  { %v5234_v44 = vpop.permute.xlu1 %5233 }
0x4e27   :  { %v5236_v32 = vsel %vm187_vm3, %v5228_v43, %v5234_v44 }
0x4e28   :  { %6517 = vmatmul.mubr.msk.f32.vlgmr.msra.gmra.mrb[38].mxu1 %vm195_vm4, %v5236_v32 }
0x4e65   :  { %v2337_v18 = vpop.xlane.xlu1 %2336 }
0x4e66   :  { %v2338_v47 = vsub.f32 %v2331_v53, %v2337_v18 }
0x4e68   :  { %v2339_v23 = vmul.f32 1.442695, %v2338_v47 }
0x4e69   :  { %v2762_v12 = vpop.xlane.xlu1 %2761 }
0x4e6a   :  { %7082 = vpow2.f32 %v2339_v23  ;;  %v2763_v7 = vsub.f32 %v2757_v42, %v2762_v12 }
0x4e6c   :  { %v2764_v48 = vmul.f32 1.442695, %v2763_v7 }
0x4e6e   :  { %7084 = vpow2.f32 %v2764_v48 }
0x4e74   :  { %v8470_v33 = vpop.eup %7082 }
0x4e75   :  { %v2341_v37 = vsel %vm2334_vm0, %v8470_v33, 0.0 }
0x4e76   :  { %2342 = vadd.xlane.f32.xlu0 %v2341_v37 }
0x4e78   :  { %v8475_v49 = vpop.eup %7084 }
0x4e79   :  { %v2766_v51 = vsel %vm2334_vm0, %v8475_v49, 0.0 }
0x4e7a   :  { %3186 = vmax.xlane.f32.xlu0 %v3185_v19  ;;  %2767 = vadd.xlane.f32.xlu1 %v2766_v51 }
0x4e7e   :  { %3611 = vmax.xlane.f32.xlu0 %v3610_v2 }
0x4e82   :  { %4036 = vmax.xlane.f32.xlu0 %v4035_v57 }
0x4e86   :  { %4461 = vmax.xlane.f32.xlu0 %v4460_v3 }
0x4e8a   :  { %4886 = vmax.xlane.f32.xlu0 %v4885_v4 }
0x4efb   :  { %v5306_v54 = vpop.f32.mrb[38].mxu1 }
0x4efc   :  { %v5307_v6 = vadd.f32 %v5650_v46, %v5306_v54  ;;  %v6518_v35 = vpop.f32.mrb[39].mxu1 }
0x4efe   :  { %v5310_v45 = vsel %vm2334_vm0, %v5307_v6, -inf }
0x4eff   :  { %5311 = vmax.xlane.f32.xlu0 %v5310_v45 }
0x4f03   :  { %v2343_v14 = vpop.xlane.xlu0 %2342 }
0x4f07   :  { %v3187_v16 = vpop.xlane.xlu0 %3186  ;;  %v2768_v53 = vpop.xlane.xlu1 %2767 }
0x4f08   :  { %v3188_v58 = vsub.f32 %v3182_v56, %v3187_v16 }
0x4f0a   :  { %v3189_v8 = vmul.f32 1.442695, %v3188_v58 }
0x4f0b   :  { %v3612_v22 = vpop.xlane.xlu0 %3611 }
0x4f0c   :  { %7086 = vpow2.f32 %v3189_v8  ;;  %v3613_v1 = vsub.f32 %v3607_v41, %v3612_v22 }
0x4f0e   :  { %v3614_v13 = vmul.f32 1.442695, %v3613_v1 }
0x4f0f   :  { %v4037_v27 = vpop.xlane.xlu0 %4036 }
0x4f10   :  { %7088 = vpow2.f32 %v3614_v13  ;;  %v4038_v25 = vsub.f32 %v4032_v55, %v4037_v27 }
0x4f12   :  { %v4039_v26 = vmul.f32 1.442695, %v4038_v25 }
0x4f13   :  { %v4462_v36 = vpop.xlane.xlu0 %4461 }
0x4f14   :  { %7090 = vpow2.f32 %v4039_v26  ;;  %v4463_v38 = vsub.f32 %v4457_v31, %v4462_v36 }
0x4f16   :  { %v7087_v24 = vpop.eup %7086  ;;  %v4464_v61 = vmul.f32 1.442695, %v4463_v38 }
0x4f17   :  { %v4887_v50 = vpop.xlane.xlu0 %4886  ;;  %v3191_v60 = vsel %vm2334_vm0, %v7087_v24, 0.0 }
0x4f18   :  { %7092 = vpow2.f32 %v4464_v61  ;;  %v4888_v0 = vsub.f32 %v4882_v52, %v4887_v50  ;;  %3192 = vadd.xlane.f32.xlu1 %v3191_v60 }
0x4f1a   :  { %v7089_v20 = vpop.eup %7088  ;;  %v4889_v63 = vmul.f32 1.442695, %v4888_v0 }
0x4f1b   :  { %v3616_v59 = vsel %vm2334_vm0, %v7089_v20, 0.0 }
0x4f1c   :  { %7094 = vpow2.f32 %v4889_v63  ;;  %3617 = vadd.xlane.f32.xlu1 %v3616_v59 }
0x4f1e   :  { %v7091_v5 = vpop.eup %7090 }
0x4f1f   :  { %v4041_v34 = vsel %vm2334_vm0, %v7091_v5, 0.0 }
0x4f20   :  { %4042 = vadd.xlane.f32.xlu1 %v4041_v34 }
0x4f22   :  { %v7093_v15 = vpop.eup %7092 }
0x4f23   :  { %v4466_v10 = vsel %vm2334_vm0, %v7093_v15, 0.0 }
0x4f24   :  { %4467 = vadd.xlane.f32.xlu1 %v4466_v10 }
0x4f26   :  { %v7095_v28 = vpop.eup %7094 }
0x4f27   :  { %v4891_v9 = vsel %vm2334_vm0, %v7095_v28, 0.0 }
0x4f28   :  { %4892 = vadd.xlane.f32.xlu1 %v4891_v9 }
0x4f8c   :  { %v5312_v29 = vpop.xlane.xlu0 %5311 }
0x4f8d   :  { %v5313_v62 = vsub.f32 %v5307_v6, %v5312_v29 }
0x4f8f   :  { %v5314_v17 = vmul.f32 1.442695, %v5313_v62 }
0x4f91   :  { %7096 = vpow2.f32 %v5314_v17 }
0x4f92   :  { %7098 = vrcp.f32 %v2768_v53 }
0x4f93   :  { %7100 = vrcp.f32 %v2343_v14 }
0x4f9b   :  { %v7097_v30 = vpop.eup %7096 }
0x4f9c   :  { %v5316_v46 = vsel %vm2334_vm0, %v7097_v30, 0.0  ;;  %v7099_v32 = vpop.eup %7098 }
0x4f9d   :  { %5317 = vadd.xlane.f32.xlu1 %v5316_v46  ;;  %v7101_v18 = vpop.eup %7100  ;;  %v2770_v12 = vmul.f32 %v7099_v32, %v8475_v49 }
0x4f9e   :  { %v2345_v31 = vmul.f32 %v7101_v18, %v8470_v33 }
0x4f9f   :  { %v5353_v19 = vrot.slane %v2770_v12, %v7713_v11 }
0x4fa0   :  { %v5328_v6 = vrot.slane %v2345_v31, %v7713_v11 }
0x4fa1   :  { %v5354_v4 = vcombine.high %v5353_v19, %v5353_v19  ;;  %v5361_v14 = vrot.slane %v5353_v19, %v7713_v11 }
0x4fa2   :  { %v5329_v13 = vcombine.high %v5328_v6, %v5328_v6  ;;  %v5336_v63 = vrot.slane %v5328_v6, %v7713_v11 }
0x4fa3   :  { %v5368_v33 = vrot.slane %v5354_v4, %v7713_v11  ;;  %v5510_v36 = vrot.slane %v5361_v14, %v7722_v21 }
0x4fa5   :  { %v3193_v42 = vpop.xlane.xlu1 %3192  ;;  %v5514_v50 = vrot.slane %v5368_v33, %v7722_v21  ;;  %v5577_v46 = vsel %vm1867_vm15, %v5336_v63, %v5510_v36 }
0x4fa6   :  { %7102 = vrcp.f32 %v3193_v42 }
0x4fa9   :  { %v3618_v39 = vpop.xlane.xlu1 %3617 }
0x4faa   :  { %7104 = vrcp.f32 %v3618_v39 }
0x4fad   :  { %v4043_v40 = vpop.xlane.xlu1 %4042 }
0x4fae   :  { %7106 = vrcp.f32 %v4043_v40 }
0x4fb0   :  { %v7103_v47 = vpop.eup %7102 }
0x4fb1   :  { %v4468_v43 = vpop.xlane.xlu1 %4467  ;;  %v3195_v56 = vmul.f32 %v7103_v47, %v7087_v24 }
0x4fb2   :  { %7108 = vrcp.f32 %v4468_v43 }
0x4fb3   :  { %v5376_v57 = vrot.slane %v3195_v56, %v7713_v11 }
0x4fb4   :  { %v7105_v23 = vpop.eup %7104 }
0x4fb5   :  { %v4893_v44 = vpop.xlane.xlu1 %4892  ;;  %v3620_v41 = vmul.f32 %v7105_v23, %v7089_v20  ;;  %v5377_v35 = vcombine.high %v5376_v57, %v5376_v57  ;;  %v5384_v58 = vrot.slane %v5376_v57, %v7713_v11 }
0x4fb6   :  { %7110 = vrcp.f32 %v4893_v44 }
0x4fb7   :  { %v5399_v3 = vrot.slane %v3620_v41, %v7713_v11  ;;  %v5391_v27 = vrot.slane %v5377_v35, %v7713_v11  ;;  %v5520_v60 = vrot.slane %v5384_v58, %v7722_v21 }
0x4fb8   :  { %v7107_v7 = vpop.eup %7106 }
0x4fb9   :  { %v4045_v51 = vmul.f32 %v7107_v7, %v7091_v5  ;;  %v5400_v16 = vcombine.high %v5399_v3, %v5399_v3  ;;  %v5407_v22 = vrot.slane %v5399_v3, %v7713_v11  ;;  %v5524_v10 = vrot.slane %v5391_v27, %v7722_v21 }
0x4fba   :  { %v5579_v39 = vsel %vm1870_vm2, %v5577_v46, %v5520_v60 }
0x4fbb   :  { %v5422_v49 = vrot.slane %v4045_v51, %v7713_v11  ;;  %v5414_v38 = vrot.slane %v5400_v16, %v7713_v11  ;;  %v5530_v59 = vrot.slane %v5407_v22, %v7722_v21 }
0x4fbc   :  { %v7109_v48 = vpop.eup %7108 }
0x4fbd   :  { %v4470_v55 = vmul.f32 %v7109_v48, %v7093_v15  ;;  %v5423_v8 = vcombine.high %v5422_v49, %v5422_v49  ;;  %v5430_v25 = vrot.slane %v5422_v49, %v7713_v11  ;;  %v5343_v15 = vrot.slane %v5329_v13, %v7713_v11 }
0x4fbe   :  { %v5534_v62 = vrot.slane %v5414_v38, %v7722_v21  ;;  %v5581_v32 = vsel %vm1873_vm5, %v5579_v39, %v5530_v59 }
0x4fbf   :  { %v5445_v54 = vrot.slane %v4470_v55, %v7713_v11  ;;  %v5437_v0 = vrot.slane %v5423_v8, %v7713_v11  ;;  %v5540_v9 = vrot.slane %v5430_v25, %v7722_v21  ;;  %v5578_v42 = vsel %vm1867_vm15, %v5343_v15, %v5514_v50 }
0x4fc0   :  { %v7111_v37 = vpop.eup %7110  ;;  %v5580_v47 = vsel %vm1870_vm2, %v5578_v42, %v5524_v10 }
0x4fc1   :  { %v4895_v52 = vmul.f32 %v7111_v37, %v7095_v28  ;;  %v5446_v1 = vcombine.high %v5445_v54, %v5445_v54  ;;  %v5453_v24 = vrot.slane %v5445_v54, %v7713_v11  ;;  %v5583_v23 = vsel %vm1876_vm6, %v5581_v32, %v5540_v9 }
0x4fc2   :  { %v5582_v48 = vsel %vm1873_vm5, %v5580_v47, %v5534_v62 }
0x4fc3   :  { %v5468_v45 = vrot.slane %v4895_v52, %v7713_v11  ;;  %v5460_v34 = vrot.slane %v5446_v1, %v7713_v11  ;;  %v5550_v17 = vrot.slane %v5453_v24, %v7722_v21 }
0x4fc5   :  { %v5469_v26 = vcombine.high %v5468_v45, %v5468_v45  ;;  %v5476_v20 = vrot.slane %v5468_v45, %v7713_v11  ;;  %v5554_v44 = vrot.slane %v5460_v34, %v7722_v21  ;;  %v5585_v56 = vsel %vm1879_vm8, %v5583_v23, %v5550_v17 }
0x4fc7   :  { %v5483_v28 = vrot.slane %v5469_v26, %v7713_v11  ;;  %v5560_v53 = vrot.slane %v5476_v20, %v7722_v21 }
0x4fc9   :  { %v5564_v18 = vrot.slane %v5483_v28, %v7722_v21  ;;  %v5587_v41 = vsel %vm1882_vm9, %v5585_v56, %v5560_v53 }
0x502a   :  { %v5318_v2 = vpop.xlane.xlu1 %5317 }
0x502b   :  { %7112 = vrcp.f32 %v5318_v2 }
0x5035   :  { %v7113_v61 = vpop.eup %7112 }
0x5036   :  { %v5320_v5 = vmul.f32 %v7113_v61, %v7097_v30  ;;  %v5544_v30 = vrot.slane %v5437_v0, %v7722_v21 }
0x5038   :  { %v5491_v29 = vrot.slane %v5320_v5, %v7713_v11  ;;  %v5584_v37 = vsel %vm1876_vm6, %v5582_v48, %v5544_v30 }
0x5039   :  { %v5586_v51 = vsel %vm1879_vm8, %v5584_v37, %v5554_v44 }
0x503a   :  { %v5492_v40 = vcombine.high %v5491_v29, %v5491_v29  ;;  %v5499_v43 = vrot.slane %v5491_v29, %v7713_v11 }
0x503c   :  { %v5506_v12 = vrot.slane %v5492_v40, %v7713_v11  ;;  %v5570_v7 = vrot.slane %v5499_v43, %v7722_v21  ;;  %v5588_v11 = vsel %vm1882_vm9, %v5586_v51, %v5564_v18 }
0x503e   :  { %v5574_v19 = vrot.slane %v5506_v12, %v7722_v21  ;;  %v5589_v55 = vsel %vm1885_vm10, %v5587_v41, %v5570_v7 }
0x503f   :  { %5591 = vst.msk [vmem:[#allocation7] sm:$0xff] %vm113_vm1, %v5589_v55 }
0x5040   :  { %v5590_v2 = vsel %vm1885_vm10, %v5588_v11, %v5574_v19 }
0x5041   :  { %5592 = vst.msk [vmem:[#allocation7 + $0x8] sm:$0xff] %vm113_vm1, %v5590_v2 }
0x5042   :  { %7173 = shalt.err (!%p7170_p6)
}
0x5043   :  { %s7174_s2 = scalar_lea.hbm %s8576_s10, 256 }
0x5044   :  { %p7175_p7 = scmp.ne.s32.totalorder %s8576_s10, %s7174_s2  ;;  %p7178_p8 = scmp.lt.u32.totalorder %s7174_s2, %s8576_s10 }
0x5046   :  { %p7180_p9 = pnand %p7178_p8, %p7175_p7 }
0x5048   :  { %7183 = shalt.err (!%p7180_p9)
}
0x5049   :  { %5604 = dma.vmem_to_hbm [thread:$0]  %s5599_s5, 256, %s8576_s10, [#allocation4], %s7191_s23, %s7191_s23, %s7192_s24  }
0x504a   :  { %7188 = dma.done.wait [#allocation4], 256  }
0x504b   :  { %7189 = vsyncadd [#allocation4], 4294967040 }
0x504c   :  { %5608 = vsyncpa [#allocation3], 1 }
0x504d   :  { %5609 = vsyncpa [#allocation6], 1 }
0x504e   :  { %5610 = vsyncpa [#allocation4], 1 }

</bundles_post_ra>
